<compile_context>
chip_gen: v5e
topology: v5e:2x2
jax: 0.10.0
libtpu: 0.0.40
codegen_flags: <defaults>
</compile_context>

<pallas_src>
import math

import numpy as np
import jax
import jax.numpy as jnp
from jax.experimental import pallas as pl
from jax.experimental.pallas import tpu as pltpu

EPS = 1e-5  # PyTorch GroupNorm default eps


# ----------------------------------------------------------------------------
# In-kernel GroupNorm over one sample laid out as [H*W, C]
# ----------------------------------------------------------------------------
def _group_norm(y, gamma, beta, smat, inv_count):
    """GroupNorm for one sample flattened to [hw, C] (f32 in / f32 out).

    Sum over hw first (XLU reduce), then broadcast within-group channel sums with
    a tiny [1, C] @ [C, C] matmul (`smat` is the 0/1 same-group matrix).  Two-pass
    (subtract-mean) variance; affine folded into a single scale/shift.
    """
    rowsum = jnp.sum(y, axis=0, keepdims=True)                                # [1, C]
    mean = jnp.dot(rowsum, smat, preferred_element_type=jnp.float32) * inv_count
    yc = y - mean                                                             # [hw, C]
    rowsq = jnp.sum(yc * yc, axis=0, keepdims=True)                           # [1, C]
    var = jnp.dot(rowsq, smat, preferred_element_type=jnp.float32) * inv_count
    scale = jax.lax.rsqrt(var + EPS) * gamma
    return yc * scale + beta


def _conv3x3(tap_fn, w_ref, c_in, c_out, hw, xcat_ref):
    """3x3 conv of 9 gathered bf16 taps against w_ref [9*c_in, c_out] (bf16).

    If `xcat_ref` (VMEM scratch [hw, 9*c_in]) is provided, taps are packed into
    the contraction dim and a single long-K MXU matmul is issued; otherwise 9
    accumulated dots are used (when c_in is not 128-lane aligned).
    Returns (f32 accumulator [hw, c_out], center tap [hw, c_in] bf16).
    """
    center = None
    if xcat_ref is not None:
        for t in range(9):
            tap = tap_fn(t)
            if t == 4:
                center = tap
            xcat_ref[:, t * c_in:(t + 1) * c_in] = tap
        acc = jnp.dot(xcat_ref[...], w_ref[...], preferred_element_type=jnp.float32)
    else:
        acc = jnp.zeros((hw, c_out), jnp.float32)
        for t in range(9):
            tap = tap_fn(t)
            if t == 4:
                center = tap
            acc = acc + jnp.dot(tap, w_ref[t * c_in:(t + 1) * c_in, :],
                                preferred_element_type=jnp.float32)
    return acc, center


# ----------------------------------------------------------------------------
# Fused PostRes kernel (one whole sample per grid step)
# ----------------------------------------------------------------------------
def _make_postres_kernel(stride, ho, wo, c_in, c_out, groups, use_down, act,
                         fold1, fold2):
    hw = ho * wo
    inv_cnt = 1.0 / float((c_out // groups) * hw)

    def kernel(*refs):
        it = iter(refs)
        xph_ref = next(it)         # [s*s, Hq, Wq, c_in]  bf16 padded, phase-decomposed x
        w1_ref = next(it)          # [9*c_in, c_out]      bf16
        g1_ref = next(it)          # [1, c_out]           f32
        b1_ref = next(it)
        w2_ref = next(it)          # [9*c_out, c_out]     bf16
        g2_ref = next(it)
        b2_ref = next(it)
        smat_ref = next(it)        # [c_out, c_out]       f32 same-group matrix
        if use_down:
            wd_ref = next(it)      # [c_in, c_out]        bf16
            gd_ref = next(it)
            bd_ref = next(it)
        o_ref = next(it)           # [hw, c_out]          bf16
        hp_ref = next(it)          # [ho+2, wo+2, c_out]  bf16 scratch: padded conv1 out
        xcat1_ref = next(it) if fold1 else None
        xcat2_ref = next(it) if fold2 else None

        smat = smat_ref[...]

        # ---- conv1 (3x3, stride s): taps are contiguous slices of the phase slabs
        def tap1(t):
            dy, dx = divmod(t, 3)
            p = (dy % stride) * stride + (dx % stride)
            a, b = dy // stride, dx // stride
            v = xph_ref[p, a:a + ho, b:b + wo, :]            # [ho, wo, c_in]
            return v.reshape(hw, c_in)

        acc1, center = _conv3x3(tap1, w1_ref, c_in, c_out, hw, xcat1_ref)
        h = jnp.maximum(
            _group_norm(acc1, g1_ref[...], b1_ref[...], smat, inv_cnt), 0.0)

        # ---- padded conv1 output lives only in VMEM (no HBM round trip)
        hp_ref[...] = jnp.zeros_like(hp_ref)                 # re-zero halo each step
        hp_ref[1:1 + ho, 1:1 + wo, :] = h.reshape(ho, wo, c_out).astype(hp_ref.dtype)

        # ---- conv2 (3x3, stride 1) sliced from the padded scratch
        def tap2(t):
            dy, dx = divmod(t, 3)
            v = hp_ref[dy:dy + ho, dx:dx + wo, :]            # [ho, wo, c_out]
            return v.reshape(hw, c_out)

        acc2, _ = _conv3x3(tap2, w2_ref, c_out, c_out, hw, xcat2_ref)
        y2 = _group_norm(acc2, g2_ref[...], b2_ref[...], smat, inv_cnt)

        # ---- residual: conv1 center tap == x[::s, ::s], already resident in VMEM
        if use_down:
            rd = jnp.dot(center, wd_ref[...], preferred_element_type=jnp.float32)
            r = _group_norm(rd, gd_ref[...], bd_ref[...], smat, inv_cnt)
        else:
            r = center.astype(jnp.float32)                   # identity (c_in == c_out)

        out = y2 + r
        if act:
            out = jnp.maximum(out, 0.0)
        o_ref[...] = out.astype(o_ref.dtype)

    return kernel


# ----------------------------------------------------------------------------
# Host-side layout glue: pad by 1 (conv padding) + stride phase decomposition.
# Total bytes == bf16 x (no 9x im2col replication).
# ----------------------------------------------------------------------------
def _pad_and_phase(x_bf16, stride):
    n, h, w, c = x_bf16.shape
    hp = -(-(h + 2) // stride) * stride
    wp = -(-(w + 2) // stride) * stride
    xp = jnp.pad(x_bf16, ((0, 0), (1, hp - h - 1), (1, wp - w - 1), (0, 0)))
    hq, wq = hp // stride, wp // stride
    xph = xp.reshape(n, hq, stride, wq, stride, c)
    xph = jnp.transpose(xph, (0, 2, 4, 1, 3, 5)).reshape(n, stride * stride, hq, wq, c)
    # xph[n, p*stride+q, i, j, :] == xpad[n, stride*i + p, stride*j + q, :]
    return xph, hq, wq


# ----------------------------------------------------------------------------
# PostRes forward (NCHW in / NCHW out, matching the PyTorch module)
# ----------------------------------------------------------------------------
def post_res_forward(params, x_nchw, *, stride=1, act=True):
    groups = params["groups"]
    x = jnp.transpose(x_nchw, (0, 2, 3, 1)).astype(jnp.bfloat16)   # NHWC, bf16 first
    n, h, w, c_in = x.shape
    c_out = params["w1"].shape[-1]
    ho = (h - 1) // stride + 1
    wo = (w - 1) // stride + 1
    hw = ho * wo
    use_down = (stride != 1) or (c_in != c_out)
    fold1 = (c_in % 128 == 0)      # lane-aligned -> pack taps into K for conv1
    fold2 = (c_out % 128 == 0)     # idem for conv2

    xph, hq, wq = _pad_and_phase(x, stride)
    ss = stride * stride

    w1 = params["w1"].reshape(9 * c_in, c_out).astype(jnp.bfloat16)
    w2 = params["w2"].reshape(9 * c_out, c_out).astype(jnp.bfloat16)
    g1 = params["g1"].reshape(1, c_out).astype(jnp.float32)
    b1 = params["b1"].reshape(1, c_out).astype(jnp.float32)
    g2 = params["g2"].reshape(1, c_out).astype(jnp.float32)
    b2 = params["b2"].reshape(1, c_out).astype(jnp.float32)
    smat = params["smat"].astype(jnp.float32)

    in_specs = [
        pl.BlockSpec((None, ss, hq, wq, c_in), lambda i: (i, 0, 0, 0, 0)),
        pl.BlockSpec((9 * c_in, c_out), lambda i: (0, 0)),
        pl.BlockSpec((1, c_out), lambda i: (0, 0)),
        pl.BlockSpec((1, c_out), lambda i: (0, 0)),
        pl.BlockSpec((9 * c_out, c_out), lambda i: (0, 0)),
        pl.BlockSpec((1, c_out), lambda i: (0, 0)),
        pl.BlockSpec((1, c_out), lambda i: (0, 0)),
        pl.BlockSpec((c_out, c_out), lambda i: (0, 0)),
    ]
    args = [xph, w1, g1, b1, w2, g2, b2, smat]
    if use_down:
        in_specs += [
            pl.BlockSpec((c_in, c_out), lambda i: (0, 0)),
            pl.BlockSpec((1, c_out), lambda i: (0, 0)),
            pl.BlockSpec((1, c_out), lambda i: (0, 0)),
        ]
        args += [params["wd"].astype(jnp.bfloat16),
                 params["gd"].reshape(1, c_out).astype(jnp.float32),
                 params["bd"].reshape(1, c_out).astype(jnp.float32)]

    scratch_shapes = [pltpu.VMEM((ho + 2, wo + 2, c_out), jnp.bfloat16)]
    if fold1:
        scratch_shapes.append(pltpu.VMEM((hw, 9 * c_in), jnp.bfloat16))
    if fold2:
        scratch_shapes.append(pltpu.VMEM((hw, 9 * c_out), jnp.bfloat16))

    out = pl.pallas_call(
        _make_postres_kernel(stride, ho, wo, c_in, c_out, groups, use_down, act,
                             fold1, fold2),
        out_shape=jax.ShapeDtypeStruct((n, hw, c_out), jnp.bfloat16),
        grid=(n,),
        in_specs=in_specs,
        out_specs=pl.BlockSpec((None, hw, c_out), lambda i: (i, 0, 0)),
        scratch_shapes=scratch_shapes,
        compiler_params=pltpu.CompilerParams(
            dimension_semantics=("parallel",),
            vmem_limit_bytes=32 * 1024 * 1024),
    )(*args)

    return jnp.transpose(out.reshape(n, ho, wo, c_out), (0, 3, 1, 2)).astype(jnp.float32)


# ----------------------------------------------------------------------------
# Parameters (synthetic, deterministic).  Conv weights use the tap-major layout
# [9, Cin, Cout]; tap k = dy*3+dx corresponds to torch conv.weight[:, :, dy, dx].T
# ----------------------------------------------------------------------------
def init_postres_params(key, n_in, n_out, *, ng=32, use_down):
    groups = math.gcd(ng, n_out)
    ks = jax.random.split(key, 8)
    p = {
        "groups": groups,
        "w1": jax.random.normal(ks[0], (9, n_in, n_out), jnp.float32) / np.sqrt(9 * n_in),
        "g1": 1.0 + 0.1 * jax.random.normal(ks[1], (n_out,), jnp.float32),
        "b1": 0.1 * jax.random.normal(ks[2], (n_out,), jnp.float32),
        "w2": jax.random.normal(ks[3], (9, n_out, n_out), jnp.float32) / np.sqrt(9 * n_out),
        "g2": 1.0 + 0.1 * jax.random.normal(ks[4], (n_out,), jnp.float32),
        "b2": 0.1 * jax.random.normal(ks[5], (n_out,), jnp.float32),
    }
    if use_down:
        p["wd"] = jax.random.normal(ks[6], (n_in, n_out), jnp.float32) / np.sqrt(n_in)
        kgd, kbd = jax.random.split(ks[7])
        p["gd"] = 1.0 + 0.1 * jax.random.normal(kgd, (n_out,), jnp.float32)
        p["bd"] = 0.1 * jax.random.normal(kbd, (n_out,), jnp.float32)
    cg = n_out // groups
    gid = np.arange(n_out) // cg
    p["smat"] = jnp.asarray((gid[:, None] == gid[None, :]).astype(np.float32))
    return p


# ----------------------------------------------------------------------------
# Pure-JAX (XLA) reference in f32, for correctness checking
# ----------------------------------------------------------------------------
def post_res_reference(params, x_nchw, *, stride=1, act=True):
    groups = params["groups"]
    x = jnp.transpose(x_nchw, (0, 2, 3, 1)).astype(jnp.float32)
    c_in = x.shape[-1]
    c_out = params["w1"].shape[-1]

    def conv(inp, w_hwio, s, pad):
        return jax.lax.conv_general_dilated(
            inp, w_hwio, window_strides=(s, s), padding=pad,
            dimension_numbers=("NHWC", "HWIO", "NHWC"))

    def gn(y, gamma, beta):
        nn_, hh, ww, cc = y.shape
        yg = y.reshape(nn_, hh, ww, groups, cc // groups)
        mean = jnp.mean(yg, axis=(1, 2, 4), keepdims=True)
        var = jnp.mean((yg - mean) ** 2, axis=(1, 2, 4), keepdims=True)
        yn = ((yg - mean) / jnp.sqrt(var + EPS)).reshape(nn_, hh, ww, cc)
        return yn * gamma + beta

    w1 = params["w1"].reshape(3, 3, c_in, c_out)
    w2 = params["w2"].reshape(3, 3, c_out, c_out)
    out = jax.nn.relu(gn(conv(x, w1, stride, ((1, 1), (1, 1))), params["g1"], params["b1"]))
    out = gn(conv(out, w2, 1, ((1, 1), (1, 1))), params["g2"], params["b2"])
    if (stride != 1) or (c_in != c_out):
        wd = params["wd"].reshape(1, 1, c_in, c_out)
        r = gn(conv(x, wd, stride, ((0, 0), (0, 0))), params["gd"], params["bd"])
    else:
        r = x
    out = out + r
    if act:
        out = jax.nn.relu(out)
    return jnp.transpose(out, (0, 3, 1, 2))


# ----------------------------------------------------------------------------
# Demo
# ----------------------------------------------------------------------------
def _run_case(name, key, *, n, c_in, c_out, spatial, stride, ng, act):
    kp, kx = jax.random.split(key)
    use_down = (stride != 1) or (c_in != c_out)
    params = init_postres_params(kp, c_in, c_out, ng=ng, use_down=use_down)
    x = jax.random.normal(kx, (n, c_in, spatial, spatial), jnp.float32)

    out = jax.block_until_ready(post_res_forward(params, x, stride=stride, act=act))
    ref = post_res_reference(params, x, stride=stride, act=act)

    ho = (spatial - 1) // stride + 1
    assert out.shape == (n, c_out, ho, ho), (name, out.shape)
    assert bool(jnp.all(jnp.isfinite(out))), name
    err_max = float(jnp.max(jnp.abs(out - ref)))
    err_mean = float(jnp.mean(jnp.abs(out - ref)))
    # bf16 MXU operands / bf16 activations & output store; f32 accumulation & stats.
    assert err_max < 0.25, f"{name}: max |pallas - reference| = {err_max}"
    assert err_mean < 0.03, f"{name}: mean |pallas - reference| = {err_mean}"


if __name__ == "__main__":
    root = jax.random.PRNGKey(0)
    k1, k2 = jax.random.split(root)
    # Case 1: stride=2, n_in != n_out -> fused 1x1-conv+GN downsample residual path.
    _run_case("downsample", k1, n=2, c_in=64, c_out=128, spatial=16,
              stride=2, ng=32, act=True)
    # Case 2: stride=1, n_in == n_out -> identity residual, lane-dense C=128.
    _run_case("identity", k2, n=2, c_in=128, c_out=128, spatial=16,
              stride=1, ng=32, act=True)
    print("KERNEL_OK")
</pallas_src>

<mosaic_0001>
module attributes {stable_mosaic.version = 11 : i64} {
  func.func @kernel(%arg0: i32, %arg1: memref<1x4x9x9x64xbf16, #tpu.memory_space<vmem>>, %arg2: memref<576x128xbf16, #tpu.memory_space<vmem>>, %arg3: memref<1x128xf32, #tpu.memory_space<vmem>>, %arg4: memref<1x128xf32, #tpu.memory_space<vmem>>, %arg5: memref<1152x128xbf16, #tpu.memory_space<vmem>>, %arg6: memref<1x128xf32, #tpu.memory_space<vmem>>, %arg7: memref<1x128xf32, #tpu.memory_space<vmem>>, %arg8: memref<128x128xf32, #tpu.memory_space<vmem>>, %arg9: memref<64x128xbf16, #tpu.memory_space<vmem>>, %arg10: memref<1x128xf32, #tpu.memory_space<vmem>>, %arg11: memref<1x128xf32, #tpu.memory_space<vmem>>, %arg12: memref<1x64x128xbf16, #tpu.memory_space<vmem>>, %arg13: memref<10x10x128xbf16, #tpu.memory_space<vmem>>, %arg14: memref<64x1152xbf16, #tpu.memory_space<vmem>>) attributes {dimension_semantics = [#tpu.dimension_semantics<parallel>], iteration_bounds = array<i64: 2>, scalar_prefetch = 0 : i64, scratch_operands = 2 : i64, tpu.core_type = #tpu.core_type<tc>, window_params = [{transform_indices = @transform_0, window_bounds = array<i64: 1, 4, 9, 9, 64>}, {pipeline_mode = #tpu.pipeline_mode<synchronous>, transform_indices = @transform_1, window_bounds = array<i64: 576, 128>}, {pipeline_mode = #tpu.pipeline_mode<synchronous>, transform_indices = @transform_2, window_bounds = array<i64: 1, 128>}, {pipeline_mode = #tpu.pipeline_mode<synchronous>, transform_indices = @transform_3, window_bounds = array<i64: 1, 128>}, {pipeline_mode = #tpu.pipeline_mode<synchronous>, transform_indices = @transform_4, window_bounds = array<i64: 1152, 128>}, {pipeline_mode = #tpu.pipeline_mode<synchronous>, transform_indices = @transform_5, window_bounds = array<i64: 1, 128>}, {pipeline_mode = #tpu.pipeline_mode<synchronous>, transform_indices = @transform_6, window_bounds = array<i64: 1, 128>}, {pipeline_mode = #tpu.pipeline_mode<synchronous>, transform_indices = @transform_7, window_bounds = array<i64: 128, 128>}, {pipeline_mode = #tpu.pipeline_mode<synchronous>, transform_indices = @transform_8, window_bounds = array<i64: 64, 128>}, {pipeline_mode = #tpu.pipeline_mode<synchronous>, transform_indices = @transform_9, window_bounds = array<i64: 1, 128>}, {pipeline_mode = #tpu.pipeline_mode<synchronous>, transform_indices = @transform_10, window_bounds = array<i64: 1, 128>}, {transform_indices = @transform_11, window_bounds = array<i64: 1, 64, 128>}]} {
    %c0 = arith.constant 0 : index
    %c0_0 = arith.constant 0 : index
    %0 = vector.load %arg8[%c0, %c0_0] : memref<128x128xf32, #tpu.memory_space<vmem>>, vector<128x128xf32>
    %cst = arith.constant 0.000000e+00 : f32
    %1 = vector.broadcast %cst : f32 to vector<64x128xf32>
    %c0_1 = arith.constant 0 : index
    %c0_2 = arith.constant 0 : index
    %c0_3 = arith.constant 0 : index
    %c0_4 = arith.constant 0 : index
    %c0_5 = arith.constant 0 : index
    %2 = vector.load %arg1[%c0_1, %c0_2, %c0_3, %c0_4, %c0_5] : memref<1x4x9x9x64xbf16, #tpu.memory_space<vmem>>, vector<1x1x8x8x64xbf16>
    %3 = vector.shape_cast %2 : vector<1x1x8x8x64xbf16> to vector<8x8x64xbf16>
    %4 = vector.shape_cast %3 : vector<8x8x64xbf16> to vector<64x64xbf16>
    %c0_6 = arith.constant 0 : index
    %c0_7 = arith.constant 0 : index
    %5 = vector.load %arg2[%c0_6, %c0_7] : memref<576x128xbf16, #tpu.memory_space<vmem>>, vector<64x128xbf16>
    %cst_8 = arith.constant dense<0.000000e+00> : vector<64x128xf32>
    %6 = tpu.matmul %4, %5, %cst_8 {dimension_numbers = #tpu.dot_dimension_numbers<[1], [0], [0], [1], [0, 0, 1, 1], [], []>} : vector<64x64xbf16>, vector<64x128xbf16>, vector<64x128xf32> -> vector<64x128xf32>
    %7 = arith.addf %1, %6 : vector<64x128xf32>
    %c0_9 = arith.constant 0 : index
    %c1 = arith.constant 1 : index
    %c0_10 = arith.constant 0 : index
    %c0_11 = arith.constant 0 : index
    %c0_12 = arith.constant 0 : index
    %8 = vector.load %arg1[%c0_9, %c1, %c0_10, %c0_11, %c0_12] : memref<1x4x9x9x64xbf16, #tpu.memory_space<vmem>>, vector<1x1x8x8x64xbf16>
    %9 = vector.shape_cast %8 : vector<1x1x8x8x64xbf16> to vector<8x8x64xbf16>
    %10 = vector.shape_cast %9 : vector<8x8x64xbf16> to vector<64x64xbf16>
    %c64 = arith.constant 64 : index
    %c0_13 = arith.constant 0 : index
    %11 = vector.load %arg2[%c64, %c0_13] : memref<576x128xbf16, #tpu.memory_space<vmem>>, vector<64x128xbf16>
    %cst_14 = arith.constant dense<0.000000e+00> : vector<64x128xf32>
    %12 = tpu.matmul %10, %11, %cst_14 {dimension_numbers = #tpu.dot_dimension_numbers<[1], [0], [0], [1], [0, 0, 1, 1], [], []>} : vector<64x64xbf16>, vector<64x128xbf16>, vector<64x128xf32> -> vector<64x128xf32>
    %13 = arith.addf %7, %12 : vector<64x128xf32>
    %c0_15 = arith.constant 0 : index
    %c0_16 = arith.constant 0 : index
    %c0_17 = arith.constant 0 : index
    %c1_18 = arith.constant 1 : index
    %c0_19 = arith.constant 0 : index
    %14 = vector.load %arg1[%c0_15, %c0_16, %c0_17, %c1_18, %c0_19] : memref<1x4x9x9x64xbf16, #tpu.memory_space<vmem>>, vector<1x1x8x8x64xbf16>
    %15 = vector.shape_cast %14 : vector<1x1x8x8x64xbf16> to vector<8x8x64xbf16>
    %16 = vector.shape_cast %15 : vector<8x8x64xbf16> to vector<64x64xbf16>
    %c128 = arith.constant 128 : index
    %c0_20 = arith.constant 0 : index
    %17 = vector.load %arg2[%c128, %c0_20] : memref<576x128xbf16, #tpu.memory_space<vmem>>, vector<64x128xbf16>
    %cst_21 = arith.constant dense<0.000000e+00> : vector<64x128xf32>
    %18 = tpu.matmul %16, %17, %cst_21 {dimension_numbers = #tpu.dot_dimension_numbers<[1], [0], [0], [1], [0, 0, 1, 1], [], []>} : vector<64x64xbf16>, vector<64x128xbf16>, vector<64x128xf32> -> vector<64x128xf32>
    %19 = arith.addf %13, %18 : vector<64x128xf32>
    %c0_22 = arith.constant 0 : index
    %c2 = arith.constant 2 : index
    %c0_23 = arith.constant 0 : index
    %c0_24 = arith.constant 0 : index
    %c0_25 = arith.constant 0 : index
    %20 = vector.load %arg1[%c0_22, %c2, %c0_23, %c0_24, %c0_25] : memref<1x4x9x9x64xbf16, #tpu.memory_space<vmem>>, vector<1x1x8x8x64xbf16>
    %21 = vector.shape_cast %20 : vector<1x1x8x8x64xbf16> to vector<8x8x64xbf16>
    %22 = vector.shape_cast %21 : vector<8x8x64xbf16> to vector<64x64xbf16>
    %c192 = arith.constant 192 : index
    %c0_26 = arith.constant 0 : index
    %23 = vector.load %arg2[%c192, %c0_26] : memref<576x128xbf16, #tpu.memory_space<vmem>>, vector<64x128xbf16>
    %cst_27 = arith.constant dense<0.000000e+00> : vector<64x128xf32>
    %24 = tpu.matmul %22, %23, %cst_27 {dimension_numbers = #tpu.dot_dimension_numbers<[1], [0], [0], [1], [0, 0, 1, 1], [], []>} : vector<64x64xbf16>, vector<64x128xbf16>, vector<64x128xf32> -> vector<64x128xf32>
    %25 = arith.addf %19, %24 : vector<64x128xf32>
    %c0_28 = arith.constant 0 : index
    %c3 = arith.constant 3 : index
    %c0_29 = arith.constant 0 : index
    %c0_30 = arith.constant 0 : index
    %c0_31 = arith.constant 0 : index
    %26 = vector.load %arg1[%c0_28, %c3, %c0_29, %c0_30, %c0_31] : memref<1x4x9x9x64xbf16, #tpu.memory_space<vmem>>, vector<1x1x8x8x64xbf16>
    %27 = vector.shape_cast %26 : vector<1x1x8x8x64xbf16> to vector<8x8x64xbf16>
    %28 = vector.shape_cast %27 : vector<8x8x64xbf16> to vector<64x64xbf16>
    %c256 = arith.constant 256 : index
    %c0_32 = arith.constant 0 : index
    %29 = vector.load %arg2[%c256, %c0_32] : memref<576x128xbf16, #tpu.memory_space<vmem>>, vector<64x128xbf16>
    %cst_33 = arith.constant dense<0.000000e+00> : vector<64x128xf32>
    %30 = tpu.matmul %28, %29, %cst_33 {dimension_numbers = #tpu.dot_dimension_numbers<[1], [0], [0], [1], [0, 0, 1, 1], [], []>} : vector<64x64xbf16>, vector<64x128xbf16>, vector<64x128xf32> -> vector<64x128xf32>
    %31 = arith.addf %25, %30 : vector<64x128xf32>
    %c0_34 = arith.constant 0 : index
    %c2_35 = arith.constant 2 : index
    %c0_36 = arith.constant 0 : index
    %c1_37 = arith.constant 1 : index
    %c0_38 = arith.constant 0 : index
    %32 = vector.load %arg1[%c0_34, %c2_35, %c0_36, %c1_37, %c0_38] : memref<1x4x9x9x64xbf16, #tpu.memory_space<vmem>>, vector<1x1x8x8x64xbf16>
    %33 = vector.shape_cast %32 : vector<1x1x8x8x64xbf16> to vector<8x8x64xbf16>
    %34 = vector.shape_cast %33 : vector<8x8x64xbf16> to vector<64x64xbf16>
    %c320 = arith.constant 320 : index
    %c0_39 = arith.constant 0 : index
    %35 = vector.load %arg2[%c320, %c0_39] : memref<576x128xbf16, #tpu.memory_space<vmem>>, vector<64x128xbf16>
    %cst_40 = arith.constant dense<0.000000e+00> : vector<64x128xf32>
    %36 = tpu.matmul %34, %35, %cst_40 {dimension_numbers = #tpu.dot_dimension_numbers<[1], [0], [0], [1], [0, 0, 1, 1], [], []>} : vector<64x64xbf16>, vector<64x128xbf16>, vector<64x128xf32> -> vector<64x128xf32>
    %37 = arith.addf %31, %36 : vector<64x128xf32>
    %c0_41 = arith.constant 0 : index
    %c0_42 = arith.constant 0 : index
    %c1_43 = arith.constant 1 : index
    %c0_44 = arith.constant 0 : index
    %c0_45 = arith.constant 0 : index
    %38 = vector.load %arg1[%c0_41, %c0_42, %c1_43, %c0_44, %c0_45] : memref<1x4x9x9x64xbf16, #tpu.memory_space<vmem>>, vector<1x1x8x8x64xbf16>
    %39 = vector.shape_cast %38 : vector<1x1x8x8x64xbf16> to vector<8x8x64xbf16>
    %40 = vector.shape_cast %39 : vector<8x8x64xbf16> to vector<64x64xbf16>
    %c384 = arith.constant 384 : index
    %c0_46 = arith.constant 0 : index
    %41 = vector.load %arg2[%c384, %c0_46] : memref<576x128xbf16, #tpu.memory_space<vmem>>, vector<64x128xbf16>
    %cst_47 = arith.constant dense<0.000000e+00> : vector<64x128xf32>
    %42 = tpu.matmul %40, %41, %cst_47 {dimension_numbers = #tpu.dot_dimension_numbers<[1], [0], [0], [1], [0, 0, 1, 1], [], []>} : vector<64x64xbf16>, vector<64x128xbf16>, vector<64x128xf32> -> vector<64x128xf32>
    %43 = arith.addf %37, %42 : vector<64x128xf32>
    %c0_48 = arith.constant 0 : index
    %c1_49 = arith.constant 1 : index
    %c1_50 = arith.constant 1 : index
    %c0_51 = arith.constant 0 : index
    %c0_52 = arith.constant 0 : index
    %44 = vector.load %arg1[%c0_48, %c1_49, %c1_50, %c0_51, %c0_52] : memref<1x4x9x9x64xbf16, #tpu.memory_space<vmem>>, vector<1x1x8x8x64xbf16>
    %45 = vector.shape_cast %44 : vector<1x1x8x8x64xbf16> to vector<8x8x64xbf16>
    %46 = vector.shape_cast %45 : vector<8x8x64xbf16> to vector<64x64xbf16>
    %c448 = arith.constant 448 : index
    %c0_53 = arith.constant 0 : index
    %47 = vector.load %arg2[%c448, %c0_53] : memref<576x128xbf16, #tpu.memory_space<vmem>>, vector<64x128xbf16>
    %cst_54 = arith.constant dense<0.000000e+00> : vector<64x128xf32>
    %48 = tpu.matmul %46, %47, %cst_54 {dimension_numbers = #tpu.dot_dimension_numbers<[1], [0], [0], [1], [0, 0, 1, 1], [], []>} : vector<64x64xbf16>, vector<64x128xbf16>, vector<64x128xf32> -> vector<64x128xf32>
    %49 = arith.addf %43, %48 : vector<64x128xf32>
    %c0_55 = arith.constant 0 : index
    %c0_56 = arith.constant 0 : index
    %c1_57 = arith.constant 1 : index
    %c1_58 = arith.constant 1 : index
    %c0_59 = arith.constant 0 : index
    %50 = vector.load %arg1[%c0_55, %c0_56, %c1_57, %c1_58, %c0_59] : memref<1x4x9x9x64xbf16, #tpu.memory_space<vmem>>, vector<1x1x8x8x64xbf16>
    %51 = vector.shape_cast %50 : vector<1x1x8x8x64xbf16> to vector<8x8x64xbf16>
    %52 = vector.shape_cast %51 : vector<8x8x64xbf16> to vector<64x64xbf16>
    %c512 = arith.constant 512 : index
    %c0_60 = arith.constant 0 : index
    %53 = vector.load %arg2[%c512, %c0_60] : memref<576x128xbf16, #tpu.memory_space<vmem>>, vector<64x128xbf16>
    %cst_61 = arith.constant dense<0.000000e+00> : vector<64x128xf32>
    %54 = tpu.matmul %52, %53, %cst_61 {dimension_numbers = #tpu.dot_dimension_numbers<[1], [0], [0], [1], [0, 0, 1, 1], [], []>} : vector<64x64xbf16>, vector<64x128xbf16>, vector<64x128xf32> -> vector<64x128xf32>
    %55 = arith.addf %49, %54 : vector<64x128xf32>
    %c0_62 = arith.constant 0 : index
    %c0_63 = arith.constant 0 : index
    %56 = vector.load %arg3[%c0_62, %c0_63] : memref<1x128xf32, #tpu.memory_space<vmem>>, vector<1x128xf32>
    %c0_64 = arith.constant 0 : index
    %c0_65 = arith.constant 0 : index
    %57 = vector.load %arg4[%c0_64, %c0_65] : memref<1x128xf32, #tpu.memory_space<vmem>>, vector<1x128xf32>
    %cst_66 = arith.constant dense<0.000000e+00> : vector<128xf32>
    %58 = vector.multi_reduction <add>, %55, %cst_66 [0] : vector<64x128xf32> to vector<128xf32>
    %59 = vector.shape_cast %58 : vector<128xf32> to vector<1x128xf32>
    %cst_67 = arith.constant dense<0.000000e+00> : vector<1x128xf32>
    %60 = tpu.matmul %59, %0, %cst_67 {dimension_numbers = #tpu.dot_dimension_numbers<[1], [0], [0], [1], [0, 0, 1, 1], [], []>} : vector<1x128xf32>, vector<128x128xf32>, vector<1x128xf32> -> vector<1x128xf32>
    %cst_68 = arith.constant 3.906250e-03 : f32
    %61 = vector.broadcast %cst_68 : f32 to vector<1x128xf32>
    %62 = arith.mulf %60, %61 : vector<1x128xf32>
    %63 = vector.broadcast %62 : vector<1x128xf32> to vector<64x128xf32>
    %64 = arith.subf %55, %63 : vector<64x128xf32>
    %65 = arith.mulf %64, %64 : vector<64x128xf32>
    %cst_69 = arith.constant dense<0.000000e+00> : vector<128xf32>
    %66 = vector.multi_reduction <add>, %65, %cst_69 [0] : vector<64x128xf32> to vector<128xf32>
    %67 = vector.shape_cast %66 : vector<128xf32> to vector<1x128xf32>
    %cst_70 = arith.constant dense<0.000000e+00> : vector<1x128xf32>
    %68 = tpu.matmul %67, %0, %cst_70 {dimension_numbers = #tpu.dot_dimension_numbers<[1], [0], [0], [1], [0, 0, 1, 1], [], []>} : vector<1x128xf32>, vector<128x128xf32>, vector<1x128xf32> -> vector<1x128xf32>
    %cst_71 = arith.constant 3.906250e-03 : f32
    %69 = vector.broadcast %cst_71 : f32 to vector<1x128xf32>
    %70 = arith.mulf %68, %69 : vector<1x128xf32>
    %cst_72 = arith.constant 9.99999974E-6 : f32
    %71 = vector.broadcast %cst_72 : f32 to vector<1x128xf32>
    %72 = arith.addf %70, %71 : vector<1x128xf32>
    %73 = math.rsqrt %72 : vector<1x128xf32>
    %74 = arith.mulf %73, %56 : vector<1x128xf32>
    %75 = vector.broadcast %74 : vector<1x128xf32> to vector<64x128xf32>
    %76 = arith.mulf %64, %75 : vector<64x128xf32>
    %77 = vector.broadcast %57 : vector<1x128xf32> to vector<64x128xf32>
    %78 = arith.addf %76, %77 : vector<64x128xf32>
    %cst_73 = arith.constant 0.000000e+00 : f32
    %79 = vector.broadcast %cst_73 : f32 to vector<64x128xf32>
    %80 = arith.maximumf %78, %79 : vector<64x128xf32>
    %cst_74 = arith.constant 0.000000e+00 : bf16
    %81 = vector.broadcast %cst_74 : bf16 to vector<10x10x128xbf16>
    %c0_75 = arith.constant 0 : index
    %c0_76 = arith.constant 0 : index
    %c0_77 = arith.constant 0 : index
    %82 = vector.load %arg13[%c0_75, %c0_76, %c0_77] : memref<10x10x128xbf16, #tpu.memory_space<vmem>>, vector<10x10x128xbf16>
    tpu.vector_store %arg13[%c0_75, %c0_76, %c0_77], %81 {strides = array<i32>} : memref<10x10x128xbf16, #tpu.memory_space<vmem>>, vector<10x10x128xbf16>,
    %83 = vector.shape_cast %80 : vector<64x128xf32> to vector<8x8x128xf32>
    %84 = arith.truncf %83 : vector<8x8x128xf32> to vector<8x8x128xbf16>
    %c1_78 = arith.constant 1 : index
    %c1_79 = arith.constant 1 : index
    %c0_80 = arith.constant 0 : index
    %85 = vector.load %arg13[%c1_78, %c1_79, %c0_80] : memref<10x10x128xbf16, #tpu.memory_space<vmem>>, vector<8x8x128xbf16>
    tpu.vector_store %arg13[%c1_78, %c1_79, %c0_80], %84 {strides = array<i32>} : memref<10x10x128xbf16, #tpu.memory_space<vmem>>, vector<8x8x128xbf16>,
    %c0_81 = arith.constant 0 : index
    %c0_82 = arith.constant 0 : index
    %c0_83 = arith.constant 0 : index
    %86 = vector.load %arg13[%c0_81, %c0_82, %c0_83] : memref<10x10x128xbf16, #tpu.memory_space<vmem>>, vector<8x8x128xbf16>
    %87 = vector.shape_cast %86 : vector<8x8x128xbf16> to vector<64x128xbf16>
    %c0_84 = arith.constant 0 : index
    %c0_85 = arith.constant 0 : index
    %88 = vector.load %arg14[%c0_84, %c0_85] : memref<64x1152xbf16, #tpu.memory_space<vmem>>, vector<64x128xbf16>
    tpu.vector_store %arg14[%c0_84, %c0_85], %87 {strides = array<i32>} : memref<64x1152xbf16, #tpu.memory_space<vmem>>, vector<64x128xbf16>,
    %c0_86 = arith.constant 0 : index
    %c1_87 = arith.constant 1 : index
    %c0_88 = arith.constant 0 : index
    %89 = vector.load %arg13[%c0_86, %c1_87, %c0_88] : memref<10x10x128xbf16, #tpu.memory_space<vmem>>, vector<8x8x128xbf16>
    %90 = vector.shape_cast %89 : vector<8x8x128xbf16> to vector<64x128xbf16>
    %c0_89 = arith.constant 0 : index
    %c128_90 = arith.constant 128 : index
    %91 = vector.load %arg14[%c0_89, %c128_90] : memref<64x1152xbf16, #tpu.memory_space<vmem>>, vector<64x128xbf16>
    tpu.vector_store %arg14[%c0_89, %c128_90], %90 {strides = array<i32>} : memref<64x1152xbf16, #tpu.memory_space<vmem>>, vector<64x128xbf16>,
    %c0_91 = arith.constant 0 : index
    %c2_92 = arith.constant 2 : index
    %c0_93 = arith.constant 0 : index
    %92 = vector.load %arg13[%c0_91, %c2_92, %c0_93] : memref<10x10x128xbf16, #tpu.memory_space<vmem>>, vector<8x8x128xbf16>
    %93 = vector.shape_cast %92 : vector<8x8x128xbf16> to vector<64x128xbf16>
    %c0_94 = arith.constant 0 : index
    %c256_95 = arith.constant 256 : index
    %94 = vector.load %arg14[%c0_94, %c256_95] : memref<64x1152xbf16, #tpu.memory_space<vmem>>, vector<64x128xbf16>
    tpu.vector_store %arg14[%c0_94, %c256_95], %93 {strides = array<i32>} : memref<64x1152xbf16, #tpu.memory_space<vmem>>, vector<64x128xbf16>,
    %c1_96 = arith.constant 1 : index
    %c0_97 = arith.constant 0 : index
    %c0_98 = arith.constant 0 : index
    %95 = vector.load %arg13[%c1_96, %c0_97, %c0_98] : memref<10x10x128xbf16, #tpu.memory_space<vmem>>, vector<8x8x128xbf16>
    %96 = vector.shape_cast %95 : vector<8x8x128xbf16> to vector<64x128xbf16>
    %c0_99 = arith.constant 0 : index
    %c384_100 = arith.constant 384 : index
    %97 = vector.load %arg14[%c0_99, %c384_100] : memref<64x1152xbf16, #tpu.memory_space<vmem>>, vector<64x128xbf16>
    tpu.vector_store %arg14[%c0_99, %c384_100], %96 {strides = array<i32>} : memref<64x1152xbf16, #tpu.memory_space<vmem>>, vector<64x128xbf16>,
    %c1_101 = arith.constant 1 : index
    %c1_102 = arith.constant 1 : index
    %c0_103 = arith.constant 0 : index
    %98 = vector.load %arg13[%c1_101, %c1_102, %c0_103] : memref<10x10x128xbf16, #tpu.memory_space<vmem>>, vector<8x8x128xbf16>
    %99 = vector.shape_cast %98 : vector<8x8x128xbf16> to vector<64x128xbf16>
    %c0_104 = arith.constant 0 : index
    %c512_105 = arith.constant 512 : index
    %100 = vector.load %arg14[%c0_104, %c512_105] : memref<64x1152xbf16, #tpu.memory_space<vmem>>, vector<64x128xbf16>
    tpu.vector_store %arg14[%c0_104, %c512_105], %99 {strides = array<i32>} : memref<64x1152xbf16, #tpu.memory_space<vmem>>, vector<64x128xbf16>,
    %c1_106 = arith.constant 1 : index
    %c2_107 = arith.constant 2 : index
    %c0_108 = arith.constant 0 : index
    %101 = vector.load %arg13[%c1_106, %c2_107, %c0_108] : memref<10x10x128xbf16, #tpu.memory_space<vmem>>, vector<8x8x128xbf16>
    %102 = vector.shape_cast %101 : vector<8x8x128xbf16> to vector<64x128xbf16>
    %c0_109 = arith.constant 0 : index
    %c640 = arith.constant 640 : index
    %103 = vector.load %arg14[%c0_109, %c640] : memref<64x1152xbf16, #tpu.memory_space<vmem>>, vector<64x128xbf16>
    tpu.vector_store %arg14[%c0_109, %c640], %102 {strides = array<i32>} : memref<64x1152xbf16, #tpu.memory_space<vmem>>, vector<64x128xbf16>,
    %c2_110 = arith.constant 2 : index
    %c0_111 = arith.constant 0 : index
    %c0_112 = arith.constant 0 : index
    %104 = vector.load %arg13[%c2_110, %c0_111, %c0_112] : memref<10x10x128xbf16, #tpu.memory_space<vmem>>, vector<8x8x128xbf16>
    %105 = vector.shape_cast %104 : vector<8x8x128xbf16> to vector<64x128xbf16>
    %c0_113 = arith.constant 0 : index
    %c768 = arith.constant 768 : index
    %106 = vector.load %arg14[%c0_113, %c768] : memref<64x1152xbf16, #tpu.memory_space<vmem>>, vector<64x128xbf16>
    tpu.vector_store %arg14[%c0_113, %c768], %105 {strides = array<i32>} : memref<64x1152xbf16, #tpu.memory_space<vmem>>, vector<64x128xbf16>,
    %c2_114 = arith.constant 2 : index
    %c1_115 = arith.constant 1 : index
    %c0_116 = arith.constant 0 : index
    %107 = vector.load %arg13[%c2_114, %c1_115, %c0_116] : memref<10x10x128xbf16, #tpu.memory_space<vmem>>, vector<8x8x128xbf16>
    %108 = vector.shape_cast %107 : vector<8x8x128xbf16> to vector<64x128xbf16>
    %c0_117 = arith.constant 0 : index
    %c896 = arith.constant 896 : index
    %109 = vector.load %arg14[%c0_117, %c896] : memref<64x1152xbf16, #tpu.memory_space<vmem>>, vector<64x128xbf16>
    tpu.vector_store %arg14[%c0_117, %c896], %108 {strides = array<i32>} : memref<64x1152xbf16, #tpu.memory_space<vmem>>, vector<64x128xbf16>,
    %c2_118 = arith.constant 2 : index
    %c2_119 = arith.constant 2 : index
    %c0_120 = arith.constant 0 : index
    %110 = vector.load %arg13[%c2_118, %c2_119, %c0_120] : memref<10x10x128xbf16, #tpu.memory_space<vmem>>, vector<8x8x128xbf16>
    %111 = vector.shape_cast %110 : vector<8x8x128xbf16> to vector<64x128xbf16>
    %c0_121 = arith.constant 0 : index
    %c1024 = arith.constant 1024 : index
    %112 = vector.load %arg14[%c0_121, %c1024] : memref<64x1152xbf16, #tpu.memory_space<vmem>>, vector<64x128xbf16>
    tpu.vector_store %arg14[%c0_121, %c1024], %111 {strides = array<i32>} : memref<64x1152xbf16, #tpu.memory_space<vmem>>, vector<64x128xbf16>,
    %c0_122 = arith.constant 0 : index
    %c0_123 = arith.constant 0 : index
    %113 = vector.load %arg14[%c0_122, %c0_123] : memref<64x1152xbf16, #tpu.memory_space<vmem>>, vector<64x1152xbf16>
    %c0_124 = arith.constant 0 : index
    %c0_125 = arith.constant 0 : index
    %114 = vector.load %arg5[%c0_124, %c0_125] : memref<1152x128xbf16, #tpu.memory_space<vmem>>, vector<1152x128xbf16>
    %cst_126 = arith.constant dense<0.000000e+00> : vector<64x128xf32>
    %115 = tpu.matmul %113, %114, %cst_126 {dimension_numbers = #tpu.dot_dimension_numbers<[1], [0], [0], [1], [0, 0, 1, 1], [], []>} : vector<64x1152xbf16>, vector<1152x128xbf16>, vector<64x128xf32> -> vector<64x128xf32>
    %c0_127 = arith.constant 0 : index
    %c0_128 = arith.constant 0 : index
    %116 = vector.load %arg6[%c0_127, %c0_128] : memref<1x128xf32, #tpu.memory_space<vmem>>, vector<1x128xf32>
    %c0_129 = arith.constant 0 : index
    %c0_130 = arith.constant 0 : index
    %117 = vector.load %arg7[%c0_129, %c0_130] : memref<1x128xf32, #tpu.memory_space<vmem>>, vector<1x128xf32>
    %cst_131 = arith.constant dense<0.000000e+00> : vector<128xf32>
    %118 = vector.multi_reduction <add>, %115, %cst_131 [0] : vector<64x128xf32> to vector<128xf32>
    %119 = vector.shape_cast %118 : vector<128xf32> to vector<1x128xf32>
    %cst_132 = arith.constant dense<0.000000e+00> : vector<1x128xf32>
    %120 = tpu.matmul %119, %0, %cst_132 {dimension_numbers = #tpu.dot_dimension_numbers<[1], [0], [0], [1], [0, 0, 1, 1], [], []>} : vector<1x128xf32>, vector<128x128xf32>, vector<1x128xf32> -> vector<1x128xf32>
    %cst_133 = arith.constant 3.906250e-03 : f32
    %121 = vector.broadcast %cst_133 : f32 to vector<1x128xf32>
    %122 = arith.mulf %120, %121 : vector<1x128xf32>
    %123 = vector.broadcast %122 : vector<1x128xf32> to vector<64x128xf32>
    %124 = arith.subf %115, %123 : vector<64x128xf32>
    %125 = arith.mulf %124, %124 : vector<64x128xf32>
    %cst_134 = arith.constant dense<0.000000e+00> : vector<128xf32>
    %126 = vector.multi_reduction <add>, %125, %cst_134 [0] : vector<64x128xf32> to vector<128xf32>
    %127 = vector.shape_cast %126 : vector<128xf32> to vector<1x128xf32>
    %cst_135 = arith.constant dense<0.000000e+00> : vector<1x128xf32>
    %128 = tpu.matmul %127, %0, %cst_135 {dimension_numbers = #tpu.dot_dimension_numbers<[1], [0], [0], [1], [0, 0, 1, 1], [], []>} : vector<1x128xf32>, vector<128x128xf32>, vector<1x128xf32> -> vector<1x128xf32>
    %cst_136 = arith.constant 3.906250e-03 : f32
    %129 = vector.broadcast %cst_136 : f32 to vector<1x128xf32>
    %130 = arith.mulf %128, %129 : vector<1x128xf32>
    %cst_137 = arith.constant 9.99999974E-6 : f32
    %131 = vector.broadcast %cst_137 : f32 to vector<1x128xf32>
    %132 = arith.addf %130, %131 : vector<1x128xf32>
    %133 = math.rsqrt %132 : vector<1x128xf32>
    %134 = arith.mulf %133, %116 : vector<1x128xf32>
    %135 = vector.broadcast %134 : vector<1x128xf32> to vector<64x128xf32>
    %136 = arith.mulf %124, %135 : vector<64x128xf32>
    %137 = vector.broadcast %117 : vector<1x128xf32> to vector<64x128xf32>
    %138 = arith.addf %136, %137 : vector<64x128xf32>
    %c0_138 = arith.constant 0 : index
    %c0_139 = arith.constant 0 : index
    %139 = vector.load %arg9[%c0_138, %c0_139] : memref<64x128xbf16, #tpu.memory_space<vmem>>, vector<64x128xbf16>
    %cst_140 = arith.constant dense<0.000000e+00> : vector<64x128xf32>
    %140 = tpu.matmul %28, %139, %cst_140 {dimension_numbers = #tpu.dot_dimension_numbers<[1], [0], [0], [1], [0, 0, 1, 1], [], []>} : vector<64x64xbf16>, vector<64x128xbf16>, vector<64x128xf32> -> vector<64x128xf32>
    %c0_141 = arith.constant 0 : index
    %c0_142 = arith.constant 0 : index
    %141 = vector.load %arg10[%c0_141, %c0_142] : memref<1x128xf32, #tpu.memory_space<vmem>>, vector<1x128xf32>
    %c0_143 = arith.constant 0 : index
    %c0_144 = arith.constant 0 : index
    %142 = vector.load %arg11[%c0_143, %c0_144] : memref<1x128xf32, #tpu.memory_space<vmem>>, vector<1x128xf32>
    %cst_145 = arith.constant dense<0.000000e+00> : vector<128xf32>
    %143 = vector.multi_reduction <add>, %140, %cst_145 [0] : vector<64x128xf32> to vector<128xf32>
    %144 = vector.shape_cast %143 : vector<128xf32> to vector<1x128xf32>
    %cst_146 = arith.constant dense<0.000000e+00> : vector<1x128xf32>
    %145 = tpu.matmul %144, %0, %cst_146 {dimension_numbers = #tpu.dot_dimension_numbers<[1], [0], [0], [1], [0, 0, 1, 1], [], []>} : vector<1x128xf32>, vector<128x128xf32>, vector<1x128xf32> -> vector<1x128xf32>
    %cst_147 = arith.constant 3.906250e-03 : f32
    %146 = vector.broadcast %cst_147 : f32 to vector<1x128xf32>
    %147 = arith.mulf %145, %146 : vector<1x128xf32>
    %148 = vector.broadcast %147 : vector<1x128xf32> to vector<64x128xf32>
    %149 = arith.subf %140, %148 : vector<64x128xf32>
    %150 = arith.mulf %149, %149 : vector<64x128xf32>
    %cst_148 = arith.constant dense<0.000000e+00> : vector<128xf32>
    %151 = vector.multi_reduction <add>, %150, %cst_148 [0] : vector<64x128xf32> to vector<128xf32>
    %152 = vector.shape_cast %151 : vector<128xf32> to vector<1x128xf32>
    %cst_149 = arith.constant dense<0.000000e+00> : vector<1x128xf32>
    %153 = tpu.matmul %152, %0, %cst_149 {dimension_numbers = #tpu.dot_dimension_numbers<[1], [0], [0], [1], [0, 0, 1, 1], [], []>} : vector<1x128xf32>, vector<128x128xf32>, vector<1x128xf32> -> vector<1x128xf32>
    %cst_150 = arith.constant 3.906250e-03 : f32
    %154 = vector.broadcast %cst_150 : f32 to vector<1x128xf32>
    %155 = arith.mulf %153, %154 : vector<1x128xf32>
    %cst_151 = arith.constant 9.99999974E-6 : f32
    %156 = vector.broadcast %cst_151 : f32 to vector<1x128xf32>
    %157 = arith.addf %155, %156 : vector<1x128xf32>
    %158 = math.rsqrt %157 : vector<1x128xf32>
    %159 = arith.mulf %158, %141 : vector<1x128xf32>
    %160 = vector.broadcast %159 : vector<1x128xf32> to vector<64x128xf32>
    %161 = arith.mulf %149, %160 : vector<64x128xf32>
    %162 = vector.broadcast %142 : vector<1x128xf32> to vector<64x128xf32>
    %163 = arith.addf %161, %162 : vector<64x128xf32>
    %164 = arith.addf %138, %163 : vector<64x128xf32>
    %cst_152 = arith.constant 0.000000e+00 : f32
    %165 = vector.broadcast %cst_152 : f32 to vector<64x128xf32>
    %166 = arith.maximumf %164, %165 : vector<64x128xf32>
    %167 = arith.truncf %166 : vector<64x128xf32> to vector<64x128xbf16>
    %c0_153 = arith.constant 0 : index
    %c0_154 = arith.constant 0 : index
    %c0_155 = arith.constant 0 : index
    %168 = vector.load %arg12[%c0_153, %c0_154, %c0_155] : memref<1x64x128xbf16, #tpu.memory_space<vmem>>, vector<1x64x128xbf16>
    %169 = vector.shape_cast %168 : vector<1x64x128xbf16> to vector<64x128xbf16>
    %170 = vector.shape_cast %167 : vector<64x128xbf16> to vector<1x64x128xbf16>
    tpu.vector_store %arg12[%c0_153, %c0_154, %c0_155], %170 {strides = array<i32>} : memref<1x64x128xbf16, #tpu.memory_space<vmem>>, vector<1x64x128xbf16>,
    return
  }
  func.func @transform_0(%arg0: i32) -> (i32, i32, i32, i32, i32) {
    %c0_i32 = arith.constant 0 : i32
    %c0_i32_0 = arith.constant 0 : i32
    %c0_i32_1 = arith.constant 0 : i32
    %c0_i32_2 = arith.constant 0 : i32
    %c0_i32_3 = arith.constant 0 : i32
    return %arg0, %c0_i32, %c0_i32_0, %c0_i32_1, %c0_i32_2 : i32, i32, i32, i32, i32
  }
  func.func @transform_1(%arg0: i32) -> (i32, i32) {
    %c0_i32 = arith.constant 0 : i32
    %c0_i32_0 = arith.constant 0 : i32
    %c0_i32_1 = arith.constant 0 : i32
    return %c0_i32, %c0_i32_0 : i32, i32
  }
  func.func @transform_2(%arg0: i32) -> (i32, i32) {
    %c0_i32 = arith.constant 0 : i32
    %c0_i32_0 = arith.constant 0 : i32
    %c0_i32_1 = arith.constant 0 : i32
    return %c0_i32, %c0_i32_0 : i32, i32
  }
  func.func @transform_3(%arg0: i32) -> (i32, i32) {
    %c0_i32 = arith.constant 0 : i32
    %c0_i32_0 = arith.constant 0 : i32
    %c0_i32_1 = arith.constant 0 : i32
    return %c0_i32, %c0_i32_0 : i32, i32
  }
  func.func @transform_4(%arg0: i32) -> (i32, i32) {
    %c0_i32 = arith.constant 0 : i32
    %c0_i32_0 = arith.constant 0 : i32
    %c0_i32_1 = arith.constant 0 : i32
    return %c0_i32, %c0_i32_0 : i32, i32
  }
  func.func @transform_5(%arg0: i32) -> (i32, i32) {
    %c0_i32 = arith.constant 0 : i32
    %c0_i32_0 = arith.constant 0 : i32
    %c0_i32_1 = arith.constant 0 : i32
    return %c0_i32, %c0_i32_0 : i32, i32
  }
  func.func @transform_6(%arg0: i32) -> (i32, i32) {
    %c0_i32 = arith.constant 0 : i32
    %c0_i32_0 = arith.constant 0 : i32
    %c0_i32_1 = arith.constant 0 : i32
    return %c0_i32, %c0_i32_0 : i32, i32
  }
  func.func @transform_7(%arg0: i32) -> (i32, i32) {
    %c0_i32 = arith.constant 0 : i32
    %c0_i32_0 = arith.constant 0 : i32
    %c0_i32_1 = arith.constant 0 : i32
    return %c0_i32, %c0_i32_0 : i32, i32
  }
  func.func @transform_8(%arg0: i32) -> (i32, i32) {
    %c0_i32 = arith.constant 0 : i32
    %c0_i32_0 = arith.constant 0 : i32
    %c0_i32_1 = arith.constant 0 : i32
    return %c0_i32, %c0_i32_0 : i32, i32
  }
  func.func @transform_9(%arg0: i32) -> (i32, i32) {
    %c0_i32 = arith.constant 0 : i32
    %c0_i32_0 = arith.constant 0 : i32
    %c0_i32_1 = arith.constant 0 : i32
    return %c0_i32, %c0_i32_0 : i32, i32
  }
  func.func @transform_10(%arg0: i32) -> (i32, i32) {
    %c0_i32 = arith.constant 0 : i32
    %c0_i32_0 = arith.constant 0 : i32
    %c0_i32_1 = arith.constant 0 : i32
    return %c0_i32, %c0_i32_0 : i32, i32
  }
  func.func @transform_11(%arg0: i32) -> (i32, i32, i32) {
    %c0_i32 = arith.constant 0 : i32
    %c0_i32_0 = arith.constant 0 : i32
    %c0_i32_1 = arith.constant 0 : i32
    return %arg0, %c0_i32, %c0_i32_0 : i32, i32, i32
  }
}

</mosaic_0001>

<bundles_post_ra>
// kernel: tpu_custom_call.1
= control target key start
LH: loop header
LB: loop body
LE: loop exit
PB: predicated region body
PF: predicated region fallthrough
CT: control target
= control target key end

     0   :  { %s6709_s0 = inlined_call_operand.vmem [shape: bf16[2,4,9,9,64], index: 0, kind: input, shape index: {}]   ;;  %s6710_s1 = inlined_call_operand.vmem [shape: bf16[576,128], index: 1, kind: input, shape index: {}]   ;;  %s6711_s2 = inlined_call_operand.vmem [shape: f32[1,128], index: 2, kind: input, shape index: {}]   ;;  %s6712_s3 = inlined_call_operand.vmem [shape: f32[1,128], index: 3, kind: input, shape index: {}]   ;;  %s6713_s4 = inlined_call_operand.vmem [shape: bf16[1152,128], index: 4, kind: input, shape index: {}]   ;;  %s6714_s5 = inlined_call_operand.vmem [shape: f32[1,128], index: 5, kind: input, shape index: {}]   ;;  %s6715_s6 = inlined_call_operand.vmem [shape: f32[1,128], index: 6, kind: input, shape index: {}]   ;;  %s6716_s7 = inlined_call_operand.hbm [shape: f32[128,128], index: 7, kind: input, shape index: {}]   ;;  %s6717_s8 = inlined_call_operand.vmem [shape: bf16[64,128], index: 8, kind: input, shape index: {}]   ;;  %s6718_s9 = inlined_call_operand.vmem [shape: f32[1,128], index: 9, kind: input, shape index: {}]   ;;  %s6719_s10 = inlined_call_operand.vmem [shape: f32[1,128], index: 10, kind: input, shape index: {}]   ;;  %s6720_s11 = inlined_call_operand.hbm [shape: bf16[2,64,128], index: 11, kind: output, shape index: {}]  }
   0x1   :  { %6721 = sst [smem:[#allocation10_spill]] %s6716_s7 }
   0x2   :  { %16 = vsyncpa [#allocation5], 0 }
   0x3   :  { %17 = vsyncpa [#allocation6], 0 }
   0x4   :  { %19 = vsyncpa [#allocation6 + $0x1], 0  ;;  %s5511_s17 = smov 0   ;;  %s5513_s18 = smov 0  }
   0x5   :  { %s5515_s19 = smov 0   ;;  %s5517_s20 = smov 0  }
   0x6 LB: > { %s5532_s21 = sadd.s32 4294967295, %s5443_s20   ;;  %s4225_s22 = sadd.s32 4294967294, %s5443_s20   ;;  %s5443_s20 = sphi %s5517_s20, %s6736_s20   ;;  %s5439_s19 = sphi %s5515_s19, %s6735_s19   ;;  %s5435_s18 = sphi %s5513_s18, %s6734_s18   ;;  %s5431_s17 = sphi %s5511_s17, %s6733_s17  }
   0x7   : > { %s5536_s23 = sadd.s32 1, %s5443_s20   ;;  %s268_s24 = sadd.s32 1, %s5439_s19 }
   0x8   : > { %s265_s25 = ssub.s32 %s5443_s20, %s5536_s23  ;;  %p278_p0 = scmp.ne.s32.totalorder %s5439_s19, %s5435_s18 }
   0x9   : > { %p266_p1 = scmp.eq.s32.totalorder %s265_s25, 0  ;;  %p279_p2 = scmp.eq.s32.totalorder %s5532_s21, 1 }
   0xa   : > { %p284_p3 = scmp.ne.s32.totalorder %s5435_s18, %s5431_s17  ;;  %p285_p4 = scmp.eq.s32.totalorder %s4225_s22, 1 }
   0xb   : > { %s5547_s26 = scalar_select %p266_p1, %s5439_s19, %s268_s24  }
   0xc   : > { %p5549_p5 = por %p279_p2, %p278_p0  ;;  %p5553_p6 = por %p285_p4, %p284_p3 }
   0xd   : > { %p4226_p7 = scmp.ge.s32.totalorder %s5443_s20, 1  ;;  %p292_p8 = scmp.lt.s32.totalorder %s5443_s20, 3 }
   0xe   : > { %p5281_p9 = scmp.eq.s32.totalorder %s5532_s21, 0  ;;  %s6724_s7 = sld [smem:[#allocation10_spill]] }
   0xf   : > { %p293_p10 = pnand %p4226_p7, %p292_p8  ;;  %s5445_s13 = smov [#allocation4]  }
  0x10   : > { %s323_s14 = sshll.u32 %s5445_s13, 4  ;;  %s5446_s15 = smov 128   ;;  %s324_s14 = int_to_ptr.vmem [resolvable:$true] %s323_s14 }
  0x11   : > { %p5273_p11 = pneg %p293_p10  ;;  %s5447_s16 = smov 8  }
  0x12   : > { %356 = sbr.rel (%p293_p10) target bundleno = 1613 (0x64d), region = 64 }
  0x13   : > { %p5274_p12 = pnand %p5281_p9, %p5273_p11 }
  0x14   : > { %s321_s12 = sshll.u32 %s6724_s7, 4  ;;  %s322_s12 = int_to_ptr.hbm [resolvable:$true] %s321_s12 }
  0x15   : > { %5276 = dma.hbm_to_vmem [thread:$0]  (!%p5274_p12), %s322_s12, 2048, %s324_s14, [#allocation5], %s5446_s15, %s5446_s15, %s5447_s16  }
  0x17   : > { %5422 = dma.done.wait (%p5281_p9), [#allocation5], 2048  }
  0x18   : > { %5424 = vsyncadd (%p5281_p9), [#allocation5], 4294965248  ;;  %p397_p13 = scmp.lt.s32.totalorder %s5532_s21, 1  ;;  %v5077_v0 = vld [vmem:[%s6710_s1 + $0x38] sm:$0xff]  ;;  %v5076_v3 = vld [vmem:[%s6710_s1 + $0x30] sm:$0xff]  ;;  %vm496_vm2 = vcmask 523264  }
  0x19   : > { %v5577_v1 = vld [vmem:[%s6710_s1 + $0x18] sm:$0xff]  ;;  %513 = vmatpush.bf16.msra.mxu0 %v5077_v0  ;;  %v5589_v4 = vld [vmem:[%s6710_s1 + $0x10] sm:$0xff]  ;;  %v5075_v6 = vld [vmem:[%s6710_s1 + $0x28] sm:$0xff]  ;;  %vm639_vm0 = vsmask.f32 3328  ;;  %vm1965_vm7 = vcmask 1043456  }
  0x1a   : > { %s398_s22 = scalar_select %p397_p13, %s5532_s21, 1  ;;  %v5081_v2 = vld [vmem:[%s6710_s1 + $0x58] sm:$0xff]  ;;  %5259 = vmatpush.bf16.msra.mxu3 %v5577_v1  ;;  %v5080_v5 = vld [vmem:[%s6710_s1 + $0x50] sm:$0xff]  ;;  %5258 = vmatpush.bf16.msra.mxu1 %v5577_v1  ;;  %vm640_vm1 = vsmask.f32 7440  ;;  %v5606_v7 = vld [vmem:[%s6710_s1 + $0x8] sm:$0xff] }
  0x1b   : > { %814 = vmatpush.bf16.msra.mxu2 %v5081_v2  ;;  %v5079_v14 = vld [vmem:[%s6710_s1 + $0x48] sm:$0xff]  ;;  %v5074_v19 = vld [vmem:[%s6710_s1 + $0x20] sm:$0xff]  ;;  %vm5635_vm3 = vmor %vm639_vm0, %vm640_vm1  ;;  %vm1966_vm8 = vsmask.f32 7938  ;;  %vm1972_vm9 = vsmask.f32 256 }
  0x1c   : > { %s5266_s24 = smul.u32 288, %s398_s22  ;;  %v5623_v20 = vld [vmem:[%s6710_s1] sm:$0xff]  ;;  %v5089_v41 = vld [vmem:[%s6710_s1 + $0x78] sm:$0xff]  ;;  %v5088_v59 = vld [vmem:[%s6710_s1 + $0x70] sm:$0xff]  ;;  %vm1971_vm10 = vcmask 1040384   ;;  %vm2211_vm13 = vcmask 1042432  }
  0x1d   : > { %514 = vmatpush.bf16.msra.mxu0 %v5076_v3  ;;  %v5078_v24 = vld [vmem:[%s6710_s1 + $0x40] sm:$0xff]  ;;  %vm6148_vm11 = vmand %vm1965_vm7, %vm1966_vm8  ;;  %vm2212_vm14 = vcmask 1046532   ;;  %s394_s29 = sand.u32 1, %s5435_s18   ;;  %s5234_s14 = sshll.u32 %s5532_s21, 5 }
  0x1e   : > { %s5594_s30 = scalar_lea.vmem %s6709_s0, %s5266_s24  ;;  %5261 = vmatpush.bf16.msra.mxu3 %v5589_v4  ;;  %5260 = vmatpush.bf16.msra.mxu1 %v5589_v4  ;;  %vm6157_vm12 = vmand %vm1971_vm10, %vm1972_vm9  ;;  %s4147_s24 = scalar_lea.hbm %s6720_s11, %s5234_s14 }
  0x1f   : > { %v623_v8 = vld [vmem:[%s5594_s30] sm:$0xf]  ;;  %v624_v9 = vld [vmem:[%s5594_s30 + $0x4] sm:$0x1]  ;;  %v625_v10 = vld [vmem:[%s5594_s30 + $0x8] sm:$0xf]  ;;  %815 = vmatpush.bf16.msra.mxu2 %v5080_v5 }
  0x20   : > { %v626_v11 = vld [vmem:[%s5594_s30 + $0xc] sm:$0x1]  ;;  %v643_v12 = vshrl.u32 %v623_v8, 16  ;;  %v646_v13 = vshll.u32 %v623_v8, 16  ;;  %v652_v15 = vshll.u32 %v624_v9, 16  ;;  %v657_v16 = vshrl.u32 %v625_v10, 16  ;;  %vm6251_vm15 = vmor %vm2211_vm13, %vm2212_vm14 }
  0x21   : > { %v660_v17 = vshll.u32 %v625_v10, 16  ;;  %v666_v18 = vshll.u32 %v626_v11, 16  ;;  %v4243_v21 = vld [vmem:[%s5594_s30 + $0x48] sm:$0xf]  ;;  %v5070_v25 = vld [vmem:[%s5594_s30 + $0x4c] sm:$0xf0]  ;;  %515 = vmatpush.bf16.msra.mxu0 %v5075_v6 }
  0x22   : > { %v645_v22 = vrot.slane %v643_v12, 4  ;;  %v648_v23 = vrot.slane %v646_v13, 5  ;;  %v4291_v26 = vld [vmem:[%s5594_s30 + $0x30] sm:$0xf]  ;;  %v659_v27 = vrot.slane %v657_v16, 4  ;;  %5263 = vmatpush.bf16.msra.mxu3 %v5606_v7  ;;  %v654_v32 = vrot.slane %v652_v15, 5  ;;  %5262 = vmatpush.bf16.msra.mxu1 %v5606_v7 }
  0x23   : > { %v662_v28 = vrot.slane %v660_v17, 5  ;;  %v5065_v29 = vld [vmem:[%s5594_s30 + $0x34] sm:$0xf0]  ;;  %v668_v33 = vrot.slane %v666_v18, 5  ;;  %v627_v34 = vld [vmem:[%s5594_s30 + $0x10] sm:$0xf]  ;;  %816 = vmatpush.bf16.msra.mxu2 %v5079_v14  ;;  %v4244_v39 = vor.u32 %v5070_v25, %v4243_v21 }
  0x24   : > { %v649_v31 = vor.u32 %v648_v23, %v645_v22  ;;  %v4283_v36 = vld [vmem:[%s5594_s30 + $0x10] sm:$0xf]  ;;  %v5063_v37 = vld [vmem:[%s5594_s30 + $0x14] sm:$0xf0]  ;;  %v671_v42 = vshrl.u32 %v627_v34, 16  ;;  %v674_v43 = vshll.u32 %v627_v34, 16  ;;  %v4292_v44 = vor.u32 %v5065_v29, %v4291_v26 }
  0x25   : > { %v663_v35 = vor.u32 %v662_v28, %v659_v27  ;;  %v629_v38 = vld [vmem:[%s5594_s30 + $0x18] sm:$0xf]  ;;  %516 = vmatpush.bf16.msra.mxu0 %v5074_v19  ;;  %v4284_v49 = vor.u32 %v5063_v37, %v4283_v36  ;;  %v628_v50 = vld [vmem:[%s5594_s30 + $0x14] sm:$0x1]  ;;  %v630_v51 = vld [vmem:[%s5594_s30 + $0x1c] sm:$0x1] }
  0x26   : > { %v650_v40 = vrot.slane %v649_v31, 4  ;;  %v685_v46 = vshrl.u32 %v629_v38, 16  ;;  %v688_v47 = vshll.u32 %v629_v38, 16  ;;  %5265 = vmatpush.bf16.msra.mxu3 %v5623_v20  ;;  %v673_v52 = vrot.slane %v671_v42, 4  ;;  %5264 = vmatpush.bf16.msra.mxu1 %v5623_v20  ;;  %v631_v2 = vld [vmem:[%s5594_s30 + $0x20] sm:$0xf] }
  0x27   : > { %v664_v45 = vrot.slane %v663_v35, 4  ;;  %v676_v53 = vrot.slane %v674_v43, 5  ;;  %817 = vmatpush.bf16.msra.mxu2 %v5078_v24  ;;  %v680_v61 = vshll.u32 %v628_v50, 16  ;;  %v694_v63 = vshll.u32 %v630_v51, 16  ;;  %v633_v9 = vld [vmem:[%s5594_s30 + $0x28] sm:$0xf] }
  0x28   : > { %v655_v48 = vsel %vm5635_vm3, %v650_v40, %v654_v32  ;;  %v687_v56 = vrot.slane %v685_v46, 4  ;;  %v690_v57 = vrot.slane %v688_v47, 5  ;;  %4273 = vmatmul.msk.bf16.vlgmr.msra.gmra.mxu0 %vm496_vm2, %v4244_v39  ;;  %v4247_v10 = vld [vmem:[%s5594_s30 + $0x58] sm:$0xf]  ;;  %v5071_v11 = vld [vmem:[%s5594_s30 + $0x5c] sm:$0xf0] }
  0x29   : > { %598 = vmatpush.bf16.msrb.mxu0 %v5577_v1  ;;  %v669_v54 = vsel %vm5635_vm3, %v664_v45, %v668_v33  ;;  %v762_v55 = vunpack.c.l.b16 %v655_v48  ;;  %4312 = vmatmul.msk.bf16.vlgmr.msra.gmra.mxu3 %vm496_vm2, %v4292_v44  ;;  %v677_v60 = vor.u32 %v676_v53, %v673_v52  ;;  %v5087_v1 = vld [vmem:[%s6710_s1 + $0x68] sm:$0xff]  ;;  %v682_v5 = vrot.slane %v680_v61, 5  ;;  %v4343_v16 = vld [vmem:[%s5594_s30 + $0x90] sm:$0xf]  ;;  %v5082_v17 = vld [vmem:[%s5594_s30 + $0x94] sm:$0xf0] }
  0x2a   : > { %v763_v58 = vunpack.c.l.b16 %v669_v54  ;;  %924 = vmatpush.bf16.msrb.mxu3 %v5089_v41  ;;  %v691_v62 = vor.u32 %v690_v57, %v687_v56  ;;  %4310 = vmatmul.msk.bf16.vlgmr.msra.gmra.mxu1 %vm496_vm2, %v4284_v49  ;;  %v696_v8 = vrot.slane %v694_v63, 5  ;;  %v699_v12 = vshrl.u32 %v631_v2, 16  ;;  %v4287_v24 = vld [vmem:[%s5594_s30 + $0x20] sm:$0xf]  ;;  %v5064_v25 = vld [vmem:[%s5594_s30 + $0x24] sm:$0xf0] }
  0x2b   : > { %v678_v3 = vrot.slane %v677_v60, 4  ;;  %v702_v13 = vshll.u32 %v631_v2, 16  ;;  %v713_v18 = vshrl.u32 %v633_v9, 16  ;;  %v716_v19 = vshll.u32 %v633_v9, 16  ;;  %v632_v31 = vld [vmem:[%s5594_s30 + $0x24] sm:$0x1] }
  0x2c   : > { %v770_v0 = vpack.c.b16 %v763_v58, %v762_v55  ;;  %v692_v6 = vrot.slane %v691_v62, 4  ;;  %v4344_v23 = vor.u32 %v5082_v17, %v4343_v16  ;;  %v701_v26 = vrot.slane %v699_v12, 4  ;;  %v634_v32 = vld [vmem:[%s5594_s30 + $0x2c] sm:$0x1]  ;;  %v635_v38 = vld [vmem:[%s5594_s30 + $0x30] sm:$0xf] }
  0x2d   : > { %599 = vmatpush.bf16.msrb.mxu0 %v5589_v4  ;;  %v5086_v4 = vld [vmem:[%s6710_s1 + $0x60] sm:$0xff]  ;;  %v683_v14 = vsel %vm5635_vm3, %v678_v3, %v682_v5  ;;  %v704_v27 = vrot.slane %v702_v13, 5  ;;  %v715_v28 = vrot.slane %v713_v18, 4  ;;  %v718_v29 = vrot.slane %v716_v19, 5  ;;  %v5109_v39 = vld [vmem:[%s6710_s1 + $0xd8] sm:$0xff]  ;;  %v5116_v16 = vld [vmem:[%s6710_s1 + $0xf0] sm:$0xff] }
  0x2e   : > { %4329 = vmatmul.msk.bf16.vlgmr.msra.gmra.mxu2 %vm496_vm2, %v770_v0  ;;  %925 = vmatpush.bf16.msrb.mxu3 %v5088_v59  ;;  %v697_v15 = vsel %vm5635_vm3, %v692_v6, %v696_v8  ;;  %v764_v21 = vunpack.c.l.b16 %v683_v14  ;;  %v4288_v33 = vor.u32 %v5064_v25, %v4287_v24  ;;  %v708_v35 = vshll.u32 %v632_v31, 16  ;;  %v637_v44 = vld [vmem:[%s5594_s30 + $0x38] sm:$0xf]  ;;  %v4251_v49 = vld [vmem:[%s5594_s30 + $0x68] sm:$0xf]  ;;  %v5100_v17 = vld [vmem:[%s6710_s1 + $0xb0] sm:$0xff] }
  0x2f   : > { %v765_v22 = vunpack.c.l.b16 %v697_v15  ;;  %v719_v36 = vor.u32 %v718_v29, %v715_v28  ;;  %v722_v37 = vshll.u32 %v634_v32, 16  ;;  %1365 = vmatpush.bf16.msrb.mxu2 %v5109_v39  ;;  %v727_v45 = vshrl.u32 %v635_v38, 16  ;;  %v5072_v52 = vld [vmem:[%s5594_s30 + $0x6c] sm:$0xf0]  ;;  %v4347_v53 = vld [vmem:[%s5594_s30 + $0xa0] sm:$0xf] }
  0x30   : > { %v710_v41 = vrot.slane %v708_v35, 5  ;;  %v730_v46 = vshll.u32 %v635_v38, 16  ;;  %v741_v47 = vshrl.u32 %v637_v44, 16  ;;  %v744_v48 = vshll.u32 %v637_v44, 16  ;;  %v5083_v54 = vld [vmem:[%s5594_s30 + $0xa4] sm:$0xf0] }
  0x31   : > { %600 = vmatpush.bf16.msrb.mxu0 %v5606_v7  ;;  %v4248_v7 = vor.u32 %v5071_v11, %v4247_v10  ;;  %v771_v34 = vpack.c.b16 %v765_v22, %v764_v21  ;;  %v720_v42 = vrot.slane %v719_v36, 4  ;;  %v724_v43 = vrot.slane %v722_v37, 5  ;;  %v636_v59 = vld [vmem:[%s5594_s30 + $0x34] sm:$0x1]  ;;  %v638_v0 = vld [vmem:[%s5594_s30 + $0x3c] sm:$0x1] }
  0x32   : > { %926 = vmatpush.bf16.msrb.mxu3 %v5087_v1  ;;  %v729_v55 = vrot.slane %v727_v45, 4  ;;  %v732_v56 = vrot.slane %v730_v46, 5  ;;  %v743_v60 = vrot.slane %v741_v47, 4  ;;  %v746_v61 = vrot.slane %v744_v48, 5  ;;  %v5097_v8 = vld [vmem:[%s6710_s1 + $0x98] sm:$0xff]  ;;  %v5108_v10 = vld [vmem:[%s6710_s1 + $0xd0] sm:$0xff] }
  0x33   : > { %v725_v51 = vsel %vm5635_vm3, %v720_v42, %v724_v43  ;;  %v4252_v62 = vor.u32 %v5072_v52, %v4251_v49  ;;  %v4348_v63 = vor.u32 %v5083_v54, %v4347_v53  ;;  %v736_v1 = vshll.u32 %v636_v59, 16  ;;  %v5117_v9 = vld [vmem:[%s6710_s1 + $0xf8] sm:$0xff]  ;;  %v5096_v11 = vld [vmem:[%s6710_s1 + $0x90] sm:$0xff]  ;;  %1366 = vmatpush.bf16.msrb.mxu2 %v5108_v10  ;;  %v5107_v18 = vld [vmem:[%s6710_s1 + $0xc8] sm:$0xff]  ;;  %s4150_s22 = sshll.u32 %s4147_s24, 4  ;;  %s4136_s25 = scalar_lea.sflag [#allocation6], %s394_s29  ;;  %s4151_s22 = int_to_ptr.hbm [resolvable:$true] %s4150_s22 }
  0x34   : > { %v767_v58 = vunpack.c.l.b16 %v725_v51  ;;  %v733_v3 = vor.u32 %v732_v56, %v729_v55  ;;  %v747_v5 = vor.u32 %v746_v61, %v743_v60  ;;  %v750_v6 = vshll.u32 %v638_v0, 16  ;;  %v4255_v19 = vld [vmem:[%s5594_s30 + $0x78] sm:$0xf]  ;;  %v4351_v21 = vld [vmem:[%s5594_s30 + $0xb0] sm:$0xf]  ;;  %v5099_v29 = vld [vmem:[%s6710_s1 + $0xa8] sm:$0xff] }
  0x35   : > { %601 = vmatpush.bf16.msrb.mxu0 %v5623_v20  ;;  %v705_v20 = vor.u32 %v704_v27, %v701_v26  ;;  %v738_v13 = vrot.slane %v736_v1, 5  ;;  %v5084_v22 = vld [vmem:[%s5594_s30 + $0xb4] sm:$0xf0]  ;;  %v5115_v26 = vld [vmem:[%s6710_s1 + $0xe8] sm:$0xff]  ;;  %v4421_v27 = vld [vmem:[%s5594_s30 + $0x90] sm:$0xf] }
  0x36   : > { %927 = vmatpush.bf16.msrb.mxu3 %v5086_v4  ;;  %v5101_v4 = vld [vmem:[%s6710_s1 + $0xb8] sm:$0xff]  ;;  %v734_v12 = vrot.slane %v733_v3, 4  ;;  %v748_v14 = vrot.slane %v747_v5, 4  ;;  %v752_v15 = vrot.slane %v750_v6, 5  ;;  %v5106_v31 = vld [vmem:[%s6710_s1 + $0xc0] sm:$0xff]  ;;  %v1084_v32 = vshrl.u32 %v4421_v27, 16 }
  0x37   : > { %v706_v40 = vrot.slane %v705_v20, 4  ;;  %1255 = vmatpush.bf16.msrb.mxu1 %v5101_v4  ;;  %v4423_v28 = vld [vmem:[%s5594_s30 + $0x98] sm:$0xf]  ;;  %1367 = vmatpush.bf16.msrb.mxu2 %v5107_v18  ;;  %v5094_v35 = vld [vmem:[%s6710_s1 + $0x80] sm:$0xff]  ;;  %v4352_v43 = vor.u32 %v5084_v22, %v4351_v21  ;;  %v4422_v45 = vld [vmem:[%s5594_s30 + $0x94] sm:$0x1] }
  0x38   : > { %4274 = vmatmul.msk.bf16.gmra.mxu0 %vm496_vm2, %v4248_v7  ;;  %v5073_v7 = vld [vmem:[%s5594_s30 + $0x7c] sm:$0xf0]  ;;  %v739_v24 = vsel %vm5635_vm3, %v734_v12, %v738_v13  ;;  %v753_v25 = vsel %vm5635_vm3, %v748_v14, %v752_v15  ;;  %v1101_v20 = vshll.u32 %v4423_v28, 16  ;;  %v1086_v36 = vrot.slane %v1084_v32, 4  ;;  %v4424_v46 = vld [vmem:[%s5594_s30 + $0x9c] sm:$0x1] }
  0x39   : > { %4373 = vmatmul.msk.bf16.vlgmr.msrb.gmra.mxu3 %vm496_vm2, %v4344_v23  ;;  %v711_v50 = vsel %vm5635_vm3, %v706_v40, %v710_v41  ;;  %1034 = vmatpush.bf16.msra.mxu0 %v5097_v8  ;;  %v5095_v23 = vld [vmem:[%s6710_s1 + $0x88] sm:$0xff]  ;;  %v4256_v40 = vor.u32 %v5073_v7, %v4255_v19  ;;  %v768_v41 = vunpack.c.l.b16 %v739_v24  ;;  %v769_v42 = vunpack.c.l.b16 %v753_v25  ;;  %v5114_v44 = vld [vmem:[%s6710_s1 + $0xe0] sm:$0xff]  ;;  %v5102_v18 = vld [vmem:[%s5594_s30 + $0xc] sm:$0xf0]  ;;  %s5391_s13 = sshra.s32 %s4151_s22, 4  ;;  %s5397_s7 = scalar_lea.hbm %s6720_s11, 64  ;;  %s5392_s13 = int_to_ptr.hbm [resolvable:$true] %s5391_s13 }
  0x3a   : > { %4311 = vmatmul.msk.bf16.gmra.mxu1 %vm496_vm2, %v4288_v33  ;;  %v766_v57 = vunpack.c.l.b16 %v711_v50  ;;  %1475 = vmatpush.bf16.msra.mxu3 %v5117_v9  ;;  %v1087_v33 = vshll.u32 %v4421_v27, 16  ;;  %v1103_v39 = vrot.slane %v1101_v20, 5  ;;  %v1093_v48 = vshll.u32 %v4422_v45, 16  ;;  %v5098_v51 = vld [vmem:[%s6710_s1 + $0xa0] sm:$0xff]  ;;  %v5085_v3 = vld [vmem:[%s5594_s30 + $0xc4] sm:$0xf0]  ;;  %p5398_p3 = scmp.lt.s32.totalorder %s5392_s13, %s6720_s11 }
  0x3b   : > { %1256 = vmatpush.bf16.msrb.mxu1 %v5100_v17  ;;  %1368 = vmatpush.bf16.msrb.mxu2 %v5106_v31  ;;  %v1107_v50 = vshll.u32 %v4424_v46, 16  ;;  %v773_v56 = vpack.c.b16 %v769_v42, %v768_v41  ;;  %v4355_v0 = vld [vmem:[%s5594_s30 + $0xc0] sm:$0xf]  ;;  %v4426_v15 = vld [vmem:[%s5594_s30 + $0xa4] sm:$0x1]  ;;  %v5120_v32 = vld [vmem:[%s6710_s1 + $0x110] sm:$0xff] }
  0x3c   : > { %v772_v2 = vpack.c.b16 %v767_v58, %v766_v57  ;;  %v1089_v37 = vrot.slane %v1087_v33, 5  ;;  %v1095_v53 = vrot.slane %v1093_v48, 5  ;;  %v4425_v1 = vld [vmem:[%s5594_s30 + $0xa0] sm:$0xf]  ;;  %v4356_v14 = vor.u32 %v5085_v3, %v4355_v0  ;;  %v4467_v17 = vld [vmem:[%s5594_s30 + $0x8] sm:$0xf] }
  0x3d   : > { %1035 = vmatpush.bf16.msra.mxu0 %v5096_v11  ;;  %v1109_v55 = vrot.slane %v1107_v50, 5  ;;  %v1112_v5 = vshrl.u32 %v4425_v1, 16  ;;  %v1115_v6 = vshll.u32 %v4425_v1, 16  ;;  %v1121_v7 = vshll.u32 %v4426_v15, 16  ;;  %v5119_v0 = vld [vmem:[%s6710_s1 + $0x108] sm:$0xff]  ;;  %s5393_s12 = scalar_lea.hbm %s5392_s13, 32 }
  0x3e   : > { %4330 = vmatmul.msk.bf16.gmra.mxu2 %vm496_vm2, %v771_v34  ;;  %1476 = vmatpush.bf16.msra.mxu3 %v5116_v16  ;;  %v1098_v34 = vshrl.u32 %v4423_v28, 16  ;;  %v1090_v47 = vor.u32 %v1089_v37, %v1086_v36  ;;  %v4428_v16 = vld [vmem:[%s5594_s30 + $0xac] sm:$0x1]  ;;  %v4468_v28 = vor.u32 %v5102_v18, %v4467_v17  ;;  %v5090_v36 = vld [vmem:[%s5594_s30 + $0xdc] sm:$0xf0]  ;;  %p5394_p0 = scmp.ne.s32.totalorder %s5392_s13, %s5393_s12  ;;  %p5399_p4 = scmp.lt.s32.totalorder %s5397_s7, %s5393_s12 }
  0x3f   : > { %1257 = vmatpush.bf16.msrb.mxu1 %v5099_v29  ;;  %v1114_v4 = vrot.slane %v1112_v5, 4  ;;  %v1117_v10 = vrot.slane %v1115_v6, 5  ;;  %v1135_v22 = vshll.u32 %v4428_v16, 16  ;;  %v1123_v25 = vrot.slane %v1121_v7, 5  ;;  %v4511_v37 = vld [vmem:[%s5594_s30 + $0x50] sm:$0xf] }
  0x40   : > { %v1100_v38 = vrot.slane %v1098_v34, 4  ;;  %v1091_v52 = vrot.slane %v1090_v47, 4  ;;  %p5395_p1 = pnand %p5394_p0, %p5549_p5  ;;  %p5400_p7 = por %p5399_p4, %p5398_p3 }
  0x41   : > { %1036 = vmatpush.bf16.msra.mxu0 %v5095_v23  ;;  %v1118_v19 = vor.u32 %v1117_v10, %v1114_v4  ;;  %v5121_v23 = vld [vmem:[%s6710_s1 + $0x118] sm:$0xff]  ;;  %v1137_v27 = vrot.slane %v1135_v22, 5  ;;  %v4515_v4 = vld [vmem:[%s5594_s30 + $0x60] sm:$0xf] }
  0x42   : > { %1477 = vmatpush.bf16.msra.mxu3 %v5115_v26  ;;  %v1104_v49 = vor.u32 %v1103_v39, %v1100_v38  ;;  %v1096_v57 = vsel %vm5635_vm3, %v1091_v52, %v1095_v53  ;;  %v4429_v38 = vld [vmem:[%s5594_s30 + $0xb0] sm:$0xf]  ;;  %v4431_v39 = vld [vmem:[%s5594_s30 + $0xb8] sm:$0xf]  ;;  %v4432_v52 = vld [vmem:[%s5594_s30 + $0xbc] sm:$0x1]  ;;  %p5396_p2 = pneg %p5395_p1 }
  0x43   : > { %1258 = vmatpush.bf16.msrb.mxu1 %v5098_v51  ;;  %v1203_v59 = vunpack.c.l.b16 %v1096_v57  ;;  %v1119_v24 = vrot.slane %v1118_v19, 4  ;;  %v1140_v41 = vshrl.u32 %v4429_v38, 16  ;;  %v1143_v42 = vshll.u32 %v4429_v38, 16  ;;  %v4430_v51 = vld [vmem:[%s5594_s30 + $0xb4] sm:$0x1] }
  0x44   : > { %v1105_v54 = vrot.slane %v1104_v49, 4  ;;  %v4471_v53 = vld [vmem:[%s5594_s30 + $0x18] sm:$0xf]  ;;  %v4433_v10 = vld [vmem:[%s5594_s30 + $0xc0] sm:$0xf]  ;;  %p5401_p8 = pnand %p5400_p7, %p5396_p2 }
  0x45   : > { %1037 = vmatpush.bf16.msra.mxu0 %v5094_v35  ;;  %v1124_v29 = vsel %vm5635_vm3, %v1119_v24, %v1123_v25  ;;  %v4387_v35 = vld [vmem:[%s5594_s30 + $0xd8] sm:$0xf]  ;;  %v1142_v45 = vrot.slane %v1140_v41, 4  ;;  %v1145_v46 = vrot.slane %v1143_v42, 5  ;;  %v4436_v24 = vld [vmem:[%s5594_s30 + $0xcc] sm:$0x1] }
  0x46   : > { %1478 = vmatpush.bf16.msra.mxu3 %v5114_v44  ;;  %v1110_v58 = vsel %vm5635_vm3, %v1105_v54, %v1109_v55  ;;  %v1205_v33 = vunpack.c.l.b16 %v1124_v29  ;;  %v1157_v44 = vshll.u32 %v4431_v39, 16  ;;  %v5803_v49 = vor.u32 %v5090_v36, %v4387_v35  ;;  %v5103_v54 = vld [vmem:[%s5594_s30 + $0x1c] sm:$0xf0]  ;;  %v4475_v25 = vld [vmem:[%s5594_s30 + $0x28] sm:$0xf] }
  0x47   : > { %v1204_v60 = vunpack.c.l.b16 %v1110_v58  ;;  %v1146_v55 = vor.u32 %v1145_v46, %v1142_v45  ;;  %v1163_v58 = vshll.u32 %v4432_v52, 16  ;;  %v5118_v36 = vld [vmem:[%s6710_s1 + $0x100] sm:$0xff]  ;;  %v4395_v42 = vld [vmem:[%s5594_s30 + $0xf8] sm:$0xf]  ;;  %v4545_v52 = vld [vmem:[%s5594_s30 + $0x8] sm:$0xf] }
  0x48   : > { %4275 = vmatmul.msk.bf16.gmra.mxu0 %vm496_vm2, %v4252_v62  ;;  %v4279_v62 = vld [vmem:[%s5594_s30] sm:$0xf]  ;;  %v1159_v48 = vrot.slane %v1157_v44, 5  ;;  %v4519_v44 = vld [vmem:[%s5594_s30 + $0x70] sm:$0xf] }
  0x49   : > { %4374 = vmatmul.msk.bf16.gmra.mxu3 %vm496_vm2, %v4348_v63  ;;  %v1211_v61 = vpack.c.b16 %v1204_v60, %v1203_v59  ;;  %v5062_v63 = vld [vmem:[%s5594_s30 + $0x4] sm:$0xf0]  ;;  %v1147_v59 = vrot.slane %v1146_v55, 4  ;;  %v5112_v45 = vld [vmem:[%s5594_s30 + $0x74] sm:$0xf0]  ;;  %v1528_v55 = vshll.u32 %v4545_v52, 16 }
  0x4a   : > { %v4280_v13 = vor.u32 %v5062_v63, %v4279_v62  ;;  %v1165_v62 = vrot.slane %v1163_v58, 5  ;;  %v4472_v63 = vor.u32 %v5103_v54, %v4471_v53  ;;  %v4547_v53 = vld [vmem:[%s5594_s30 + $0x10] sm:$0xf]  ;;  %v1525_v54 = vshrl.u32 %v4545_v52, 16  ;;  %v4399_v58 = vld [vmem:[%s5594_s30 + $0x108] sm:$0xf] }
  0x4b   : > { %4453 = vmatmul.msk.bf16.vlgmr.msrb.gmra.mxu1 %vm496_vm2, %v1211_v61  ;;  %v4555_v52 = vld [vmem:[%s5594_s30 + $0x30] sm:$0xf] }
  0x4e   : > { %4331 = vmatmul.msk.bf16.gmra.mxu2 %vm496_vm2, %v772_v2  ;;  %v4427_v2 = vld [vmem:[%s5594_s30 + $0xa8] sm:$0xf] }
  0x4f   : > { %v1126_v8 = vshrl.u32 %v4427_v2, 16  ;;  %v1129_v9 = vshll.u32 %v4427_v2, 16 }
  0x51   : > { %v1128_v11 = vrot.slane %v1126_v8, 4  ;;  %v1131_v12 = vrot.slane %v1129_v9, 5  ;;  %v4391_v8 = vld [vmem:[%s5594_s30 + $0xe8] sm:$0xf]  ;;  %v5091_v9 = vld [vmem:[%s5594_s30 + $0xec] sm:$0xf0] }
  0x53   : > { %v1132_v21 = vor.u32 %v1131_v12, %v1128_v11  ;;  %v4435_v11 = vld [vmem:[%s5594_s30 + $0xc8] sm:$0xf] }
  0x54   : > { %v5111_v12 = vld [vmem:[%s5594_s30 + $0x64] sm:$0xf0]  ;;  %v1182_v15 = vshrl.u32 %v4435_v11, 16  ;;  %v1185_v16 = vshll.u32 %v4435_v11, 16 }
  0x55   : > { %v1133_v26 = vrot.slane %v1132_v21, 4  ;;  %v5827_v21 = vor.u32 %v5091_v9, %v4391_v8  ;;  %v4516_v22 = vor.u32 %v5111_v12, %v4515_v4 }
  0x56   : > { %v1184_v19 = vrot.slane %v1182_v15, 4  ;;  %v1187_v7 = vrot.slane %v1185_v16, 5  ;;  %v4549_v16 = vld [vmem:[%s5594_s30 + $0x18] sm:$0xf] }
  0x57   : > { %v1138_v31 = vsel %vm5635_vm3, %v1133_v26, %v1137_v27  ;;  %v5104_v26 = vld [vmem:[%s5594_s30 + $0x2c] sm:$0xf0] }
  0x58   : > { %4276 = vmatmul.msk.bf16.gmra.mxu0 %vm496_vm2, %v4256_v40  ;;  %v1206_v34 = vunpack.c.l.b16 %v1138_v31  ;;  %v5110_v40 = vld [vmem:[%s5594_s30 + $0x54] sm:$0xf0]  ;;  %v1188_v29 = vor.u32 %v1187_v7, %v1184_v19  ;;  %v1191_v31 = vshll.u32 %v4436_v24, 16  ;;  %v1556_v24 = vshll.u32 %v4549_v16, 16 }
  0x59   : > { %4375 = vmatmul.msk.bf16.gmra.mxu3 %vm496_vm2, %v4352_v43  ;;  %v1154_v43 = vshrl.u32 %v4431_v39, 16  ;;  %v4512_v50 = vor.u32 %v5110_v40, %v4511_v37 }
  0x5a   : > { %v1212_v20 = vpack.c.b16 %v1206_v34, %v1205_v33  ;;  %v1189_v34 = vrot.slane %v1188_v29, 4  ;;  %v1193_v35 = vrot.slane %v1191_v31, 5 }
  0x5b   : > { %v1156_v47 = vrot.slane %v1154_v43, 4  ;;  %v5092_v43 = vld [vmem:[%s5594_s30 + $0xfc] sm:$0xf0] }
  0x5c   : > { %4454 = vmatmul.msk.bf16.gmra.mxu1 %vm496_vm2, %v1212_v20  ;;  %v4476_v20 = vor.u32 %v5104_v26, %v4475_v25  ;;  %v1194_v38 = vsel %vm5635_vm3, %v1189_v34, %v1193_v35  ;;  %v5849_v46 = vor.u32 %v5092_v43, %v4395_v42  ;;  %v4552_v35 = vld [vmem:[%s5594_s30 + $0x24] sm:$0x1] }
  0x5d   : > { %v1160_v57 = vor.u32 %v1159_v48, %v1156_v47  ;;  %v1210_v40 = vunpack.c.l.b16 %v1194_v38  ;;  %v4520_v47 = vor.u32 %v5112_v45, %v4519_v44  ;;  %v4479_v48 = vld [vmem:[%s5594_s30 + $0x38] sm:$0xf]  ;;  %v1576_v42 = vshll.u32 %v4552_v35, 16  ;;  %v4553_v45 = vld [vmem:[%s5594_s30 + $0x28] sm:$0xf] }
  0x5e   : > { %4332 = vmatmul.msk.bf16.gmra.mxu2 %vm496_vm2, %v773_v56  ;;  %v1149_v56 = vshll.u32 %v4430_v51, 16 }
  0x5f   : > { %v1161_v61 = vrot.slane %v1160_v57, 4  ;;  %v1542_v57 = vshll.u32 %v4547_v53, 16 }
  0x60   : > { %v1151_v60 = vrot.slane %v1149_v56, 5  ;;  %v1539_v56 = vshrl.u32 %v4547_v53, 16 }
  0x61   : > { %v1166_v2 = vsel %vm5635_vm3, %v1161_v61, %v1165_v62  ;;  %v5113_v61 = vld [vmem:[%s5594_s30 + $0x84] sm:$0xf0]  ;;  %v1527_v62 = vrot.slane %v1525_v54, 4  ;;  %v1581_v54 = vshrl.u32 %v4553_v45, 16 }
  0x62   : > { %v1152_v1 = vsel %vm5635_vm3, %v1147_v59, %v1151_v60  ;;  %v1208_v5 = vunpack.c.l.b16 %v1166_v2  ;;  %v5093_v59 = vld [vmem:[%s5594_s30 + $0x10c] sm:$0xf0]  ;;  %v4523_v60 = vld [vmem:[%s5594_s30 + $0x80] sm:$0xf]  ;;  %v4546_v2 = vld [vmem:[%s5594_s30 + $0xc] sm:$0x1] }
  0x63   : > { %v1207_v3 = vunpack.c.l.b16 %v1152_v1  ;;  %v1544_v1 = vrot.slane %v1542_v57, 5  ;;  %v1534_v9 = vshll.u32 %v4546_v2, 16  ;;  %v1598_v57 = vshll.u32 %v4555_v52, 16 }
  0x65   : > { %v1213_v6 = vpack.c.b16 %v1208_v5, %v1207_v3  ;;  %v4548_v3 = vld [vmem:[%s5594_s30 + $0x14] sm:$0x1]  ;;  %v5865_v5 = vor.u32 %v5093_v59, %v4399_v58 }
  0x68   : > { %4309 = vmatmul.msk.bf16.vlgmr.msrb.gmra.mxu0 %vm496_vm2, %v4280_v13  ;;  %v1168_v13 = vshrl.u32 %v4433_v10, 16 }
  0x69   : > { %4376 = vmatmul.msk.bf16.gmra.mxu3 %vm496_vm2, %v4356_v14  ;;  %1696 = vmatpush.bf16.msrb.mxu0 %v5121_v23  ;;  %v1171_v14 = vshll.u32 %v4433_v10, 16  ;;  %v4434_v23 = vld [vmem:[%s5594_s30 + $0xc4] sm:$0x1]  ;;  %v1548_v10 = vshll.u32 %v4548_v3, 16  ;;  %v1600_v3 = vrot.slane %v1598_v57, 5 }
  0x6a   : > { %v1170_v17 = vrot.slane %v1168_v13, 4  ;;  %v1536_v13 = vrot.slane %v1534_v9, 5 }
  0x6b   : > { %v1173_v18 = vrot.slane %v1171_v14, 5  ;;  %v1550_v15 = vrot.slane %v1548_v10, 5 }
  0x6c   : > { %4455 = vmatmul.msk.bf16.gmra.mxu1 %vm496_vm2, %v1213_v6  ;;  %v4524_v6 = vor.u32 %v5113_v61, %v4523_v60 }
  0x6d   : > { %1697 = vmatpush.bf16.msrb.mxu0 %v5120_v32  ;;  %v1174_v27 = vor.u32 %v1173_v18, %v1170_v17  ;;  %v4551_v17 = vld [vmem:[%s5594_s30 + $0x20] sm:$0xf] }
  0x6e   : > { %4497 = vmatmul.msk.bf16.vlgmr.msrb.gmra.mxu2 %vm496_vm2, %v4468_v28  ;;  %v1177_v28 = vshll.u32 %v4434_v23, 16  ;;  %v1553_v23 = vshrl.u32 %v4549_v16, 16  ;;  %v1567_v25 = vshrl.u32 %v4551_v17, 16  ;;  %v1570_v26 = vshll.u32 %v4551_v17, 16 }
  0x6f   : > { %v1175_v32 = vrot.slane %v1174_v27, 4 }
  0x70   : > { %v1179_v33 = vrot.slane %v1177_v28, 5  ;;  %v1555_v31 = vrot.slane %v1553_v23, 4  ;;  %v1572_v34 = vrot.slane %v1570_v26, 5 }
  0x71   : > { %1698 = vmatpush.bf16.msrb.mxu0 %v5119_v0  ;;  %v1541_v0 = vrot.slane %v1539_v56, 4  ;;  %v1595_v56 = vshrl.u32 %v4555_v52, 16  ;;  %v4560_v52 = vld [vmem:[%s5594_s30 + $0x44] sm:$0x1] }
  0x72   : > { %v1180_v37 = vsel %vm5635_vm3, %v1175_v32, %v1179_v33  ;;  %v1558_v32 = vrot.slane %v1556_v24, 5  ;;  %v1569_v33 = vrot.slane %v1567_v25, 4 }
  0x73   : > { %v1209_v39 = vunpack.c.l.b16 %v1180_v37  ;;  %v1545_v4 = vor.u32 %v1544_v1, %v1541_v0  ;;  %v1597_v2 = vrot.slane %v1595_v56, 4 }
  0x75   : > { %1699 = vmatpush.bf16.msrb.mxu0 %v5118_v36  ;;  %v1214_v41 = vpack.c.b16 %v1210_v40, %v1209_v39  ;;  %v1546_v14 = vrot.slane %v1545_v4, 4  ;;  %v1559_v39 = vor.u32 %v1558_v32, %v1555_v31  ;;  %v4557_v31 = vld [vmem:[%s5594_s30 + $0x38] sm:$0xf]  ;;  %v4559_v32 = vld [vmem:[%s5594_s30 + $0x40] sm:$0xf] }
  0x77   : > { %v1551_v7 = vsel %vm5635_vm3, %v1546_v14, %v1550_v15  ;;  %v1601_v14 = vor.u32 %v1600_v3, %v1597_v2 }
  0x78   : > { %4417 = vmatmul.msk.bf16.vlgmr.msra.gmra.mxu0 %vm496_vm2, %v5803_v49  ;;  %v1645_v29 = vunpack.c.l.b16 %v1551_v7 }
  0x79   : > { %4541 = vmatmul.msk.bf16.vlgmr.msra.gmra.mxu3 %vm496_vm2, %v4512_v50  ;;  %v5105_v50 = vld [vmem:[%s5594_s30 + $0x3c] sm:$0xf0]  ;;  %v1602_v26 = vrot.slane %v1601_v14, 4 }
  0x7a   : > { %v4480_v51 = vor.u32 %v5105_v50, %v4479_v48 }
  0x7c   : > { %4456 = vmatmul.msk.bf16.gmra.mxu1 %vm496_vm2, %v1214_v41  ;;  %v1573_v41 = vor.u32 %v1572_v34, %v1569_v33 }
  0x7e   : > { %4498 = vmatmul.msk.bf16.gmra.mxu2 %vm496_vm2, %v4472_v63  ;;  %v1530_v63 = vrot.slane %v1528_v55, 5  ;;  %v1574_v50 = vrot.slane %v1573_v41, 4  ;;  %v1584_v55 = vshll.u32 %v4553_v45, 16  ;;  %v1626_v41 = vshll.u32 %v4559_v32, 16 }
  0x80   : > { %v1531_v8 = vor.u32 %v1530_v63, %v1527_v62  ;;  %v1583_v62 = vrot.slane %v1581_v54, 4  ;;  %v1586_v63 = vrot.slane %v1584_v55, 5 }
  0x82   : > { %v1532_v12 = vrot.slane %v1531_v8, 4  ;;  %v4556_v8 = vld [vmem:[%s5594_s30 + $0x34] sm:$0x1]  ;;  %v1587_v10 = vor.u32 %v1586_v63, %v1583_v62 }
  0x83   : > { %v1604_v15 = vshll.u32 %v4556_v8, 16 }
  0x84   : > { %v1537_v19 = vsel %vm5635_vm3, %v1532_v12, %v1536_v13  ;;  %v1588_v23 = vrot.slane %v1587_v10, 4 }
  0x85   : > { %v1644_v28 = vunpack.c.l.b16 %v1537_v19 }
  0x87   : > { %v1652_v37 = vpack.c.b16 %v1645_v29, %v1644_v28  ;;  %v1606_v28 = vrot.slane %v1604_v15, 5 }
  0x88   : > { %4418 = vmatmul.msk.bf16.gmra.mxu0 %vm496_vm2, %v5827_v21 }
  0x89   : > { %4542 = vmatmul.msk.bf16.gmra.mxu3 %vm496_vm2, %v4516_v22  ;;  %v1607_v35 = vsel %vm5635_vm3, %v1602_v26, %v1606_v28 }
  0x8e   : > { %4499 = vmatmul.msk.bf16.gmra.mxu2 %vm496_vm2, %v4476_v20  ;;  %v4550_v20 = vld [vmem:[%s5594_s30 + $0x1c] sm:$0x1] }
  0x8f   : > { %v1562_v40 = vshll.u32 %v4550_v20, 16 }
  0x91   : > { %v1564_v48 = vrot.slane %v1562_v40, 5  ;;  %v1623_v40 = vshrl.u32 %v4559_v32, 16 }
  0x98   : > { %4419 = vmatmul.msk.bf16.gmra.mxu0 %vm496_vm2, %v5849_v46 }
  0x99   : > { %4543 = vmatmul.msk.bf16.gmra.mxu3 %vm496_vm2, %v4520_v47  ;;  %v1560_v47 = vrot.slane %v1559_v39, 4  ;;  %v1612_v39 = vshll.u32 %v4557_v31, 16 }
  0x9b   : > { %v1565_v59 = vsel %vm5635_vm3, %v1560_v47, %v1564_v48  ;;  %v1614_v47 = vrot.slane %v1612_v39, 5  ;;  %v1625_v48 = vrot.slane %v1623_v40, 4 }
  0x9c   : > { %v1646_v0 = vunpack.c.l.b16 %v1565_v59 }
  0x9e   : > { %4500 = vmatmul.msk.bf16.gmra.mxu2 %vm496_vm2, %v4480_v51  ;;  %v1578_v51 = vrot.slane %v1576_v42, 5 }
  0xa0   : > { %v1579_v60 = vsel %vm5635_vm3, %v1574_v50, %v1578_v51  ;;  %v1628_v50 = vrot.slane %v1626_v41, 5  ;;  %v4558_v51 = vld [vmem:[%s5594_s30 + $0x3c] sm:$0x1] }
  0xa1   : > { %v1647_v1 = vunpack.c.l.b16 %v1579_v60  ;;  %v1618_v59 = vshll.u32 %v4558_v51, 16 }
  0xa2   : > { %v1629_v60 = vor.u32 %v1628_v50, %v1625_v48 }
  0xa3   : > { %v1653_v12 = vpack.c.b16 %v1647_v1, %v1646_v0  ;;  %v1620_v2 = vrot.slane %v1618_v59, 5 }
  0xa4   : > { %v1630_v3 = vrot.slane %v1629_v60, 4  ;;  %v414_v60 = vld [vmem:[#allocation4 + $0x58] sm:$0xff] }
  0xa5   : > { %v5867_v11 = vpop.f32.mrf.mxu0 }
  0xa7   : > { %v608_v44 = vpop.f32.mrf.mxu1 }
  0xa8   : > { %4420 = vmatmul.msk.bf16.gmra.mxu0 %vm496_vm2, %v5865_v5 }
  0xa9   : > { %4544 = vmatmul.msk.bf16.gmra.mxu3 %vm496_vm2, %v4524_v6  ;;  %v4554_v6 = vld [vmem:[%s5594_s30 + $0x2c] sm:$0x1]  ;;  %s6669_s30 = sshll.u32 %s394_s29, 5 }
  0xaa   : > { %v1590_v13 = vshll.u32 %v4554_v6, 16  ;;  %s396_s21 = scalar_lea.vmem [#allocation7], %s6669_s30 }
  0xab   : > { %s4148_s16 = sshll.u32 %s396_s21, 4  ;;  %s4149_s16 = int_to_ptr.vmem [resolvable:$true] %s4148_s16 }
  0xac   : > { %v5874_v18 = vpop.f32.mrf.mxu3  ;;  %v1592_v25 = vrot.slane %v1590_v13, 5 }
  0xad   : > { %v5880_v22 = vpop.f32.mrf.mxu0 }
  0xae   : > { %v1593_v20 = vsel %vm5635_vm3, %v1588_v23, %v1592_v25 }
  0xaf   : > { %v610_v9 = vpop.f32.mrf.mxu1  ;;  %v1648_v42 = vunpack.c.l.b16 %v1593_v20 }
  0xb1   : > { %v5882_v27 = vpop.f32.mrf.mxu2 }
  0xb4   : > { %v5886_v36 = vpop.f32.mrf.mxu3 }
  0xb5   : > { %v523_v38 = vpop.f32.mrf.mxu0 }
  0xb6   : > { %v609_v24 = vadd.f32 %v608_v44, %v523_v38  ;;  %v1609_v38 = vshrl.u32 %v4557_v31, 16  ;;  %v1649_v44 = vunpack.c.l.b16 %v1607_v35 }
  0xb7   : > { %v613_v56 = vpop.f32.mrf.mxu1 }
  0xb8   : > { %4577 = vmatmul.msk.bf16.vlgmr.msrb.gmra.mxu0 %vm496_vm2, %v1652_v37  ;;  %v1611_v45 = vrot.slane %v1609_v38, 4  ;;  %v1654_v55 = vpack.c.b16 %v1649_v44, %v1648_v42 }
  0xb9   : > { %v5888_v43 = vpop.f32.mrf.mxu2 }
  0xbc   : > { %v5893_v53 = vpop.f32.mrf.mxu3 }
  0xbd   : > { %v525_v58 = vpop.f32.mrf.mxu0 }
  0xbe   : > { %v611_v16 = vadd.f32 %v610_v9, %v525_v58  ;;  %v1615_v58 = vor.u32 %v1614_v47, %v1611_v45  ;;  %v418_v45 = vld [vmem:[#allocation4 + $0x78] sm:$0xff]  ;;  %v417_v47 = vld [vmem:[#allocation4 + $0x70] sm:$0xff] }
  0xbf   : > { %1744 = vmatpush.msra.mxu1 %v418_v45  ;;  %1795 = vmatpush.msra.mxu2 %v418_v45 }
  0xc0   : > { %v1616_v1 = vrot.slane %v1615_v58, 4 }
  0xc1   : > { %v824_v61 = vpop.f32.mrf.mxu2  ;;  %1745 = vmatpush.msra.mxu1 %v417_v47  ;;  %1796 = vmatpush.msra.mxu2 %v417_v47 }
  0xc2   : > { %v841_v29 = vadd.f32 %v824_v61, %v609_v24  ;;  %v1632_v61 = vshll.u32 %v4560_v52, 16  ;;  %v1621_v13 = vsel %vm5635_vm3, %v1616_v1, %v1620_v2  ;;  %v416_v52 = vld [vmem:[#allocation4 + $0x68] sm:$0xff] }
  0xc3   : > { %v1650_v14 = vunpack.c.l.b16 %v1621_v13  ;;  %1746 = vmatpush.msra.mxu1 %v416_v52  ;;  %1797 = vmatpush.msra.mxu2 %v416_v52  ;;  %v412_v2 = vld [vmem:[#allocation4 + $0x48] sm:$0xff]  ;;  %v409_v13 = vld [vmem:[#allocation4 + $0x30] sm:$0xff] }
  0xc4   : > { %v5901_v4 = vpop.f32.mrf.mxu3  ;;  %v1634_v6 = vrot.slane %v1632_v61, 5  ;;  %v413_v61 = vld [vmem:[#allocation4 + $0x50] sm:$0xff] }
  0xc5   : > { %v528_v17 = vpop.f32.mrf.mxu0 }
  0xc6   : > { %v614_v0 = vadd.f32 %v613_v56, %v528_v17 }
  0xc8   : > { %4578 = vmatmul.msk.bf16.gmra.mxu0 %vm496_vm2, %v1653_v12 }
  0xc9   : > { %v826_v19 = vpop.f32.mrf.mxu2 }
  0xca   : > { %v5903_v7 = vadd.f32 %v826_v19, %v611_v16 }
  0xcc   : > { %v934_v33 = vpop.f32.mrf.mxu3 }
  0xcd   : > { %v951_v34 = vadd.f32 %v934_v33, %v841_v29  ;;  %v5912_v37 = vpop.f32.mrf.mxu0 }
  0xd1   : > { %v829_v63 = vpop.f32.mrf.mxu2 }
  0xd2   : > { %v843_v8 = vadd.f32 %v829_v63, %v614_v0 }
  0xd4   : > { %v5916_v54 = vpop.f32.mrf.mxu3 }
  0xd5   : > { %v533_v57 = vpop.f32.mrf.mxu0  ;;  %v952_v45 = vadd.f32 %v5916_v54, %v5903_v7 }
  0xd6   : > { %v5919_v62 = vadd.f32 %v5874_v18, %v533_v57  ;;  %v1635_v18 = vsel %vm5635_vm3, %v1630_v3, %v1634_v6  ;;  %v411_v3 = vld [vmem:[#allocation4 + $0x40] sm:$0xff] }
  0xd7   : > { %v1651_v15 = vunpack.c.l.b16 %v1635_v18 }
  0xd8   : > { %4579 = vmatmul.msk.bf16.gmra.mxu0 %vm496_vm2, %v1654_v55  ;;  %v415_v55 = vld [vmem:[#allocation4 + $0x60] sm:$0xff] }
  0xd9   : > { %v1655_v16 = vpack.c.b16 %v1651_v15, %v1650_v14  ;;  %v5940_v33 = vpop.f32.mrf.mxu2  ;;  %1747 = vmatpush.msra.mxu1 %v415_v55  ;;  %1798 = vmatpush.msra.mxu2 %v415_v55 }
  0xdb   : > { %1748 = vmatpush.msra.mxu1 %v414_v60  ;;  %1799 = vmatpush.msra.mxu2 %v414_v60 }
  0xdc   : > { %v939_v9 = vpop.f32.mrf.mxu3 }
  0xdd   : > { %v953_v10 = vadd.f32 %v939_v9, %v843_v8  ;;  %v5922_v12 = vpop.f32.mrf.mxu0  ;;  %1749 = vmatpush.msra.mxu1 %v413_v61  ;;  %1800 = vmatpush.msra.mxu2 %v413_v61 }
  0xde   : > { %v621_v7 = vadd.f32 %v5886_v36, %v5922_v12  ;;  %v404_v36 = vld [vmem:[#allocation4 + $0x8] sm:$0xff] }
  0xdf   : > { %1750 = vmatpush.msra.mxu1 %v412_v2  ;;  %1801 = vmatpush.msra.mxu2 %v412_v2 }
  0xe1   : > { %v5946_v35 = vpop.f32.mrf.mxu2  ;;  %1751 = vmatpush.msra.mxu1 %v411_v3  ;;  %1802 = vmatpush.msra.mxu2 %v411_v3 }
  0xe2   : > { %v845_v2 = vadd.f32 %v5946_v35, %v5919_v62  ;;  %v405_v62 = vld [vmem:[#allocation4 + $0x10] sm:$0xff] }
  0xe5   : > { %v603_v17 = vpop.f32.mrf.mxu0 }
  0xe6   : > { %v604_v19 = vadd.f32 %v603_v17, %v5867_v11  ;;  %v5942_v11 = vpop.f32.mrf.mxu3  ;;  %v408_v17 = vld [vmem:[#allocation4 + $0x28] sm:$0xff] }
  0xe8   : > { %v839_v23 = vadd.f32 %v5882_v27, %v604_v19  ;;  %4580 = vmatmul.msk.bf16.gmra.mxu0 %vm496_vm2, %v1655_v16  ;;  %v407_v19 = vld [vmem:[#allocation4 + $0x20] sm:$0xff] }
  0xe9   : > { %v5956_v40 = vpop.f32.mrf.mxu2 }
  0xea   : > { %v949_v24 = vadd.f32 %v5893_v53, %v839_v23 }
  0xed   : > { %v605_v25 = vpop.f32.mrf.mxu0 }
  0xee   : > { %v606_v26 = vadd.f32 %v605_v25, %v5880_v22  ;;  %v5950_v22 = vpop.f32.mrf.mxu3 }
  0xef   : > { %v955_v54 = vadd.f32 %v5950_v22, %v845_v2 }
  0xf0   : > { %v5934_v28 = vadd.f32 %v5888_v43, %v606_v26  ;;  %v5952_v43 = vpop.f32.mrf.mxu1 }
  0xf2   : > { %v950_v26 = vadd.f32 %v5901_v4, %v5934_v28 }
  0xf5   : > { %v1039_v29 = vpop.f32.mrf.mxu0 }
  0xf6   : > { %v5936_v31 = vadd.f32 %v1039_v29, %v949_v24  ;;  %v5958_v41 = vpop.f32.mrf.mxu3 }
  0xf8   : > { %v5960_v42 = vpop.f32.mrf.mxu1 }
  0xf9   : > { %v1280_v4 = vadd.f32 %v5960_v42, %v5936_v31  ;;  %v846_v31 = vadd.f32 %v5956_v40, %v621_v7 }
  0xfb   : > { %v956_v22 = vadd.f32 %v5958_v41, %v846_v31 }
  0xfd   : > { %v5938_v32 = vpop.f32.mrf.mxu0 }
  0xfe   : > { %v5966_v48 = vpop.f32.mrf.mxu3 }
 0x100   : > { %v1262_v50 = vpop.f32.mrf.mxu1 }
 0x105   : > { %v1044_v27 = vpop.f32.mrf.mxu0 }
 0x106   : > { %v5944_v20 = vadd.f32 %v1044_v27, %v951_v34  ;;  %v5964_v34 = vpop.f32.mrf.mxu2  ;;  %v5972_v57 = vpop.f32.mrf.mxu3  ;;  %v1060_v27 = vadd.f32 %v5938_v32, %v950_v26 }
 0x108   : > { %v1265_v59 = vpop.f32.mrf.mxu1  ;;  %v1281_v60 = vadd.f32 %v1262_v50, %v1060_v27 }
 0x109   : > { %v1282_v28 = vadd.f32 %v1265_v59, %v5944_v20  ;;  %v1390_v20 = vadd.f32 %v5964_v34, %v1280_v4 }
 0x10b   : > { %v1500_v40 = vadd.f32 %v5966_v48, %v1390_v20 }
 0x10d   : > { %v5948_v53 = vpop.f32.mrf.mxu0 }
 0x10e   : > { %v5970_v56 = vpop.f32.mrf.mxu2  ;;  %v5978_v1 = vpop.f32.mrf.mxu3  ;;  %v1062_v61 = vadd.f32 %v5948_v53, %v952_v45 }
 0x110   : > { %v1267_v6 = vpop.f32.mrf.mxu1 }
 0x111   : > { %v1283_v53 = vadd.f32 %v1267_v6, %v1062_v61 }
 0x115   : > { %v1049_v38 = vpop.f32.mrf.mxu0 }
 0x116   : > { %v5954_v39 = vadd.f32 %v1049_v38, %v953_v10  ;;  %v1375_v63 = vpop.f32.mrf.mxu2  ;;  %v410_v10 = vld [vmem:[#allocation4 + $0x38] sm:$0xff]  ;;  %v5982_v18 = vpop.f32.mrf.mxu3  ;;  %v616_v38 = vadd.f32 %v5952_v43, %v5912_v37  ;;  %v1391_v43 = vadd.f32 %v5970_v56, %v1281_v60 }
 0x117   : > { %1752 = vmatpush.msra.mxu1 %v410_v10  ;;  %1803 = vmatpush.msra.mxu2 %v410_v10  ;;  %v1392_v35 = vadd.f32 %v1375_v63, %v1282_v28 }
 0x118   : > { %v1270_v14 = vpop.f32.mrf.mxu1  ;;  %v844_v55 = vadd.f32 %v5940_v33, %v616_v38  ;;  %v406_v33 = vld [vmem:[#allocation4 + $0x18] sm:$0xff]  ;;  %v1501_v59 = vadd.f32 %v5972_v57, %v1391_v43 }
 0x119   : > { %1753 = vmatpush.msra.mxu1 %v409_v13  ;;  %1804 = vmatpush.msra.mxu2 %v409_v13 }
 0x11a   : > { %v954_v37 = vadd.f32 %v5942_v11, %v844_v55  ;;  %v1284_v11 = vadd.f32 %v1270_v14, %v5954_v39  ;;  %v1502_v39 = vadd.f32 %v5978_v1, %v1392_v35 }
 0x11b   : > { %1754 = vmatpush.msra.mxu1 %v408_v17  ;;  %1805 = vmatpush.msra.mxu2 %v408_v17 }
 0x11d   : > { %v5962_v44 = vpop.f32.mrf.mxu0  ;;  %1755 = vmatpush.msra.mxu1 %v407_v19  ;;  %1806 = vmatpush.msra.mxu2 %v407_v19 }
 0x11e   : > { %v1377_v8 = vpop.f32.mrf.mxu2  ;;  %v1490_v23 = vpop.f32.mrf.mxu3  ;;  %v1064_v50 = vadd.f32 %v5962_v44, %v954_v37  ;;  %v403_v44 = vld [vmem:[#allocation4] sm:$0xff] }
 0x11f   : > { %1756 = vmatpush.msra.mxu1 %v406_v33  ;;  %1807 = vmatpush.msra.mxu2 %v406_v33  ;;  %v1393_v3 = vadd.f32 %v1377_v8, %v1283_v53 }
 0x120   : > { %v1272_v24 = vpop.f32.mrf.mxu1 }
 0x121   : > { %1757 = vmatpush.msra.mxu1 %v405_v62  ;;  %1808 = vmatpush.msra.mxu2 %v405_v62  ;;  %v1285_v6 = vadd.f32 %v1272_v24, %v1064_v50  ;;  %v1503_v57 = vadd.f32 %v5982_v18, %v1393_v3  ;;  %v5165_v50 = vld [vmem:[%s6713_s4 + $0x38] sm:$0xff] }
 0x122   : > { %3543 = vmatpush.bf16.msrb.mxu3 %v5165_v50 }
 0x123   : > { %1758 = vmatpush.msra.mxu1 %v404_v36  ;;  %1809 = vmatpush.msra.mxu2 %v404_v36 }
 0x125   : > { %v5968_v51 = vpop.f32.mrf.mxu0  ;;  %1759 = vmatpush.msra.mxu1 %v403_v44  ;;  %1810 = vmatpush.msra.mxu2 %v403_v44 }
 0x126   : > { %v1380_v16 = vpop.f32.mrf.mxu2  ;;  %v1492_v47 = vpop.f32.mrf.mxu3  ;;  %v1065_v12 = vadd.f32 %v5968_v51, %v955_v54 }
 0x127   : > { %v1394_v34 = vadd.f32 %v1380_v16, %v1284_v11 }
 0x128   : > { %v1275_v32 = vpop.f32.mrf.mxu1 }
 0x129   : > { %v1286_v10 = vadd.f32 %v1275_v32, %v1065_v12  ;;  %v1504_v48 = vadd.f32 %v1490_v23, %v1394_v34 }
 0x12d   : > { %v5974_v58 = vpop.f32.mrf.mxu0 }
 0x12e   : > { %v1382_v29 = vpop.f32.mrf.mxu2  ;;  %v1495_v63 = vpop.f32.mrf.mxu3  ;;  %v1066_v51 = vadd.f32 %v5974_v58, %v956_v22 }
 0x12f   : > { %v1395_v8 = vadd.f32 %v1382_v29, %v1285_v6 }
 0x130   : > { %v1277_v41 = vpop.f32.mrf.mxu1 }
 0x131   : > { %v1287_v1 = vadd.f32 %v1277_v41, %v1066_v51  ;;  %v1505_v58 = vadd.f32 %v1492_v47, %v1395_v8 }
 0x135   : > { %v5976_v0 = vpop.f32.mrf.mxu0 }
 0x136   : > { %v1385_v42 = vpop.f32.mrf.mxu2  ;;  %v1721_v14 = vadd.f32 %v5976_v0, %v1500_v40  ;;  %v1497_v18 = vpop.f32.mrf.mxu3 }
 0x137   : > { %v1396_v19 = vadd.f32 %v1385_v42, %v1286_v10 }
 0x139   : > { %v1506_v45 = vadd.f32 %v1495_v63, %v1396_v19 }
 0x13d   : > { %v5980_v9 = vpop.f32.mrf.mxu0 }
 0x13e   : > { %v1722_v13 = vadd.f32 %v5980_v9, %v1501_v59  ;;  %v1387_v26 = vpop.f32.mrf.mxu2 }
 0x13f   : > { %v1397_v55 = vadd.f32 %v1387_v26, %v1287_v1  ;;  %v5448_v26 = vmov 0  }
 0x140   : > { %v1731_v16 = vadd.f32 %v1722_v13, %v1721_v14  ;;  %1858 = vst [vmem:[#allocation2 + $0x8] sm:$0xf] %v5448_v26 }
 0x141   : > { %v1507_v0 = vadd.f32 %v1497_v18, %v1397_v55  ;;  %1859 = vst [vmem:[#allocation2 + $0xc] sm:$0x1] %v5448_v26  ;;  %v5181_v18 = vld [vmem:[%s6713_s4 + $0xb8] sm:$0xff] }
 0x142   : > { %1860 = vst [vmem:[#allocation2 + $0x10] sm:$0xf] %v5448_v26  ;;  %3601 = vmatpush.bf16.msrb.mxu2 %v5181_v18 }
 0x143   : > { %1861 = vst [vmem:[#allocation2 + $0x14] sm:$0x1] %v5448_v26 }
 0x144   : > { %1862 = vst [vmem:[#allocation2 + $0x18] sm:$0xf] %v5448_v26 }
 0x145   : > { %v5984_v15 = vpop.f32.mrf.mxu0  ;;  %1863 = vst [vmem:[#allocation2 + $0x1c] sm:$0x1] %v5448_v26 }
 0x146   : > { %v1723_v17 = vadd.f32 %v5984_v15, %v1502_v39  ;;  %1864 = vst [vmem:[#allocation2 + $0x20] sm:$0xf] %v5448_v26 }
 0x147   : > { %1865 = vst [vmem:[#allocation2 + $0x24] sm:$0x1] %v5448_v26 }
 0x148   : > { %v1732_v38 = vadd.f32 %v1731_v16, %v1723_v17  ;;  %1866 = vst [vmem:[#allocation2 + $0x28] sm:$0xf] %v5448_v26 }
 0x149   : > { %1867 = vst [vmem:[#allocation2 + $0x2c] sm:$0x1] %v5448_v26 }
 0x14a   : > { %1868 = vst [vmem:[#allocation2 + $0x30] sm:$0xf] %v5448_v26 }
 0x14b   : > { %1869 = vst [vmem:[#allocation2 + $0x34] sm:$0x1] %v5448_v26 }
 0x14c   : > { %1870 = vst [vmem:[#allocation2 + $0x38] sm:$0xf] %v5448_v26 }
 0x14d   : > { %v1708_v25 = vpop.f32.mrf.mxu0  ;;  %1871 = vst [vmem:[#allocation2 + $0x3c] sm:$0x1] %v5448_v26 }
 0x14e   : > { %v1724_v24 = vadd.f32 %v1708_v25, %v1503_v57  ;;  %1872 = vst [vmem:[#allocation2 + $0x40] sm:$0xf] %v5448_v26 }
 0x14f   : > { %1873 = vst [vmem:[#allocation2 + $0x44] sm:$0x1] %v5448_v26 }
 0x150   : > { %v1733_v60 = vadd.f32 %v1732_v38, %v1724_v24  ;;  %v5189_v38 = vld [vmem:[%s6713_s4 + $0xf8] sm:$0xff]  ;;  %1856 = vst [vmem:[#allocation2] sm:$0xf] %v5448_v26 }
 0x151   : > { %3630 = vmatpush.bf16.msra.mxu0 %v5189_v38  ;;  %1857 = vst [vmem:[#allocation2 + $0x4] sm:$0x1] %v5448_v26  ;;  %v5170_v38 = vld [vmem:[%s6713_s4 + $0x60] sm:$0xff] }
 0x152   : > { %1874 = vst [vmem:[#allocation2 + $0x48] sm:$0xf] %v5448_v26 }
 0x153   : > { %1875 = vst [vmem:[#allocation2 + $0x4c] sm:$0x1] %v5448_v26  ;;  %v5177_v26 = vld [vmem:[%s6713_s4 + $0x98] sm:$0xff] }
 0x155   : > { %v1711_v52 = vpop.f32.mrf.mxu0 }
 0x156   : > { %v1725_v9 = vadd.f32 %v1711_v52, %v1504_v48 }
 0x158   : > { %v1734_v29 = vadd.f32 %v1733_v60, %v1725_v9  ;;  %v5164_v60 = vld [vmem:[%s6713_s4 + $0x30] sm:$0xff] }
 0x159   : > { %3544 = vmatpush.bf16.msrb.mxu3 %v5164_v60  ;;  %v5159_v60 = vld [vmem:[%s6713_s4 + $0x8] sm:$0xff] }
 0x15d   : > { %v1713_v56 = vpop.f32.mrf.mxu0 }
 0x15e   : > { %v1726_v61 = vadd.f32 %v1713_v56, %v1505_v58 }
 0x160   : > { %v1735_v4 = vadd.f32 %v1734_v29, %v1726_v61  ;;  %v1729_v29 = vld [vmem:[%s6711_s2] sm:$0x1] }
 0x165   : > { %v1716_v27 = vpop.f32.mrf.mxu0 }
 0x166   : > { %v1727_v2 = vadd.f32 %v1716_v27, %v1506_v45 }
 0x168   : > { %v1736_v23 = vadd.f32 %v1735_v4, %v1727_v2  ;;  %v5188_v4 = vld [vmem:[%s6713_s4 + $0xf0] sm:$0xff] }
 0x169   : > { %3631 = vmatpush.bf16.msra.mxu0 %v5188_v4 }
 0x16d   : > { %v1718_v15 = vpop.f32.mrf.mxu0 }
 0x16e   : > { %v1728_v28 = vadd.f32 %v1718_v15, %v1507_v0  ;;  %v5163_v0 = vld [vmem:[%s6713_s4 + $0x28] sm:$0xff] }
 0x16f   : > { %3545 = vmatpush.bf16.msrb.mxu3 %v5163_v0  ;;  %v5184_v0 = vld [vmem:[%s6713_s4 + $0xd0] sm:$0xff] }
 0x170   : > { %v1737_v32 = vadd.f32 %v1736_v23, %v1728_v28  ;;  %v5180_v23 = vld [vmem:[%s6713_s4 + $0xb0] sm:$0xff] }
 0x171   : > { %3602 = vmatpush.bf16.msrb.mxu2 %v5180_v23 }
 0x172   : > { %v1738_v37 = vrot.slane %v1737_v32, 4 }
 0x174   : > { %v1739_v25 = vadd.f32 %v1738_v37, %v1737_v32  ;;  %v5162_v32 = vld [vmem:[%s6713_s4 + $0x20] sm:$0xff]  ;;  %v5173_v37 = vld [vmem:[%s6713_s4 + $0x78] sm:$0xff] }
 0x175   : > { %3572 = vmatpush.bf16.msrb.mxu1 %v5173_v37  ;;  %3546 = vmatpush.bf16.msrb.mxu3 %v5162_v32  ;;  %v1968_v32 = vld [vmem:[#allocation2 + $0x8] sm:$0xf]  ;;  %v1974_v37 = vld [vmem:[#allocation2 + $0xc] sm:$0x1] }
 0x176   : > { %v1740_v7 = vrot.slane %v1739_v25, 2 }
 0x178   : > { %v1741_v54 = vadd.f32 %v1740_v7, %v1739_v25  ;;  %v5187_v25 = vld [vmem:[%s6713_s4 + $0xe8] sm:$0xff] }
 0x179   : > { %3632 = vmatpush.bf16.msra.mxu0 %v5187_v25  ;;  %v5176_v25 = vld [vmem:[%s6713_s4 + $0x90] sm:$0xff] }
 0x17a   : > { %v1742_v47 = vrot.slane %v1741_v54, 1 }
 0x17c   : > { %v1743_v33 = vadd.f32 %v1742_v47, %v1741_v54  ;;  %v5322_v54 = vld [vmem:[%s6712_s3] ss:$0 sm:$0xff]  ;;  %v5179_v47 = vld [vmem:[%s6713_s4 + $0xa8] sm:$0xff] }
 0x17d   : > { %3603 = vmatpush.bf16.msrb.mxu2 %v5179_v47 }
 0x17e   : > { %1760 = vmatmul.f32.vlgmr.msra.gmra.mxu1 %v1743_v33  ;;  %v5172_v33 = vld [vmem:[%s6713_s4 + $0x70] sm:$0xff] }
 0x17f   : > { %3573 = vmatpush.bf16.msrb.mxu1 %v5172_v33 }
 0x1fb   : > { %v1761_v52 = vpop.f32.mrf.mxu1 }
 0x1fc   : > { %v1764_v43 = vmul.f32 0.00390625, %v1761_v52 }
 0x1fe   : > { %v1765_v53 = vperm.slane %v1764_v43, 0 }
 0x200   : > { %v6022_v62 = vsub.f32 %v1721_v14, %v1765_v53  ;;  %v6024_v31 = vsub.f32 %v1722_v13, %v1765_v53  ;;  %v6026_v20 = vsub.f32 %v1723_v17, %v1765_v53  ;;  %v6028_v35 = vsub.f32 %v1724_v24, %v1765_v53 }
 0x201   : > { %v6034_v36 = vsub.f32 %v1725_v9, %v1765_v53  ;;  %v6038_v56 = vsub.f32 %v1726_v61, %v1765_v53  ;;  %v6042_v3 = vsub.f32 %v1727_v2, %v1765_v53  ;;  %v6046_v39 = vsub.f32 %v1728_v28, %v1765_v53 }
 0x202   : > { %v1774_v11 = vmul.f32 %v6022_v62, %v6022_v62  ;;  %v1775_v42 = vmul.f32 %v6024_v31, %v6024_v31  ;;  %v1776_v12 = vmul.f32 %v6026_v20, %v6026_v20  ;;  %v1777_v44 = vmul.f32 %v6028_v35, %v6028_v35 }
 0x203   : > { %v1778_v6 = vmul.f32 %v6034_v36, %v6034_v36  ;;  %v1779_v34 = vmul.f32 %v6038_v56, %v6038_v56  ;;  %v1780_v10 = vmul.f32 %v6042_v3, %v6042_v3  ;;  %v1781_v13 = vmul.f32 %v6046_v39, %v6046_v39 }
 0x204   : > { %v1782_v22 = vadd.f32 %v1775_v42, %v1774_v11  ;;  %v5161_v11 = vld [vmem:[%s6713_s4 + $0x18] sm:$0xff] }
 0x205   : > { %3547 = vmatpush.bf16.msrb.mxu3 %v5161_v11 }
 0x206   : > { %v1783_v59 = vadd.f32 %v1782_v22, %v1776_v12 }
 0x208   : > { %v1784_v40 = vadd.f32 %v1783_v59, %v1777_v44 }
 0x20a   : > { %v1785_v63 = vadd.f32 %v1784_v40, %v1778_v6 }
 0x20c   : > { %v1786_v51 = vadd.f32 %v1785_v63, %v1779_v34 }
 0x20e   : > { %v1787_v41 = vadd.f32 %v1786_v51, %v1780_v10 }
 0x210   : > { %v1788_v57 = vadd.f32 %v1787_v41, %v1781_v13  ;;  %v5160_v13 = vld [vmem:[%s6713_s4 + $0x10] sm:$0xff]  ;;  %v5185_v41 = vld [vmem:[%s6713_s4 + $0xd8] sm:$0xff] }
 0x211   : > { %3548 = vmatpush.bf16.msrb.mxu3 %v5160_v13 }
 0x212   : > { %v1789_v8 = vrot.slane %v1788_v57, 4 }
 0x214   : > { %v1790_v14 = vadd.f32 %v1789_v8, %v1788_v57 }
 0x215   : > { %3549 = vmatpush.bf16.msrb.mxu3 %v5159_v60  ;;  %v2001_v60 = vld [vmem:[#allocation2 + $0x30] sm:$0xf] }
 0x216   : > { %v1791_v17 = vrot.slane %v1790_v14, 2 }
 0x218   : > { %v1792_v48 = vadd.f32 %v1791_v17, %v1790_v14 }
 0x21a   : > { %v1793_v19 = vrot.slane %v1792_v48, 1 }
 0x21c   : > { %v1794_v1 = vadd.f32 %v1793_v19, %v1792_v48  ;;  %v2019_v48 = vld [vmem:[#allocation2] sm:$0xf] }
 0x21d   : > { %2027 = vst [vmem:[#allocation3] sm:$0xf] %v2019_v48 }
 0x21e   : > { %1811 = vmatmul.f32.vlgmr.msra.gmra.mxu2 %v1794_v1 }
 0x2a1   : > { %v1812_v16 = vpop.f32.mrf.mxu2 }
 0x2a2   : > { %v1815_v24 = vmul.f32 0.00390625, %v1812_v16 }
 0x2a4   : > { %v1816_v27 = vadd.f32 1e-05, %v1815_v24 }
 0x2a6   : > { %5325 = vrsqrt.f32 %v1816_v27  ;;  %vm1823_vm5 = vweird.f32 %v1816_v27 }
 0x2ac   : > { %v5326_v58 = vpop.eup %5325 }
 0x2ad   : > { %v1818_v9 = vmul.f32 %v5326_v58, %v1816_v27  ;;  %vm1824_vm4 = vweird.f32 %v5326_v58 }
 0x2ae   : > { %vm1825_vm6 = vmor %vm1823_vm5, %vm1824_vm4 }
 0x2af   : > { %v1819_v45 = vmul.f32 %v5326_v58, %v1818_v9 }
 0x2b1   : > { %v1820_v55 = vmul.f32 0.5, %v1819_v45 }
 0x2b3   : > { %v1821_v61 = vsub.f32 1.5, %v1820_v55 }
 0x2b5   : > { %v1822_v2 = vmul.f32 %v5326_v58, %v1821_v61 }
 0x2b7   : > { %v1826_v15 = vsel %vm1825_vm6, %v5326_v58, %v1822_v2 }
 0x2b8   : > { %v1827_v28 = vmul.f32 %v1826_v15, %v1729_v29 }
 0x2ba   : > { %v1828_v7 = vperm.slane %v1827_v28, 0 }
 0x2bc   : > { %v1829_v52 = vmul.f32 %v1828_v7, %v6022_v62  ;;  %v1830_v43 = vmul.f32 %v1828_v7, %v6024_v31  ;;  %v1831_v53 = vmul.f32 %v1828_v7, %v6026_v20  ;;  %v1832_v50 = vmul.f32 %v1828_v7, %v6028_v35  ;;  %v5186_v31 = vld [vmem:[%s6713_s4 + $0xe0] sm:$0xff] }
 0x2bd   : > { %v1833_v42 = vmul.f32 %v1828_v7, %v6034_v36  ;;  %v1834_v12 = vmul.f32 %v1828_v7, %v6038_v56  ;;  %v1835_v22 = vmul.f32 %v1828_v7, %v6042_v3  ;;  %v1836_v62 = vmul.f32 %v1828_v7, %v6046_v39  ;;  %v5178_v36 = vld [vmem:[%s6713_s4 + $0xa0] sm:$0xff]  ;;  %v5171_v39 = vld [vmem:[%s6713_s4 + $0x68] sm:$0xff]  ;;  %3633 = vmatpush.bf16.msra.mxu0 %v5186_v31 }
 0x2be   : > { %v1840_v20 = vadd.f32 %v5322_v54, %v1829_v52  ;;  %v1841_v35 = vadd.f32 %v5322_v54, %v1830_v43  ;;  %v1842_v44 = vadd.f32 %v5322_v54, %v1831_v53  ;;  %v1843_v59 = vadd.f32 %v5322_v54, %v1832_v50  ;;  %3604 = vmatpush.bf16.msrb.mxu2 %v5178_v36  ;;  %v5169_v43 = vld [vmem:[%s6713_s4 + $0x58] sm:$0xff]  ;;  %v5195_v52 = vld [vmem:[%s6713_s4 + $0x128] sm:$0xff] }
 0x2bf   : > { %v1844_v6 = vadd.f32 %v5322_v54, %v1833_v42  ;;  %v1845_v56 = vadd.f32 %v5322_v54, %v1834_v12  ;;  %v1846_v40 = vadd.f32 %v5322_v54, %v1835_v22  ;;  %v1847_v3 = vadd.f32 %v5322_v54, %v1836_v62  ;;  %3574 = vmatpush.bf16.msrb.mxu1 %v5171_v39  ;;  %v1977_v12 = vld [vmem:[#allocation2 + $0x10] sm:$0xf]  ;;  %v1980_v22 = vld [vmem:[#allocation2 + $0x14] sm:$0x1]  ;;  %v5158_v62 = vld [vmem:[%s6713_s4] sm:$0xff] }
 0x2c0   : > { %v1848_v34 = vmax.f32 %v1840_v20, 0.0  ;;  %v1849_v63 = vmax.f32 %v1841_v35, 0.0  ;;  %v1850_v10 = vmax.f32 %v1842_v44, 0.0  ;;  %v1851_v51 = vmax.f32 %v1843_v59, 0.0  ;;  %v1983_v59 = vld [vmem:[#allocation2 + $0x18] sm:$0xf]  ;;  %3550 = vmatpush.bf16.msrb.mxu3 %v5158_v62 }
 0x2c1   : > { %v1852_v57 = vmax.f32 %v1844_v6, 0.0  ;;  %v1853_v8 = vmax.f32 %v1845_v56, 0.0  ;;  %v1854_v14 = vmax.f32 %v1846_v40, 0.0  ;;  %v1855_v17 = vmax.f32 %v1847_v3, 0.0  ;;  %3634 = vmatpush.bf16.msra.mxu0 %v5185_v41  ;;  %v1986_v36 = vld [vmem:[#allocation2 + $0x1c] sm:$0x1] }
 0x2c2   : > { %v1876_v19 = vpack.c.bf16 %v1848_v34, %v1848_v34  ;;  %v1877_v1 = vpack.c.bf16 %v1849_v63, %v1849_v63  ;;  %v1878_v16 = vpack.c.bf16 %v1850_v10, %v1850_v10  ;;  %v1879_v24 = vpack.c.bf16 %v1851_v51, %v1851_v51  ;;  %3605 = vmatpush.bf16.msrb.mxu2 %v5177_v26  ;;  %v5183_v6 = vld [vmem:[%s6713_s4 + $0xc8] sm:$0xff]  ;;  %v5197_v56 = vld [vmem:[%s6713_s4 + $0x138] sm:$0xff]  ;;  %v1989_v63 = vld [vmem:[#allocation2 + $0x20] sm:$0xf] }
 0x2c3   : > { %v6122_v27 = vpack.c.bf16 %v1852_v57, %v1852_v57  ;;  %v6124_v58 = vpack.c.bf16 %v1853_v8, %v1853_v8  ;;  %v6129_v9 = vpack.c.bf16 %v1854_v14, %v1854_v14  ;;  %v6134_v61 = vpack.c.bf16 %v1855_v17, %v1855_v17  ;;  %3575 = vmatpush.bf16.msrb.mxu1 %v5170_v38  ;;  %v1992_v57 = vld [vmem:[#allocation2 + $0x24] sm:$0x1]  ;;  %v5175_v8 = vld [vmem:[%s6713_s4 + $0x88] sm:$0xff]  ;;  %v5168_v14 = vld [vmem:[%s6713_s4 + $0x50] sm:$0xff] }
 0x2c4   : > { %v1885_v45 = vshrl.u32 %v1876_v19, 16  ;;  %v1893_v55 = vshrl.u32 %v1877_v1, 16  ;;  %v1888_v18 = vshll.u32 %v1876_v19, 16  ;;  %v1901_v29 = vshrl.u32 %v1878_v16, 16  ;;  %v1995_v19 = vld [vmem:[#allocation2 + $0x28] sm:$0xf]  ;;  %3659 = vmatpush.bf16.msra.mxu3 %v5197_v56 }
 0x2c5   : > { %v1909_v2 = vshrl.u32 %v1879_v24, 16  ;;  %v1896_v23 = vshll.u32 %v1877_v1, 16  ;;  %v1917_v28 = vshrl.u32 %v6122_v27, 16  ;;  %v1904_v54 = vshll.u32 %v1878_v16, 16  ;;  %3635 = vmatpush.bf16.msra.mxu0 %v5184_v0 }
 0x2c6   : > { %v1887_v4 = vrot.slane %v1885_v45, 7  ;;  %v1895_v15 = vrot.slane %v1893_v55, 7  ;;  %v1903_v7 = vrot.slane %v1901_v29, 7  ;;  %v1925_v33 = vshrl.u32 %v6124_v58, 16  ;;  %3606 = vmatpush.bf16.msrb.mxu2 %v5176_v25  ;;  %v5196_v29 = vld [vmem:[%s6713_s4 + $0x130] sm:$0xff] }
 0x2c7   : > { %v6143_v47 = vrot.slane %v1909_v2, 7  ;;  %v1912_v11 = vshll.u32 %v1879_v24, 16  ;;  %v1920_v44 = vshll.u32 %v6122_v27, 16  ;;  %v1919_v39 = vrot.slane %v1917_v28, 7  ;;  %3576 = vmatpush.bf16.msrb.mxu1 %v5169_v43  ;;  %v1998_v27 = vld [vmem:[#allocation2 + $0x2c] sm:$0x1] }
 0x2c8   : > { %v1890_v53 = vor.u32 %v1888_v18, %v1887_v4  ;;  %v1891_v50 = vrot.slane %v1887_v4, 4  ;;  %v1898_v31 = vor.u32 %v1896_v23, %v1895_v15  ;;  %v1899_v20 = vrot.slane %v1895_v15, 4  ;;  %v5182_v18 = vld [vmem:[%s6713_s4 + $0xc0] sm:$0xff]  ;;  %v2004_v15 = vld [vmem:[#allocation2 + $0x34] sm:$0x1]  ;;  %v5167_v28 = vld [vmem:[%s6713_s4 + $0x48] sm:$0xff]  ;;  %3660 = vmatpush.bf16.msra.mxu3 %v5196_v29 }
 0x2c9   : > { %v1906_v35 = vor.u32 %v1904_v54, %v1903_v7  ;;  %v1907_v40 = vrot.slane %v1903_v7, 4  ;;  %v1914_v3 = vor.u32 %v1912_v11, %v6143_v47  ;;  %v1933_v34 = vshrl.u32 %v6129_v9, 16  ;;  %3636 = vmatpush.bf16.msra.mxu0 %v5183_v6  ;;  %v5174_v23 = vld [vmem:[%s6713_s4 + $0x80] sm:$0xff]  ;;  %v2007_v25 = vld [vmem:[#allocation2 + $0x38] sm:$0xf] }
 0x2ca   : > { %v6173_v10 = vrot.slane %v1925_v33, 7  ;;  %v1941_v51 = vshrl.u32 %v6134_v61, 16  ;;  %v1969_v13 = vsel %vm6148_vm11, %v1890_v53, %v1968_v32  ;;  %v1975_v41 = vsel %vm6157_vm12, %v1891_v50, %v1974_v37  ;;  %3607 = vmatpush.bf16.msrb.mxu2 %v5175_v8  ;;  %v2013_v33 = vld [vmem:[#allocation2 + $0x40] sm:$0xf]  ;;  %v2180_v11 = vld [vmem:[#allocation2 + $0x4] sm:$0x1] }
 0x2cb   : > { %v1915_v17 = vrot.slane %v6143_v47, 4  ;;  %v1922_v48 = vor.u32 %v1920_v44, %v1919_v39  ;;  %1970 = vst [vmem:[#allocation2 + $0x8] sm:$0xf] %v1969_v13  ;;  %v1928_v1 = vshll.u32 %v6124_v58, 16  ;;  %v6188_v16 = vrot.slane %v1933_v34, 7  ;;  %3577 = vmatpush.bf16.msrb.mxu1 %v5168_v14 }
 0x2cc   : > { %1976 = vst [vmem:[#allocation2 + $0xc] sm:$0x1] %v1975_v41  ;;  %v1978_v24 = vsel %vm6148_vm11, %v1898_v31, %v1977_v12  ;;  %v1981_v26 = vsel %vm6157_vm12, %v1899_v20, %v1980_v22  ;;  %v1923_v38 = vrot.slane %v1919_v39, 4  ;;  %v6194_v45 = vrot.slane %v1941_v51, 7  ;;  %v2010_v47 = vld [vmem:[#allocation2 + $0x3c] sm:$0x1]  ;;  %3661 = vmatpush.bf16.msra.mxu3 %v5195_v52 }
 0x2cd   : > { %1979 = vst [vmem:[#allocation2 + $0x10] sm:$0xf] %v1978_v24  ;;  %v1984_v55 = vsel %vm6148_vm11, %v1906_v35, %v1983_v59  ;;  %v1987_v58 = vsel %vm6157_vm12, %v1907_v40, %v1986_v36  ;;  %v1930_v2 = vor.u32 %v1928_v1, %v6173_v10  ;;  %v1936_v0 = vshll.u32 %v6129_v9, 16  ;;  %v6223_v43 = vld [vmem:[#allocation2] sm:$0xe]  ;;  %3637 = vmatpush.bf16.msra.mxu0 %v5182_v18 }
 0x2ce   : > { %1982 = vst [vmem:[#allocation2 + $0x14] sm:$0x1] %v1981_v26  ;;  %v1990_v4 = vsel %vm6148_vm11, %v1914_v3, %v1989_v63  ;;  %v1931_v32 = vrot.slane %v6173_v10, 4  ;;  %v1944_v37 = vshll.u32 %v6134_v61, 16  ;;  %v1993_v9 = vsel %vm6157_vm12, %v1915_v17, %v1992_v57  ;;  %v2035_v12 = vld [vmem:[#allocation2] sm:$0xf]  ;;  %3608 = vmatpush.bf16.msrb.mxu2 %v5174_v23 }
 0x2cf   : > { %1985 = vst [vmem:[#allocation2 + $0x18] sm:$0xf] %v1984_v55  ;;  %v1938_v7 = vor.u32 %v1936_v0, %v6188_v16  ;;  %v1996_v54 = vsel %vm6148_vm11, %v1922_v48, %v1995_v19  ;;  %v1939_v53 = vrot.slane %v6188_v16, 4  ;;  %v1999_v61 = vsel %vm6157_vm12, %v1923_v38, %v1998_v27  ;;  %v2016_v31 = vld [vmem:[#allocation2 + $0x44] sm:$0x1]  ;;  %3578 = vmatpush.bf16.msrb.mxu1 %v5167_v28 }
 0x2d0   : > { %1988 = vst [vmem:[#allocation2 + $0x1c] sm:$0x1] %v1987_v58  ;;  %v1946_v50 = vor.u32 %v1944_v37, %v6194_v45  ;;  %v1947_v22 = vrot.slane %v6194_v45, 4  ;;  %v2002_v62 = vsel %vm6148_vm11, %v1930_v2, %v2001_v60  ;;  %v5166_v20 = vld [vmem:[%s6713_s4 + $0x40] sm:$0xff]  ;;  %v2005_v44 = vsel %vm6157_vm12, %v1931_v32, %v2004_v15  ;;  %v4607_v37 = vld [vmem:[#allocation3] sm:$0xf] }
 0x2d1   : > { %1991 = vst [vmem:[#allocation2 + $0x20] sm:$0xf] %v1990_v4  ;;  %v2036_v35 = vld [vmem:[#allocation2 + $0x4] sm:$0x1]  ;;  %v4581_v59 = vrot.slane %v6223_v43, 9  ;;  %v2008_v36 = vsel %vm6148_vm11, %v1938_v7, %v2007_v25  ;;  %v2011_v40 = vsel %vm6157_vm12, %v1939_v53, %v2010_v47  ;;  %v2216_v10 = vrot.slane %v2180_v11, 5 }
 0x2d2   : > { %1994 = vst [vmem:[#allocation2 + $0x24] sm:$0x1] %v1993_v9  ;;  %v2181_v6 = vld [vmem:[#allocation2 + $0x8] sm:$0xe]  ;;  %v2014_v3 = vsel %vm6148_vm11, %v1946_v50, %v2013_v33  ;;  %v2052_v51 = vshrl.u32 %v2035_v12, 16  ;;  %v2055_v13 = vshll.u32 %v2035_v12, 16  ;;  %v2017_v57 = vsel %vm6157_vm12, %v1947_v22, %v2016_v31 }
 0x2d3   : > { %1997 = vst [vmem:[#allocation2 + $0x28] sm:$0xf] %v1996_v54  ;;  %v2182_v56 = vld [vmem:[#allocation2 + $0xc] sm:$0x1]  ;;  %v2037_v39 = vld [vmem:[#allocation2 + $0x8] sm:$0xf]  ;;  %3579 = vmatpush.bf16.msrb.mxu1 %v5166_v20  ;;  %v2217_v60 = vsel %vm6251_vm15, %v4581_v59, %v2216_v10 }
 0x2d4   : > { %2000 = vst [vmem:[#allocation2 + $0x2c] sm:$0x1] %v1999_v61  ;;  %v2038_v34 = vld [vmem:[#allocation2 + $0xc] sm:$0x1]  ;;  %v2020_v63 = vld [vmem:[#allocation2 + $0x8] sm:$0xf] }
 0x2d5   : > { %2003 = vst [vmem:[#allocation2 + $0x30] sm:$0xf] %v2002_v62  ;;  %v2061_v41 = vshll.u32 %v2036_v35, 16  ;;  %v2262_v8 = vld [vmem:[#allocation2 + $0x8] sm:$0xf]  ;;  %v4582_v14 = vrot.slane %v2181_v6, 9 }
 0x2d6   : > { %2006 = vst [vmem:[#allocation2 + $0x34] sm:$0x1] %v2005_v44  ;;  %v2066_v17 = vshrl.u32 %v2037_v39, 16  ;;  %v2069_v48 = vshll.u32 %v2037_v39, 16  ;;  %v2220_v1 = vrot.slane %v2182_v56, 5  ;;  %v2054_v16 = vrot.slane %v2052_v51, 4 }
 0x2d7   : > { %2009 = vst [vmem:[#allocation2 + $0x38] sm:$0xf] %v2008_v36  ;;  %v2057_v24 = vrot.slane %v2055_v13, 5  ;;  %v2075_v42 = vshll.u32 %v2038_v34, 16  ;;  %v5194_v38 = vld [vmem:[%s6713_s4 + $0x120] sm:$0xff]  ;;  %v2063_v58 = vrot.slane %v2061_v41, 5 }
 0x2d8   : > { %2012 = vst [vmem:[#allocation2 + $0x3c] sm:$0x1] %v2011_v40  ;;  %v2068_v26 = vrot.slane %v2066_v17, 4  ;;  %v2071_v27 = vrot.slane %v2069_v48, 5  ;;  %v2263_v45 = vld [vmem:[#allocation2 + $0x10] sm:$0xf]  ;;  %v2221_v29 = vsel %vm6251_vm15, %v4582_v14, %v2220_v1  ;;  %3662 = vmatpush.bf16.msra.mxu3 %v5194_v38 }
 0x2d9   : > { %2015 = vst [vmem:[#allocation2 + $0x40] sm:$0xf] %v2014_v3  ;;  %v2058_v55 = vor.u32 %v2057_v24, %v2054_v16  ;;  %v2077_v0 = vrot.slane %v2075_v42, 5  ;;  %v2183_v4 = vld [vmem:[#allocation2 + $0x10] sm:$0xe]  ;;  %v5193_v42 = vld [vmem:[%s6713_s4 + $0x118] sm:$0xff] }
 0x2da   : > { %2018 = vst [vmem:[#allocation2 + $0x44] sm:$0x1] %v2017_v57  ;;  %v2072_v18 = vor.u32 %v2071_v27, %v2068_v26  ;;  %v2021_v23 = vld [vmem:[#allocation2 + $0x10] sm:$0xf]  ;;  %v2184_v28 = vld [vmem:[#allocation2 + $0x14] sm:$0x1] }
 0x2db   : > { %2028 = vst [vmem:[#allocation3 + $0x24] sm:$0xf] %v2020_v63  ;;  %v2059_v2 = vrot.slane %v2058_v55, 4  ;;  %v4583_v32 = vrot.slane %v2183_v4, 9  ;;  %v2022_v25 = vld [vmem:[#allocation2 + $0x18] sm:$0xf] }
 0x2dc   : > { %2270 = vst [vmem:[#allocation3 + $0xc] sm:$0xf] %v2262_v8  ;;  %v2073_v15 = vrot.slane %v2072_v18, 4  ;;  %v2185_v7 = vld [vmem:[#allocation2 + $0x18] sm:$0xe]  ;;  %v2224_v43 = vrot.slane %v2184_v28, 5  ;;  %3663 = vmatpush.bf16.msra.mxu3 %v5193_v42 }
 0x2dd   : > { %2271 = vst [vmem:[#allocation3 + $0x30] sm:$0xf] %v2263_v45  ;;  %v2064_v9 = vsel %vm5635_vm3, %v2059_v2, %v2063_v58  ;;  %v2186_v54 = vld [vmem:[#allocation2 + $0x1c] sm:$0x1]  ;;  %v2264_v33 = vld [vmem:[#allocation2 + $0x18] sm:$0xf] }
 0x2de   : > { %2254 = vst [vmem:[#allocation3 + $0x8] sm:$0xf] %v2217_v60  ;;  %v2078_v47 = vsel %vm5635_vm3, %v2073_v15, %v2077_v0  ;;  %v4584_v53 = vrot.slane %v2185_v7, 9  ;;  %v2228_v50 = vrot.slane %v2186_v54, 5  ;;  %v2039_v61 = vld [vmem:[#allocation2 + $0x10] sm:$0xf]  ;;  %v2225_v59 = vsel %vm6251_vm15, %v4583_v32, %v2224_v43 }
 0x2df   : > { %2255 = vst [vmem:[#allocation3 + $0x2c] sm:$0xf] %v2221_v29  ;;  %v2040_v11 = vld [vmem:[#allocation2 + $0x14] sm:$0x1]  ;;  %v2265_v12 = vld [vmem:[#allocation2 + $0x20] sm:$0xf] }
 0x2e0   : > { %2171 = vst [vmem:[#allocation3 + $0x4] sm:$0xf] %v2064_v9  ;;  %v2041_v22 = vld [vmem:[#allocation2 + $0x18] sm:$0xf]  ;;  %v2080_v31 = vshrl.u32 %v2039_v61, 16  ;;  %v2083_v20 = vshll.u32 %v2039_v61, 16  ;;  %v2229_v3 = vsel %vm6251_vm15, %v4584_v53, %v2228_v50 }
 0x2e1   : > { %2172 = vst [vmem:[#allocation3 + $0x28] sm:$0xf] %v2078_v47  ;;  %v2042_v36 = vld [vmem:[#allocation2 + $0x1c] sm:$0x1]  ;;  %v2089_v6 = vshll.u32 %v2040_v11, 16  ;;  %v2094_v56 = vshrl.u32 %v2041_v22, 16 }
 0x2e2   : > { %v5126_v62 = vld [vmem:[#allocation3 + $0x20] sm:$0xf0]  ;;  %2029 = vst [vmem:[#allocation3 + $0x48] sm:$0xf] %v2021_v23  ;;  %v2082_v39 = vrot.slane %v2080_v31, 4  ;;  %v2085_v34 = vrot.slane %v2083_v20, 5 }
 0x2e3   : > { %v4608_v35 = vor.u32 %v5126_v62, %v4607_v37  ;;  %v5123_v44 = vld [vmem:[#allocation3 + $0xc] sm:$0xf]  ;;  %2030 = vst [vmem:[#allocation3 + $0x6c] sm:$0xf] %v2022_v25  ;;  %v2091_v51 = vrot.slane %v2089_v6, 5  ;;  %v2096_v57 = vrot.slane %v2094_v56, 4 }
 0x2e4   : > { %v4617_v40 = vld [vmem:[#allocation3 + $0x2c] sm:$0xf0]  ;;  %2272 = vst [vmem:[#allocation3 + $0x54] sm:$0xf] %v2264_v33  ;;  %v2086_v41 = vor.u32 %v2085_v34, %v2082_v39  ;;  %v2097_v8 = vshll.u32 %v2041_v22, 16  ;;  %v2103_v24 = vshll.u32 %v2042_v36, 16 }
 0x2e5   : > { %3551 = vmatmul.bf16.vlgmr.msrb.gmra.mxu3 %v4608_v35  ;;  %v4620_v63 = vor.u32 %v5123_v44, %v4617_v40  ;;  %v4615_v10 = vld [vmem:[#allocation3 + $0x8] sm:$0xf]  ;;  %2273 = vst [vmem:[#allocation3 + $0x78] sm:$0xf] %v2265_v12  ;;  %v2023_v48 = vld [vmem:[#allocation2 + $0x20] sm:$0xf] }
 0x2e6   : > { %v5127_v13 = vld [vmem:[#allocation3 + $0x28] sm:$0xf0]  ;;  %2256 = vst [vmem:[#allocation3 + $0x50] sm:$0xf] %v2225_v59  ;;  %v2087_v1 = vrot.slane %v2086_v41, 4  ;;  %v2099_v16 = vrot.slane %v2097_v8, 5 }
 0x2e7   : > { %3638 = vmatmul.bf16.vlgmr.msra.gmra.mxu0 %v4620_v63  ;;  %v4616_v14 = vor.u32 %v5127_v13, %v4615_v10  ;;  %v5122_v17 = vld [vmem:[#allocation3 + $0x4] sm:$0xf]  ;;  %2257 = vst [vmem:[#allocation3 + $0x74] sm:$0xf] %v2229_v3  ;;  %v2024_v27 = vld [vmem:[#allocation2 + $0x28] sm:$0xf] }
 0x2e8   : > { %v4609_v52 = vld [vmem:[#allocation3 + $0x24] sm:$0xf0]  ;;  %2031 = vst [vmem:[#allocation3 + $0x90] sm:$0xf] %v2023_v48  ;;  %v2092_v38 = vsel %vm5635_vm3, %v2087_v1, %v2091_v51  ;;  %v2100_v45 = vor.u32 %v2099_v16, %v2096_v57  ;;  %v2266_v55 = vld [vmem:[#allocation2 + $0x28] sm:$0xf] }
 0x2e9   : > { %3609 = vmatmul.bf16.vlgmr.msrb.gmra.mxu2 %v4616_v14  ;;  %v4612_v26 = vor.u32 %v5122_v17, %v4609_v52  ;;  %2032 = vst [vmem:[#allocation3 + $0xb4] sm:$0xf] %v2024_v27  ;;  %v2267_v58 = vld [vmem:[#allocation2 + $0x30] sm:$0xf]  ;;  %v2105_v18 = vrot.slane %v2103_v24, 5  ;;  %v5221_v29 = vld [vmem:[%s6713_s4 + $0x1f8] sm:$0xff] }
 0x2ea   : > { %2173 = vst [vmem:[#allocation3 + $0x4c] sm:$0xf] %v2092_v38  ;;  %v2101_v60 = vrot.slane %v2100_v45, 4  ;;  %v2187_v2 = vld [vmem:[#allocation2 + $0x20] sm:$0xe]  ;;  %3746 = vmatpush.bf16.msrb.mxu0 %v5221_v29  ;;  %v5213_v54 = vld [vmem:[%s6713_s4 + $0x1b8] sm:$0xff] }
 0x2eb   : > { %3580 = vmatmul.bf16.vlgmr.msrb.gmra.mxu1 %v4612_v26  ;;  %2274 = vst [vmem:[#allocation3 + $0x9c] sm:$0xf] %v2266_v55  ;;  %v4643_v0 = vld [vmem:[#allocation3 + $0x48] sm:$0xf]  ;;  %v2188_v15 = vld [vmem:[#allocation2 + $0x24] sm:$0x1]  ;;  %3717 = vmatpush.bf16.msra.mxu2 %v5213_v54 }
 0x2ec   : > { %2275 = vst [vmem:[#allocation3 + $0xc0] sm:$0xf] %v2267_v58  ;;  %v2106_v4 = vsel %vm5635_vm3, %v2101_v60, %v2105_v18  ;;  %v2189_v23 = vld [vmem:[#allocation2 + $0x28] sm:$0xe]  ;;  %v2190_v28 = vld [vmem:[#allocation2 + $0x2c] sm:$0x1] }
 0x2ed   : > { %2174 = vst [vmem:[#allocation3 + $0x70] sm:$0xf] %v2106_v4  ;;  %v4585_v32 = vrot.slane %v2187_v2, 9  ;;  %v2232_v37 = vrot.slane %v2188_v15, 5  ;;  %v5135_v9 = vld [vmem:[#allocation3 + $0x68] sm:$0xf0] }
 0x2ee   : > { %v4586_v25 = vrot.slane %v2189_v23, 9  ;;  %v2236_v7 = vrot.slane %v2190_v28, 5  ;;  %v5220_v47 = vld [vmem:[%s6713_s4 + $0x1f0] sm:$0xff]  ;;  %v5132_v33 = vld [vmem:[#allocation3 + $0x54] sm:$0xf]  ;;  %v4644_v22 = vor.u32 %v5135_v9, %v4643_v0  ;;  %v5219_v40 = vld [vmem:[%s6713_s4 + $0x1e8] sm:$0xff] }
 0x2ef   : > { %v4653_v43 = vld [vmem:[#allocation3 + $0x74] sm:$0xf0]  ;;  %v2233_v53 = vsel %vm6251_vm15, %v4585_v32, %v2232_v37  ;;  %v5192_v50 = vld [vmem:[%s6713_s4 + $0x110] sm:$0xff]  ;;  %3747 = vmatpush.bf16.msrb.mxu0 %v5220_v47  ;;  %v2043_v12 = vld [vmem:[#allocation2 + $0x20] sm:$0xf] }
 0x2f0   : > { %v2237_v61 = vsel %vm6251_vm15, %v4586_v25, %v2236_v7  ;;  %2258 = vst [vmem:[#allocation3 + $0x98] sm:$0xf] %v2233_v53  ;;  %v5212_v11 = vld [vmem:[%s6713_s4 + $0x1b0] sm:$0xff]  ;;  %v4651_v62 = vld [vmem:[#allocation3 + $0x50] sm:$0xf]  ;;  %3664 = vmatpush.bf16.msra.mxu3 %v5192_v50  ;;  %v4656_v59 = vor.u32 %v5132_v33, %v4653_v43  ;;  %v2108_v6 = vshrl.u32 %v2043_v12, 16 }
 0x2f1   : > { %2259 = vst [vmem:[#allocation3 + $0xbc] sm:$0xf] %v2237_v61  ;;  %v2044_v31 = vld [vmem:[#allocation2 + $0x24] sm:$0x1]  ;;  %v2045_v35 = vld [vmem:[#allocation2 + $0x28] sm:$0xf]  ;;  %3718 = vmatpush.bf16.msra.mxu2 %v5212_v11 }
 0x2f2   : > { %v5136_v20 = vld [vmem:[#allocation3 + $0x70] sm:$0xf0]  ;;  %v2046_v44 = vld [vmem:[#allocation2 + $0x2c] sm:$0x1]  ;;  %v5131_v36 = vld [vmem:[#allocation3 + $0x4c] sm:$0xf] }
 0x2f3   : > { %v2111_v56 = vshll.u32 %v2043_v12, 16  ;;  %v5205_v3 = vld [vmem:[%s6713_s4 + $0x178] sm:$0xff]  ;;  %v2117_v34 = vshll.u32 %v2044_v31, 16  ;;  %v2122_v63 = vshrl.u32 %v2045_v35, 16  ;;  %v2125_v10 = vshll.u32 %v2045_v35, 16  ;;  %v5211_v51 = vld [vmem:[%s6713_s4 + $0x1a8] sm:$0xff]  ;;  %3748 = vmatpush.bf16.msrb.mxu0 %v5219_v40 }
 0x2f4   : > { %v4645_v39 = vld [vmem:[#allocation3 + $0x6c] sm:$0xf0]  ;;  %v4652_v13 = vor.u32 %v5136_v20, %v4651_v62  ;;  %v2110_v41 = vrot.slane %v2108_v6, 4  ;;  %v2131_v8 = vshll.u32 %v2046_v44, 16  ;;  %3688 = vmatpush.bf16.msra.mxu1 %v5205_v3  ;;  %v2025_v17 = vld [vmem:[#allocation2 + $0x30] sm:$0xf] }
 0x2f5   : > { %3556 = vmatmul.bf16.gmra.mxu3 %v4644_v22  ;;  %v2113_v57 = vrot.slane %v2111_v56, 5  ;;  %v5218_v14 = vld [vmem:[%s6713_s4 + $0x1e0] sm:$0xff]  ;;  %v2124_v48 = vrot.slane %v2122_v63, 4  ;;  %v2127_v52 = vrot.slane %v2125_v10, 5  ;;  %v5204_v1 = vld [vmem:[%s6713_s4 + $0x170] sm:$0xff]  ;;  %v5191_v24 = vld [vmem:[%s6713_s4 + $0x108] sm:$0xff]  ;;  %v4648_v42 = vor.u32 %v5131_v36, %v4645_v39  ;;  %3719 = vmatpush.bf16.msra.mxu2 %v5211_v51 }
 0x2f6   : > { %v2026_v16 = vld [vmem:[#allocation2 + $0x38] sm:$0xf]  ;;  %2033 = vst [vmem:[#allocation3 + $0xd8] sm:$0xf] %v2025_v17  ;;  %v2119_v38 = vrot.slane %v2117_v34, 5  ;;  %3665 = vmatpush.bf16.msra.mxu3 %v5191_v24  ;;  %v2133_v60 = vrot.slane %v2131_v8, 5 }
 0x2f7   : > { %3643 = vmatmul.bf16.gmra.mxu0 %v4656_v59  ;;  %v2114_v26 = vor.u32 %v2113_v57, %v2110_v41  ;;  %v2268_v27 = vld [vmem:[#allocation2 + $0x38] sm:$0xf]  ;;  %v2128_v45 = vor.u32 %v2127_v52, %v2124_v48  ;;  %2034 = vst [vmem:[#allocation3 + $0xfc] sm:$0xf] %v2026_v16  ;;  %v2269_v55 = vld [vmem:[#allocation2 + $0x40] sm:$0xf] }
 0x2f8   : > { %2276 = vst [vmem:[#allocation3 + $0xe4] sm:$0xf] %v2268_v27  ;;  %v5210_v18 = vld [vmem:[%s6713_s4 + $0x1a0] sm:$0xff]  ;;  %v5217_v29 = vld [vmem:[%s6713_s4 + $0x1d8] sm:$0xff]  ;;  %3749 = vmatpush.bf16.msrb.mxu0 %v5218_v14  ;;  %3689 = vmatpush.bf16.msra.mxu1 %v5204_v1  ;;  %v5203_v0 = vld [vmem:[%s6713_s4 + $0x168] sm:$0xff] }
 0x2f9   : > { %3614 = vmatmul.bf16.gmra.mxu2 %v4652_v13  ;;  %v2115_v58 = vrot.slane %v2114_v26, 4  ;;  %v2129_v2 = vrot.slane %v2128_v45, 4  ;;  %2277 = vst [vmem:[#allocation3 + $0x108] sm:$0xf] %v2269_v55  ;;  %v2191_v4 = vld [vmem:[#allocation2 + $0x30] sm:$0xe] }
 0x2fa   : > { %v4679_v15 = vld [vmem:[#allocation3 + $0x90] sm:$0xf]  ;;  %v5144_v23 = vld [vmem:[#allocation3 + $0xb0] sm:$0xf0]  ;;  %v2192_v32 = vld [vmem:[#allocation2 + $0x34] sm:$0x1]  ;;  %3720 = vmatpush.bf16.msra.mxu2 %v5210_v18 }
 0x2fb   : > { %3585 = vmatmul.bf16.gmra.mxu1 %v4648_v42  ;;  %v2120_v28 = vsel %vm5635_vm3, %v2115_v58, %v2119_v38  ;;  %v2193_v37 = vld [vmem:[#allocation2 + $0x38] sm:$0xe]  ;;  %v2194_v9 = vld [vmem:[#allocation2 + $0x3c] sm:$0x1]  ;;  %v2134_v25 = vsel %vm5635_vm3, %v2129_v2, %v2133_v60  ;;  %v4587_v7 = vrot.slane %v2191_v4, 9  ;;  %v2240_v54 = vrot.slane %v2192_v32, 5 }
 0x2fc   : > { %2175 = vst [vmem:[#allocation3 + $0x94] sm:$0xf] %v2120_v28  ;;  %v4588_v47 = vrot.slane %v2193_v37, 9  ;;  %v5209_v33 = vld [vmem:[%s6713_s4 + $0x198] sm:$0xff]  ;;  %v2244_v43 = vrot.slane %v2194_v9, 5  ;;  %v5216_v53 = vld [vmem:[%s6713_s4 + $0x1d0] sm:$0xff]  ;;  %3750 = vmatpush.bf16.msrb.mxu0 %v5217_v29  ;;  %3690 = vmatpush.bf16.msra.mxu1 %v5203_v0  ;;  %v4680_v44 = vor.u32 %v5144_v23, %v4679_v15 }
 0x2fd   : > { %2176 = vst [vmem:[#allocation3 + $0xb8] sm:$0xf] %v2134_v25  ;;  %v5190_v50 = vld [vmem:[%s6713_s4 + $0x100] sm:$0xff]  ;;  %v5141_v61 = vld [vmem:[#allocation3 + $0x9c] sm:$0xf]  ;;  %v2241_v11 = vsel %vm6251_vm15, %v4587_v7, %v2240_v54  ;;  %v5208_v59 = vld [vmem:[%s6713_s4 + $0x190] sm:$0xff] }
 0x2fe   : > { %v5202_v12 = vld [vmem:[%s6713_s4 + $0x160] sm:$0xff]  ;;  %v2047_v22 = vld [vmem:[#allocation2 + $0x30] sm:$0xf]  ;;  %v2048_v62 = vld [vmem:[#allocation2 + $0x34] sm:$0x1]  ;;  %v2245_v20 = vsel %vm6251_vm15, %v4588_v47, %v2244_v43  ;;  %3666 = vmatpush.bf16.msra.mxu3 %v5190_v50  ;;  %3721 = vmatpush.bf16.msra.mxu2 %v5209_v33 }
 0x2ff   : > { %v4689_v31 = vld [vmem:[#allocation3 + $0xbc] sm:$0xf0]  ;;  %2260 = vst [vmem:[#allocation3 + $0xe0] sm:$0xf] %v2241_v11  ;;  %v2049_v35 = vld [vmem:[#allocation2 + $0x38] sm:$0xf] }
 0x300   : > { %2261 = vst [vmem:[#allocation3 + $0x104] sm:$0xf] %v2245_v20  ;;  %v2050_v36 = vld [vmem:[#allocation2 + $0x3c] sm:$0x1]  ;;  %v4687_v6 = vld [vmem:[#allocation3 + $0x98] sm:$0xf]  ;;  %3751 = vmatpush.bf16.msrb.mxu0 %v5216_v53  ;;  %3691 = vmatpush.bf16.msra.mxu1 %v5202_v12  ;;  %v4692_v41 = vor.u32 %v5141_v61, %v4689_v31 }
 0x301   : > { %v2136_v56 = vshrl.u32 %v2047_v22, 16  ;;  %v2139_v40 = vshll.u32 %v2047_v22, 16  ;;  %v2145_v3 = vshll.u32 %v2048_v62, 16  ;;  %v2150_v39 = vshrl.u32 %v2049_v35, 16  ;;  %v5145_v34 = vld [vmem:[#allocation3 + $0xb8] sm:$0xf0] }
 0x302   : > { %v2153_v63 = vshll.u32 %v2049_v35, 16  ;;  %v2159_v10 = vshll.u32 %v2050_v36, 16  ;;  %v5215_v51 = vld [vmem:[%s6713_s4 + $0x1c8] sm:$0xff]  ;;  %v5201_v13 = vld [vmem:[%s6713_s4 + $0x158] sm:$0xff]  ;;  %3722 = vmatpush.bf16.msra.mxu2 %v5208_v59  ;;  %v4688_v42 = vor.u32 %v5145_v34, %v4687_v6  ;;  %v2280_v45 = vld [vmem:[#allocation2 + $0x10] sm:$0xf] }
 0x303   : > { %v5140_v57 = vld [vmem:[#allocation3 + $0x94] sm:$0xf]  ;;  %v2138_v8 = vrot.slane %v2136_v56, 4  ;;  %v2141_v14 = vrot.slane %v2139_v40, 5  ;;  %v2152_v17 = vrot.slane %v2150_v39, 4  ;;  %v2147_v52 = vrot.slane %v2145_v3, 5 }
 0x304   : > { %v4681_v48 = vld [vmem:[#allocation3 + $0xb4] sm:$0xf0]  ;;  %v2155_v1 = vrot.slane %v2153_v63, 5  ;;  %v2161_v16 = vrot.slane %v2159_v10, 5  ;;  %v2279_v38 = vld [vmem:[#allocation2 + $0xc] sm:$0x1]  ;;  %3752 = vmatpush.bf16.msrb.mxu0 %v5215_v51  ;;  %3692 = vmatpush.bf16.msra.mxu1 %v5201_v13 }
 0x305   : > { %3561 = vmatmul.bf16.gmra.mxu3 %v4680_v44  ;;  %v5207_v24 = vld [vmem:[%s6713_s4 + $0x188] sm:$0xff]  ;;  %v2142_v26 = vor.u32 %v2141_v14, %v2138_v8  ;;  %v4684_v55 = vor.u32 %v5140_v57, %v4681_v48  ;;  %v5214_v60 = vld [vmem:[%s6713_s4 + $0x1c0] sm:$0xff]  ;;  %v5200_v18 = vld [vmem:[%s6713_s4 + $0x150] sm:$0xff]  ;;  %v2304_v15 = vshll.u32 %v2279_v38, 16  ;;  %v2309_v23 = vshrl.u32 %v2280_v45, 16 }
 0x306   : > { %v2278_v27 = vld [vmem:[#allocation2 + $0x8] sm:$0xf]  ;;  %v2156_v58 = vor.u32 %v2155_v1, %v2152_v17  ;;  %v2281_v4 = vld [vmem:[#allocation2 + $0x14] sm:$0x1]  ;;  %v2312_v28 = vshll.u32 %v2280_v45, 16  ;;  %3723 = vmatpush.bf16.msra.mxu2 %v5207_v24  ;;  %v5206_v25 = vld [vmem:[%s6713_s4 + $0x180] sm:$0xff] }
 0x307   : > { %3648 = vmatmul.bf16.gmra.mxu0 %v4692_v41  ;;  %v2295_v29 = vshrl.u32 %v2278_v27, 16  ;;  %v2298_v2 = vshll.u32 %v2278_v27, 16  ;;  %v2143_v0 = vrot.slane %v2142_v26, 4  ;;  %v2519_v7 = vld [vmem:[#allocation2 + $0x10] sm:$0xf]  ;;  %v2306_v47 = vrot.slane %v2304_v15, 5 }
 0x308   : > { %v2157_v32 = vrot.slane %v2156_v58, 4  ;;  %v2311_v33 = vrot.slane %v2309_v23, 4  ;;  %v2314_v43 = vrot.slane %v2312_v28, 5  ;;  %v2520_v53 = vld [vmem:[#allocation2 + $0x14] sm:$0x1]  ;;  %v5229_v50 = vld [vmem:[%s6713_s4 + $0x238] sm:$0xff]  ;;  %3753 = vmatpush.bf16.msrb.mxu0 %v5214_v60  ;;  %3693 = vmatpush.bf16.msra.mxu1 %v5200_v18 }
 0x309   : > { %3619 = vmatmul.bf16.gmra.mxu2 %v4688_v42  ;;  %v2297_v37 = vrot.slane %v2295_v29, 4  ;;  %v2300_v9 = vrot.slane %v2298_v2, 5  ;;  %v2148_v54 = vsel %vm5635_vm3, %v2143_v0, %v2147_v52  ;;  %v2318_v12 = vshll.u32 %v2281_v4, 16  ;;  %v2521_v22 = vld [vmem:[#allocation2 + $0x18] sm:$0xf]  ;;  %3775 = vmatpush.bf16.msrb.mxu3 %v5229_v50  ;;  %v6371_v6 = vld [vmem:[#allocation4 + $0x78] sm:$0xff] }
 0x30a   : > { %v2162_v61 = vsel %vm5635_vm3, %v2157_v32, %v2161_v16  ;;  %2177 = vst [vmem:[#allocation3 + $0xdc] sm:$0xf] %v2148_v54  ;;  %v2536_v62 = vshrl.u32 %v2519_v7, 16  ;;  %v4715_v31 = vld [vmem:[#allocation3 + $0xd8] sm:$0xf]  ;;  %v2315_v35 = vor.u32 %v2314_v43, %v2311_v33  ;;  %v2539_v59 = vshll.u32 %v2519_v7, 16  ;;  %3724 = vmatpush.bf16.msra.mxu2 %v5206_v25 }
 0x30b   : > { %3590 = vmatmul.bf16.gmra.mxu1 %v4684_v55  ;;  %v2301_v11 = vor.u32 %v2300_v9, %v2297_v37  ;;  %v5153_v20 = vld [vmem:[#allocation3 + $0xf8] sm:$0xf0]  ;;  %2178 = vst [vmem:[#allocation3 + $0x100] sm:$0xf] %v2162_v61  ;;  %v2522_v44 = vld [vmem:[#allocation2 + $0x1c] sm:$0x1] }
 0x30c   : > { %v2545_v36 = vshll.u32 %v2520_v53, 16  ;;  %3999 = vmatpush.msra.mxu0 %v6371_v6  ;;  %v2320_v40 = vrot.slane %v2318_v12, 5  ;;  %v2538_v3 = vrot.slane %v2536_v62, 4  ;;  %v2550_v39 = vshrl.u32 %v2521_v22, 16  ;;  %v5199_v34 = vld [vmem:[%s6713_s4 + $0x148] sm:$0xff]  ;;  %v5198_v8 = vld [vmem:[%s6713_s4 + $0x140] sm:$0xff] }
 0x30d   : > { %v2302_v56 = vrot.slane %v2301_v11, 4  ;;  %v5150_v63 = vld [vmem:[#allocation3 + $0xe4] sm:$0xf]  ;;  %v4725_v10 = vld [vmem:[#allocation3 + $0x104] sm:$0xf0]  ;;  %v2316_v51 = vrot.slane %v2315_v35, 4  ;;  %3694 = vmatpush.bf16.msra.mxu1 %v5199_v34  ;;  %v4716_v45 = vor.u32 %v5153_v20, %v4715_v31 }
 0x30e   : > { %v2541_v13 = vrot.slane %v2539_v59, 5  ;;  %v2553_v41 = vshll.u32 %v2521_v22, 16  ;;  %v2503_v57 = vld [vmem:[#allocation2 + $0x10] sm:$0xf]  ;;  %3870 = vmatpush.msrb.mxu2 %v6371_v6  ;;  %v6381_v14 = vld [vmem:[#allocation4 + $0x70] sm:$0xff]  ;;  %v2552_v48 = vrot.slane %v2550_v39, 4  ;;  %v4728_v15 = vor.u32 %v5150_v63, %v4725_v10 }
 0x30f   : > { %4000 = vmatpush.msra.mxu0 %v6381_v14  ;;  %v2307_v17 = vsel %vm5635_vm3, %v2302_v56, %v2306_v47  ;;  %v2559_v52 = vshll.u32 %v2522_v44, 16  ;;  %v2504_v1 = vld [vmem:[#allocation2 + $0x18] sm:$0xf]  ;;  %2511 = vst [vmem:[#allocation3 + $0x18] sm:$0xf] %v2503_v57  ;;  %v2321_v16 = vsel %vm5635_vm3, %v2316_v51, %v2320_v40  ;;  %v5228_v26 = vld [vmem:[%s6713_s4 + $0x230] sm:$0xff] }
 0x310   : > { %2414 = vst [vmem:[#allocation3 + $0x10] sm:$0xf] %v2307_v17  ;;  %v2542_v24 = vor.u32 %v2541_v13, %v2538_v3  ;;  %v2555_v42 = vrot.slane %v2553_v41, 5  ;;  %v2422_v27 = vld [vmem:[#allocation2 + $0x8] sm:$0xe]  ;;  %3871 = vmatpush.msrb.mxu2 %v6381_v14  ;;  %v6392_v38 = vld [vmem:[#allocation4 + $0x68] sm:$0xff]  ;;  %3776 = vmatpush.bf16.msrb.mxu3 %v5228_v26 }
 0x311   : > { %4001 = vmatpush.msra.mxu0 %v6392_v38  ;;  %v4723_v55 = vld [vmem:[#allocation3 + $0xe0] sm:$0xf]  ;;  %v5154_v58 = vld [vmem:[#allocation3 + $0x100] sm:$0xf0]  ;;  %2415 = vst [vmem:[#allocation3 + $0x34] sm:$0xf] %v2321_v16  ;;  %3695 = vmatpush.bf16.msra.mxu1 %v5198_v8 }
 0x312   : > { %v2423_v60 = vld [vmem:[#allocation2 + $0xc] sm:$0x1]  ;;  %v4589_v18 = vrot.slane %v2422_v27, 9  ;;  %v2543_v29 = vrot.slane %v2542_v24, 4  ;;  %v2547_v2 = vrot.slane %v2545_v36, 5  ;;  %v2556_v0 = vor.u32 %v2555_v42, %v2552_v48  ;;  %3872 = vmatpush.msrb.mxu2 %v6392_v38  ;;  %v6396_v9 = vld [vmem:[#allocation4 + $0x60] sm:$0xff] }
 0x313   : > { %2512 = vst [vmem:[#allocation3 + $0x3c] sm:$0xf] %v2504_v1  ;;  %v2456_v4 = vrot.slane %v2423_v60, 5  ;;  %v5149_v23 = vld [vmem:[#allocation3 + $0xdc] sm:$0xf]  ;;  %4002 = vmatpush.msra.mxu0 %v6396_v9  ;;  %v2561_v54 = vrot.slane %v2559_v52, 5  ;;  %v4724_v12 = vor.u32 %v5154_v58, %v4723_v55 }
 0x314   : > { %v4717_v28 = vld [vmem:[#allocation3 + $0xfc] sm:$0xf0]  ;;  %v2425_v37 = vld [vmem:[#allocation2 + $0x14] sm:$0x1]  ;;  %v2548_v25 = vsel %vm5635_vm3, %v2543_v29, %v2547_v2  ;;  %v2557_v7 = vrot.slane %v2556_v0, 4  ;;  %3873 = vmatpush.msrb.mxu2 %v6396_v9  ;;  %v6405_v11 = vld [vmem:[#allocation4 + $0x58] sm:$0xff] }
 0x315   : > { %v2424_v32 = vld [vmem:[#allocation2 + $0x10] sm:$0xe]  ;;  %3566 = vmatmul.bf16.gmra.mxu3 %v4716_v45  ;;  %v2457_v47 = vsel %vm6251_vm15, %v4589_v18, %v2456_v4  ;;  %v2282_v33 = vld [vmem:[#allocation2 + $0x18] sm:$0xf]  ;;  %v2283_v43 = vld [vmem:[#allocation2 + $0x1c] sm:$0x1]  ;;  %3819 = vmatpush.msrb.mxu1 %v6371_v6  ;;  %v4720_v59 = vor.u32 %v5149_v23, %v4717_v28 }
 0x316   : > { %2655 = vst [vmem:[#allocation3 + $0x1c] sm:$0xf] %v2548_v25  ;;  %v4590_v53 = vrot.slane %v2424_v32, 9  ;;  %v2460_v50 = vrot.slane %v2425_v37, 5  ;;  %v2284_v61 = vld [vmem:[#allocation2 + $0x20] sm:$0xf]  ;;  %4003 = vmatpush.msra.mxu0 %v6405_v11  ;;  %v2562_v22 = vsel %vm5635_vm3, %v2557_v7, %v2561_v54  ;;  %3874 = vmatpush.msrb.mxu2 %v6405_v11 }
 0x317   : > { %3653 = vmatmul.bf16.gmra.mxu0 %v4728_v15  ;;  %2494 = vst [vmem:[#allocation3 + $0x14] sm:$0xf] %v2457_v47  ;;  %3820 = vmatpush.msrb.mxu1 %v6381_v14  ;;  %v2285_v31 = vld [vmem:[#allocation2 + $0x24] sm:$0x1]  ;;  %v2323_v20 = vshrl.u32 %v2282_v33, 16  ;;  %v2326_v35 = vshll.u32 %v2282_v33, 16 }
 0x318   : > { %2656 = vst [vmem:[#allocation3 + $0x40] sm:$0xf] %v2562_v22  ;;  %v2461_v62 = vsel %vm6251_vm15, %v4590_v53, %v2460_v50  ;;  %v6414_v44 = vld [vmem:[#allocation4 + $0x50] sm:$0xff]  ;;  %v2332_v36 = vshll.u32 %v2283_v43, 16  ;;  %v2337_v56 = vshrl.u32 %v2284_v61, 16  ;;  %v2340_v39 = vshll.u32 %v2284_v61, 16 }
 0x319   : > { %4004 = vmatpush.msra.mxu0 %v6414_v44  ;;  %3624 = vmatmul.bf16.gmra.mxu2 %v4724_v12  ;;  %2495 = vst [vmem:[#allocation3 + $0x38] sm:$0xf] %v2461_v62  ;;  %v2325_v40 = vrot.slane %v2323_v20, 4  ;;  %v2328_v3 = vrot.slane %v2326_v35, 5  ;;  %v5227_v34 = vld [vmem:[%s6713_s4 + $0x228] sm:$0xff]  ;;  %v6422_v63 = vld [vmem:[#allocation4 + $0x48] sm:$0xff] }
 0x31a   : > { %3821 = vmatpush.msrb.mxu1 %v6392_v38  ;;  %3875 = vmatpush.msrb.mxu2 %v6414_v44  ;;  %v2339_v10 = vrot.slane %v2337_v56, 4  ;;  %v2346_v51 = vshll.u32 %v2285_v31, 16  ;;  %v2523_v13 = vld [vmem:[#allocation2 + $0x20] sm:$0xf]  ;;  %v2342_v8 = vrot.slane %v2340_v39, 5  ;;  %v2334_v1 = vrot.slane %v2332_v36, 5 }
 0x31b   : > { %4005 = vmatpush.msra.mxu0 %v6422_v63  ;;  %3595 = vmatmul.bf16.gmra.mxu1 %v4720_v59  ;;  %v5226_v41 = vld [vmem:[%s6713_s4 + $0x220] sm:$0xff]  ;;  %v2329_v57 = vor.u32 %v2328_v3, %v2325_v40  ;;  %v2525_v48 = vld [vmem:[#allocation2 + $0x28] sm:$0xf]  ;;  %v2564_v52 = vshrl.u32 %v2523_v13, 16  ;;  %v2526_v16 = vld [vmem:[#allocation2 + $0x2c] sm:$0x1] }
 0x31c   : > { %v2524_v17 = vld [vmem:[#allocation2 + $0x24] sm:$0x1]  ;;  %3777 = vmatpush.bf16.msrb.mxu3 %v5227_v34  ;;  %3822 = vmatpush.msrb.mxu1 %v6396_v9  ;;  %v2567_v24 = vshll.u32 %v2523_v13, 16  ;;  %v6430_v42 = vld [vmem:[#allocation4 + $0x40] sm:$0xff]  ;;  %v4623_v26 = vld [vmem:[#allocation3 + $0x10] sm:$0xf]  ;;  %v2343_v55 = vor.u32 %v2342_v8, %v2339_v10 }
 0x31d   : > { %3876 = vmatpush.msrb.mxu2 %v6422_v63  ;;  %4006 = vmatpush.msra.mxu0 %v6430_v42  ;;  %v5128_v27 = vld [vmem:[#allocation3 + $0x30] sm:$0xf0]  ;;  %v2330_v45 = vrot.slane %v2329_v57, 4  ;;  %v2566_v58 = vrot.slane %v2564_v52, 4  ;;  %v2573_v60 = vshll.u32 %v2524_v17, 16  ;;  %v2578_v2 = vshrl.u32 %v2525_v48, 16 }
 0x31e   : > { %3823 = vmatpush.msrb.mxu1 %v6405_v11  ;;  %v5125_v18 = vld [vmem:[#allocation3 + $0x1c] sm:$0xf]  ;;  %v2569_v29 = vrot.slane %v2567_v24, 5  ;;  %v2581_v0 = vshll.u32 %v2525_v48, 16  ;;  %v2587_v4 = vshll.u32 %v2526_v16, 16  ;;  %v2344_v32 = vrot.slane %v2343_v55, 4 }
 0x31f   : > { %3877 = vmatpush.msrb.mxu2 %v6430_v42  ;;  %v6435_v15 = vld [vmem:[#allocation4 + $0x38] sm:$0xff]  ;;  %v4633_v23 = vld [vmem:[#allocation3 + $0x3c] sm:$0xf0]  ;;  %v2335_v28 = vsel %vm5635_vm3, %v2330_v45, %v2334_v1  ;;  %v2348_v37 = vrot.slane %v2346_v51, 5  ;;  %v2505_v25 = vld [vmem:[#allocation2 + $0x20] sm:$0xf]  ;;  %v4624_v31 = vor.u32 %v5128_v27, %v4623_v26 }
 0x320   : > { %4007 = vmatpush.msra.mxu0 %v6435_v15  ;;  %3778 = vmatpush.bf16.msrb.mxu3 %v5226_v41  ;;  %2416 = vst [vmem:[#allocation3 + $0x58] sm:$0xf] %v2335_v28  ;;  %v2570_v7 = vor.u32 %v2569_v29, %v2566_v58  ;;  %v2580_v54 = vrot.slane %v2578_v2, 4  ;;  %v2583_v47 = vrot.slane %v2581_v0, 5  ;;  %v2506_v33 = vld [vmem:[#allocation2 + $0x28] sm:$0xf]  ;;  %v4636_v40 = vor.u32 %v5125_v18, %v4633_v23 }
 0x321   : > { %3824 = vmatpush.msrb.mxu1 %v6414_v44  ;;  %3878 = vmatpush.msrb.mxu2 %v6435_v15  ;;  %v6442_v43 = vld [vmem:[#allocation4 + $0x30] sm:$0xff]  ;;  %v4631_v53 = vld [vmem:[#allocation3 + $0x18] sm:$0xf]  ;;  %v5129_v50 = vld [vmem:[#allocation3 + $0x38] sm:$0xf0]  ;;  %v2349_v61 = vsel %vm5635_vm3, %v2344_v32, %v2348_v37  ;;  %v2575_v12 = vrot.slane %v2573_v60, 5 }
 0x322   : > { %4008 = vmatpush.msra.mxu0 %v6442_v43  ;;  %v2589_v22 = vrot.slane %v2587_v4, 5  ;;  %2513 = vst [vmem:[#allocation3 + $0x60] sm:$0xf] %v2505_v25  ;;  %v2426_v62 = vld [vmem:[#allocation2 + $0x18] sm:$0xe]  ;;  %v2571_v20 = vrot.slane %v2570_v7, 4  ;;  %v2584_v35 = vor.u32 %v2583_v47, %v2580_v54  ;;  %v4632_v16 = vor.u32 %v5129_v50, %v4631_v53 }
 0x323   : > { %3825 = vmatpush.msrb.mxu1 %v6422_v63  ;;  %2417 = vst [vmem:[#allocation3 + $0x7c] sm:$0xf] %v2349_v61  ;;  %v2427_v59 = vld [vmem:[#allocation2 + $0x1c] sm:$0x1]  ;;  %v4591_v36 = vrot.slane %v2426_v62, 9  ;;  %3879 = vmatpush.msrb.mxu2 %v6442_v43  ;;  %v6457_v1 = vld [vmem:[#allocation4 + $0x20] sm:$0xff] }
 0x324   : > { %v6449_v56 = vld [vmem:[#allocation4 + $0x28] sm:$0xff]  ;;  %v5124_v3 = vld [vmem:[#allocation3 + $0x14] sm:$0xf]  ;;  %v4625_v39 = vld [vmem:[#allocation3 + $0x34] sm:$0xf0]  ;;  %v2576_v51 = vsel %vm5635_vm3, %v2571_v20, %v2575_v12  ;;  %v2585_v13 = vrot.slane %v2584_v35, 4 }
 0x325   : > { %4009 = vmatpush.msra.mxu0 %v6449_v56  ;;  %2514 = vst [vmem:[#allocation3 + $0x84] sm:$0xf] %v2506_v33  ;;  %v2428_v34 = vld [vmem:[#allocation2 + $0x20] sm:$0xe]  ;;  %v2429_v10 = vld [vmem:[#allocation2 + $0x24] sm:$0x1]  ;;  %3826 = vmatpush.msrb.mxu1 %v6430_v42  ;;  %v4628_v2 = vor.u32 %v5124_v3, %v4625_v39 }
 0x326   : > { %3667 = vmatmul.bf16.vlgmr.msra.gmra.mxu3 %v4624_v31  ;;  %v2464_v41 = vrot.slane %v2427_v59, 5  ;;  %v4592_v57 = vrot.slane %v2428_v34, 9  ;;  %v2286_v8 = vld [vmem:[#allocation2 + $0x28] sm:$0xf]  ;;  %3880 = vmatpush.msrb.mxu2 %v6449_v56  ;;  %2657 = vst [vmem:[#allocation3 + $0x64] sm:$0xf] %v2576_v51  ;;  %v2590_v24 = vsel %vm5635_vm3, %v2585_v13, %v2589_v22 }
 0x327   : > { %v2468_v17 = vrot.slane %v2429_v10, 5  ;;  %v2287_v48 = vld [vmem:[#allocation2 + $0x2c] sm:$0x1]  ;;  %v2351_v52 = vshrl.u32 %v2286_v8, 16  ;;  %3827 = vmatpush.msrb.mxu1 %v6435_v15  ;;  %4010 = vmatpush.msra.mxu0 %v6457_v1  ;;  %v2288_v27 = vld [vmem:[#allocation2 + $0x30] sm:$0xf] }
 0x328   : > { %3754 = vmatmul.bf16.vlgmr.msrb.gmra.mxu0 %v4636_v40  ;;  %v2465_v26 = vsel %vm6251_vm15, %v4591_v36, %v2464_v41  ;;  %v2354_v45 = vshll.u32 %v2286_v8, 16  ;;  %3881 = vmatpush.msrb.mxu2 %v6457_v1  ;;  %2658 = vst [vmem:[#allocation3 + $0x88] sm:$0xf] %v2590_v24  ;;  %v2289_v58 = vld [vmem:[#allocation2 + $0x34] sm:$0x1]  ;;  %v2365_v18 = vshrl.u32 %v2288_v27, 16 }
 0x329   : > { %v2469_v55 = vsel %vm6251_vm15, %v4592_v57, %v2468_v17  ;;  %v2353_v60 = vrot.slane %v2351_v52, 4  ;;  %3828 = vmatpush.msrb.mxu1 %v6442_v43  ;;  %v6468_v29 = vld [vmem:[#allocation4 + $0x18] sm:$0xff]  ;;  %3725 = vmatmul.bf16.vlgmr.msra.gmra.mxu2 %v4632_v16  ;;  %2496 = vst [vmem:[#allocation3 + $0x5c] sm:$0xf] %v2465_v26  ;;  %v2360_v4 = vshll.u32 %v2287_v48, 16  ;;  %v2368_v28 = vshll.u32 %v2288_v27, 16 }
 0x32a   : > { %4011 = vmatpush.msra.mxu0 %v6468_v29  ;;  %v2356_v0 = vrot.slane %v2354_v45, 5  ;;  %2497 = vst [vmem:[#allocation3 + $0x80] sm:$0xf] %v2469_v55  ;;  %v2367_v23 = vrot.slane %v2365_v18, 4  ;;  %3882 = vmatpush.msrb.mxu2 %v6468_v29  ;;  %v2374_v37 = vshll.u32 %v2289_v58, 16  ;;  %v5225_v7 = vld [vmem:[%s6713_s4 + $0x218] sm:$0xff] }
 0x32b   : > { %3829 = vmatpush.msrb.mxu1 %v6449_v56  ;;  %v2527_v25 = vld [vmem:[#allocation2 + $0x30] sm:$0xf]  ;;  %v6476_v54 = vld [vmem:[#allocation4 + $0x10] sm:$0xff]  ;;  %v2370_v47 = vrot.slane %v2368_v28, 5  ;;  %v2528_v33 = vld [vmem:[#allocation2 + $0x34] sm:$0x1]  ;;  %3779 = vmatpush.bf16.msrb.mxu3 %v5225_v7 }
 0x32c   : > { %3696 = vmatmul.bf16.vlgmr.msra.gmra.mxu1 %v4628_v2  ;;  %v2357_v32 = vor.u32 %v2356_v0, %v2353_v60  ;;  %4012 = vmatpush.msra.mxu0 %v6476_v54  ;;  %v2529_v53 = vld [vmem:[#allocation2 + $0x38] sm:$0xf]  ;;  %v2592_v50 = vshrl.u32 %v2527_v25, 16  ;;  %v2362_v12 = vrot.slane %v2360_v4, 5  ;;  %v2530_v22 = vld [vmem:[#allocation2 + $0x3c] sm:$0x1] }
 0x32d   : > { %3830 = vmatpush.msrb.mxu1 %v6457_v1  ;;  %3883 = vmatpush.msrb.mxu2 %v6476_v54  ;;  %v6481_v62 = vld [vmem:[#allocation4 + $0x8] sm:$0xff]  ;;  %v4659_v31 = vld [vmem:[#allocation3 + $0x58] sm:$0xf]  ;;  %v5137_v20 = vld [vmem:[#allocation3 + $0x78] sm:$0xf0]  ;;  %v2371_v35 = vor.u32 %v2370_v47, %v2367_v23  ;;  %v2595_v36 = vshll.u32 %v2527_v25, 16 }
 0x32e   : > { %v2358_v61 = vrot.slane %v2357_v32, 4  ;;  %4013 = vmatpush.msra.mxu0 %v6481_v62  ;;  %v2594_v59 = vrot.slane %v2592_v50, 4  ;;  %v2601_v40 = vshll.u32 %v2528_v33, 16  ;;  %v5224_v3 = vld [vmem:[%s6713_s4 + $0x210] sm:$0xff]  ;;  %v2606_v10 = vshrl.u32 %v2529_v53, 16 }
 0x32f   : > { %3831 = vmatpush.msrb.mxu1 %v6468_v29  ;;  %3884 = vmatpush.msrb.mxu2 %v6481_v62  ;;  %v5134_v39 = vld [vmem:[#allocation3 + $0x64] sm:$0xf]  ;;  %v2609_v51 = vshll.u32 %v2529_v53, 16  ;;  %v2615_v13 = vshll.u32 %v2530_v22, 16  ;;  %v2507_v41 = vld [vmem:[#allocation2 + $0x30] sm:$0xf]  ;;  %v4660_v0 = vor.u32 %v5137_v20, %v4659_v31 }
 0x330   : > { %v2363_v34 = vsel %vm5635_vm3, %v2358_v61, %v2362_v12  ;;  %v6491_v57 = vld [vmem:[#allocation4] sm:$0xff]  ;;  %v2372_v8 = vrot.slane %v2371_v35, 4  ;;  %v2376_v17 = vrot.slane %v2374_v37, 5  ;;  %v2597_v48 = vrot.slane %v2595_v36, 5  ;;  %v4669_v52 = vld [vmem:[#allocation3 + $0x84] sm:$0xf0]  ;;  %3780 = vmatpush.bf16.msrb.mxu3 %v5224_v3 }
 0x331   : > { %4014 = vmatpush.msra.mxu0 %v6491_v57  ;;  %2418 = vst [vmem:[#allocation3 + $0xa0] sm:$0xf] %v2363_v34  ;;  %3832 = vmatpush.msrb.mxu1 %v6476_v54  ;;  %v4667_v16 = vld [vmem:[#allocation3 + $0x60] sm:$0xf]  ;;  %v5138_v24 = vld [vmem:[#allocation3 + $0x80] sm:$0xf0]  ;;  %v4672_v32 = vor.u32 %v5134_v39, %v4669_v52 }
 0x332   : > { %3885 = vmatpush.msrb.mxu2 %v6491_v57  ;;  %v2603_v26 = vrot.slane %v2601_v40, 5  ;;  %v2608_v27 = vrot.slane %v2606_v10, 4  ;;  %v2611_v45 = vrot.slane %v2609_v51, 5  ;;  %v2617_v55 = vrot.slane %v2615_v13, 5  ;;  %v2508_v18 = vld [vmem:[#allocation2 + $0x38] sm:$0xf] }
 0x333   : > { %v2377_v58 = vsel %vm5635_vm3, %v2372_v8, %v2376_v17  ;;  %v2598_v60 = vor.u32 %v2597_v48, %v2594_v59  ;;  %2515 = vst [vmem:[#allocation3 + $0xa8] sm:$0xf] %v2507_v41  ;;  %v2430_v2 = vld [vmem:[#allocation2 + $0x28] sm:$0xe]  ;;  %3833 = vmatpush.msrb.mxu1 %v6481_v62  ;;  %v2431_v23 = vld [vmem:[#allocation2 + $0x2c] sm:$0x1]  ;;  %v4668_v12 = vor.u32 %v5138_v24, %v4667_v16 }
 0x334   : > { %4050 = vmatpush.msra.mxu2 %v6371_v6  ;;  %2419 = vst [vmem:[#allocation3 + $0xc4] sm:$0xf] %v2377_v58  ;;  %v2612_v4 = vor.u32 %v2611_v45, %v2608_v27  ;;  %v2432_v28 = vld [vmem:[#allocation2 + $0x30] sm:$0xe]  ;;  %v5133_v37 = vld [vmem:[#allocation3 + $0x5c] sm:$0xf] }
 0x335   : > { %v2599_v25 = vrot.slane %v2598_v60, 4  ;;  %2516 = vst [vmem:[#allocation3 + $0xcc] sm:$0xf] %v2508_v18  ;;  %v2433_v6 = vld [vmem:[#allocation2 + $0x34] sm:$0x1]  ;;  %v4593_v7 = vrot.slane %v2430_v2, 9  ;;  %3834 = vmatpush.msrb.mxu1 %v6491_v57 }
 0x336   : > { %4051 = vmatpush.msra.mxu2 %v6381_v14  ;;  %3672 = vmatmul.bf16.gmra.mxu3 %v4660_v0  ;;  %v2613_v47 = vrot.slane %v2612_v4, 4  ;;  %v2472_v33 = vrot.slane %v2431_v23, 5  ;;  %v4594_v53 = vrot.slane %v2432_v28, 9  ;;  %v2476_v50 = vrot.slane %v2433_v6, 5  ;;  %v2290_v61 = vld [vmem:[#allocation2 + $0x38] sm:$0xf] }
 0x337   : > { %v4661_v22 = vld [vmem:[#allocation3 + $0x7c] sm:$0xf0]  ;;  %v2604_v14 = vsel %vm5635_vm3, %v2599_v25, %v2603_v26  ;;  %v2291_v31 = vld [vmem:[#allocation2 + $0x3c] sm:$0x1]  ;;  %v2292_v20 = vld [vmem:[#allocation2 + $0x40] sm:$0xf] }
 0x338   : > { %4052 = vmatpush.msra.mxu2 %v6392_v38  ;;  %3759 = vmatmul.bf16.gmra.mxu0 %v4672_v32  ;;  %v2618_v35 = vsel %vm5635_vm3, %v2613_v47, %v2617_v55  ;;  %2659 = vst [vmem:[#allocation3 + $0xac] sm:$0xf] %v2604_v14  ;;  %v2473_v59 = vsel %vm6251_vm15, %v4593_v7, %v2472_v33  ;;  %v2293_v40 = vld [vmem:[#allocation2 + $0x44] sm:$0x1]  ;;  %v2379_v38 = vshrl.u32 %v2290_v61, 16  ;;  %v5223_v3 = vld [vmem:[%s6713_s4 + $0x208] sm:$0xff] }
 0x339   : > { %v2477_v36 = vsel %vm6251_vm15, %v4594_v53, %v2476_v50  ;;  %2660 = vst [vmem:[#allocation3 + $0xd0] sm:$0xf] %v2618_v35  ;;  %v2382_v39 = vshll.u32 %v2290_v61, 16  ;;  %v2388_v34 = vshll.u32 %v2291_v31, 16  ;;  %v2393_v10 = vshrl.u32 %v2292_v20, 16  ;;  %3730 = vmatmul.bf16.gmra.mxu2 %v4668_v12  ;;  %3781 = vmatpush.bf16.msrb.mxu3 %v5223_v3  ;;  %v5222_v24 = vld [vmem:[%s6713_s4 + $0x200] sm:$0xff] }
 0x33a   : > { %v2396_v51 = vshll.u32 %v2292_v20, 16  ;;  %4053 = vmatpush.msra.mxu2 %v6396_v9  ;;  %v4664_v13 = vor.u32 %v5133_v37, %v4661_v22  ;;  %2498 = vst [vmem:[#allocation3 + $0xa4] sm:$0xf] %v2473_v59  ;;  %v2381_v41 = vrot.slane %v2379_v38, 4  ;;  %v2402_v16 = vshll.u32 %v2293_v40, 16 }
 0x33b   : > { %2499 = vst [vmem:[#allocation3 + $0xc8] sm:$0xf] %v2477_v36  ;;  %v2384_v8 = vrot.slane %v2382_v39, 5  ;;  %v2390_v17 = vrot.slane %v2388_v34, 5  ;;  %v2395_v48 = vrot.slane %v2393_v10, 4 }
 0x33c   : > { %4054 = vmatpush.msra.mxu2 %v6405_v11  ;;  %3701 = vmatmul.bf16.gmra.mxu1 %v4664_v13  ;;  %v2398_v52 = vrot.slane %v2396_v51, 5  ;;  %v2531_v9 = vld [vmem:[#allocation2 + $0x40] sm:$0xf]  ;;  %v2532_v27 = vld [vmem:[#allocation2 + $0x44] sm:$0x1]  ;;  %v2404_v25 = vrot.slane %v2402_v16, 5 }
 0x33d   : > { %v2385_v26 = vor.u32 %v2384_v8, %v2381_v41  ;;  %v2533_v45 = vld [vmem:[#allocation2 + $0x48] sm:$0xf]  ;;  %v2534_v58 = vld [vmem:[#allocation2 + $0x4c] sm:$0x1]  ;;  %v2620_v60 = vshrl.u32 %v2531_v9, 16  ;;  %v2623_v18 = vshll.u32 %v2531_v9, 16  ;;  %3782 = vmatpush.bf16.msrb.mxu3 %v5222_v24 }
 0x33e   : > { %4055 = vmatpush.msra.mxu2 %v6414_v44  ;;  %v2399_v55 = vor.u32 %v2398_v52, %v2395_v48  ;;  %v2629_v11 = vshll.u32 %v2532_v27, 16  ;;  %v4695_v2 = vld [vmem:[#allocation3 + $0xa0] sm:$0xf]  ;;  %v2634_v4 = vshrl.u32 %v2533_v45, 16  ;;  %v2637_v23 = vshll.u32 %v2533_v45, 16 }
 0x33f   : > { %v2386_v0 = vrot.slane %v2385_v26, 4  ;;  %v2643_v28 = vshll.u32 %v2534_v58, 16  ;;  %v5146_v32 = vld [vmem:[#allocation3 + $0xc0] sm:$0xf0]  ;;  %v2622_v6 = vrot.slane %v2620_v60, 4  ;;  %v2625_v7 = vrot.slane %v2623_v18, 5 }
 0x340   : > { %4056 = vmatpush.msra.mxu2 %v6422_v63  ;;  %v2400_v37 = vrot.slane %v2399_v55, 4  ;;  %v5143_v47 = vld [vmem:[#allocation3 + $0xac] sm:$0xf]  ;;  %v2636_v33 = vrot.slane %v2634_v4, 4  ;;  %v2639_v53 = vrot.slane %v2637_v23, 5  ;;  %v2631_v22 = vrot.slane %v2629_v11, 5 }
 0x341   : > { %v2391_v44 = vsel %vm5635_vm3, %v2386_v0, %v2390_v17  ;;  %v2509_v50 = vld [vmem:[#allocation2 + $0x40] sm:$0xf]  ;;  %v2626_v63 = vor.u32 %v2625_v7, %v2622_v6  ;;  %v2645_v14 = vrot.slane %v2643_v28, 5  ;;  %v4703_v31 = vld [vmem:[#allocation3 + $0xa8] sm:$0xf]  ;;  %v4696_v40 = vor.u32 %v5146_v32, %v4695_v2 }
 0x342   : > { %4057 = vmatpush.msra.mxu2 %v6430_v42  ;;  %v4705_v61 = vld [vmem:[#allocation3 + $0xcc] sm:$0xf0]  ;;  %v2405_v12 = vsel %vm5635_vm3, %v2400_v37, %v2404_v25  ;;  %2420 = vst [vmem:[#allocation3 + $0xe8] sm:$0xf] %v2391_v44  ;;  %v5147_v20 = vld [vmem:[#allocation3 + $0xc8] sm:$0xf0]  ;;  %v2640_v35 = vor.u32 %v2639_v53, %v2636_v33 }
 0x343   : > { %2421 = vst [vmem:[#allocation3 + $0x10c] sm:$0xf] %v2405_v12  ;;  %v2510_v59 = vld [vmem:[#allocation2 + $0x48] sm:$0xf]  ;;  %v2434_v36 = vld [vmem:[#allocation2 + $0x38] sm:$0xe]  ;;  %v4708_v41 = vor.u32 %v5143_v47, %v4705_v61 }
 0x344   : > { %4058 = vmatpush.msra.mxu2 %v6435_v15  ;;  %v2627_v38 = vrot.slane %v2626_v63, 4  ;;  %2517 = vst [vmem:[#allocation3 + $0xf0] sm:$0xf] %v2509_v50  ;;  %v2435_v42 = vld [vmem:[#allocation2 + $0x3c] sm:$0x1]  ;;  %v4595_v3 = vrot.slane %v2434_v36, 9 }
 0x345   : > { %v5142_v39 = vld [vmem:[#allocation3 + $0xa4] sm:$0xf]  ;;  %v4697_v34 = vld [vmem:[#allocation3 + $0xc4] sm:$0xf0]  ;;  %v2641_v10 = vrot.slane %v2640_v35, 4  ;;  %v2480_v13 = vrot.slane %v2435_v42, 5 }
 0x346   : > { %2518 = vst [vmem:[#allocation3 + $0x114] sm:$0xf] %v2510_v59  ;;  %v2436_v51 = vld [vmem:[#allocation2 + $0x40] sm:$0xe]  ;;  %4059 = vmatpush.msra.mxu2 %v6442_v43  ;;  %3677 = vmatmul.bf16.gmra.mxu3 %v4696_v40  ;;  %v2632_v8 = vsel %vm5635_vm3, %v2627_v38, %v2631_v22  ;;  %v2437_v17 = vld [vmem:[#allocation2 + $0x44] sm:$0x1]  ;;  %v4704_v43 = vor.u32 %v5147_v20, %v4703_v31 }
 0x347   : > { %v4596_v15 = vrot.slane %v2436_v51, 9  ;;  %v2663_v48 = vld [vmem:[#allocation2 + $0x10] sm:$0xe]  ;;  %v2646_v52 = vsel %vm5635_vm3, %v2641_v10, %v2645_v14  ;;  %2661 = vst [vmem:[#allocation3 + $0xf4] sm:$0xf] %v2632_v8  ;;  %v2481_v16 = vsel %vm6251_vm15, %v4595_v3, %v2480_v13  ;;  %v2484_v24 = vrot.slane %v2437_v17, 5 }
 0x348   : > { %v2664_v26 = vld [vmem:[#allocation2 + $0x14] sm:$0x1]  ;;  %v4597_v9 = vrot.slane %v2663_v48, 9  ;;  %4060 = vmatpush.msra.mxu2 %v6449_v56  ;;  %3764 = vmatmul.bf16.gmra.mxu0 %v4708_v41  ;;  %2662 = vst [vmem:[#allocation3 + $0x118] sm:$0xf] %v2646_v52  ;;  %v4700_v60 = vor.u32 %v5142_v39, %v4697_v34 }
 0x349   : > { %v2665_v27 = vld [vmem:[#allocation2 + $0x18] sm:$0xe]  ;;  %v2666_v45 = vld [vmem:[#allocation2 + $0x1c] sm:$0x1]  ;;  %v2485_v55 = vsel %vm6251_vm15, %v4596_v15, %v2484_v24  ;;  %2500 = vst [vmem:[#allocation3 + $0xec] sm:$0xf] %v2481_v16  ;;  %3735 = vmatmul.bf16.gmra.mxu2 %v4704_v43 }
 0x34a   : > { %v2697_v30 = vrot.slane %v2664_v26, 5  ;;  %v4598_v58 = vrot.slane %v2665_v27, 9  ;;  %4061 = vmatpush.msra.mxu2 %v6457_v1  ;;  %2501 = vst [vmem:[#allocation3 + $0x110] sm:$0xf] %v2485_v55  ;;  %v2701_v18 = vrot.slane %v2666_v45, 5 }
 0x34b   : > { %v2667_v11 = vld [vmem:[#allocation2 + $0x20] sm:$0xe]  ;;  %v2668_v2 = vld [vmem:[#allocation2 + $0x24] sm:$0x1]  ;;  %v2669_v4 = vld [vmem:[#allocation2 + $0x28] sm:$0xe] }
 0x34c   : > { %v2698_v56 = vsel %vm6251_vm15, %v4597_v9, %v2697_v30  ;;  %4062 = vmatpush.msra.mxu2 %v6468_v29  ;;  %3706 = vmatmul.bf16.gmra.mxu1 %v4700_v60  ;;  %v2702_v0 = vsel %vm6251_vm15, %v4598_v58, %v2701_v18  ;;  %v2670_v23 = vld [vmem:[#allocation2 + $0x2c] sm:$0x1]  ;;  %v4599_v1 = vrot.slane %v2667_v11, 9  ;;  %v2705_v28 = vrot.slane %v2668_v2, 5  ;;  %v2671_v25 = vld [vmem:[#allocation2 + $0x30] sm:$0xe] }
 0x34d   : > { %2735 = vst [vmem:[#allocation3 + $0x20] sm:$0xf] %v2698_v56  ;;  %v4600_v32 = vrot.slane %v2669_v4, 9  ;;  %v2709_v37 = vrot.slane %v2670_v23, 5  ;;  %v4731_v6 = vld [vmem:[#allocation3 + $0xe8] sm:$0xf] }
 0x34e   : > { %2736 = vst [vmem:[#allocation3 + $0x44] sm:$0xf] %v2702_v0  ;;  %4063 = vmatpush.msra.mxu2 %v6476_v54  ;;  %v2706_v7 = vsel %vm6251_vm15, %v4599_v1, %v2705_v28  ;;  %v2672_v29 = vld [vmem:[#allocation2 + $0x34] sm:$0x1]  ;;  %v2673_v47 = vld [vmem:[#allocation2 + $0x38] sm:$0xe] }
 0x34f   : > { %v5155_v44 = vld [vmem:[#allocation3 + $0x108] sm:$0xf0]  ;;  %v2710_v33 = vsel %vm6251_vm15, %v4600_v32, %v2709_v37  ;;  %2737 = vst [vmem:[#allocation3 + $0x68] sm:$0xf] %v2706_v7  ;;  %v5152_v50 = vld [vmem:[#allocation3 + $0xf4] sm:$0xf] }
 0x350   : > { %4064 = vmatpush.msra.mxu2 %v6481_v62  ;;  %v2674_v53 = vld [vmem:[#allocation2 + $0x3c] sm:$0x1]  ;;  %2738 = vst [vmem:[#allocation3 + $0x8c] sm:$0xf] %v2710_v33  ;;  %v4601_v54 = vrot.slane %v2671_v25, 9  ;;  %v2713_v61 = vrot.slane %v2672_v29, 5  ;;  %v4732_v59 = vor.u32 %v5155_v44, %v4731_v6 }
 0x351   : > { %v4602_v12 = vrot.slane %v2673_v47, 9  ;;  %v2717_v63 = vrot.slane %v2674_v53, 5  ;;  %v2675_v22 = vld [vmem:[#allocation2 + $0x40] sm:$0xe]  ;;  %v2676_v14 = vld [vmem:[#allocation2 + $0x44] sm:$0x1] }
 0x352   : > { %4065 = vmatpush.msra.mxu2 %v6491_v57  ;;  %v4741_v31 = vld [vmem:[#allocation3 + $0x114] sm:$0xf0]  ;;  %v2714_v62 = vsel %vm6251_vm15, %v4601_v54, %v2713_v61  ;;  %v2678_v35 = vld [vmem:[#allocation2 + $0x4c] sm:$0x1]  ;;  %v4739_v36 = vld [vmem:[#allocation3 + $0xf0] sm:$0xf] }
 0x353   : > { %v2677_v20 = vld [vmem:[#allocation2 + $0x48] sm:$0xe]  ;;  %v2718_v40 = vsel %vm6251_vm15, %v4602_v12, %v2717_v63  ;;  %2739 = vst [vmem:[#allocation3 + $0xb0] sm:$0xf] %v2714_v62  ;;  %v4603_v38 = vrot.slane %v2675_v22, 9  ;;  %v2721_v42 = vrot.slane %v2676_v14, 5  ;;  %v4744_v34 = vor.u32 %v5152_v50, %v4741_v31 }
 0x354   : > { %v5156_v3 = vld [vmem:[#allocation3 + $0x110] sm:$0xf0]  ;;  %2740 = vst [vmem:[#allocation3 + $0xd4] sm:$0xf] %v2718_v40  ;;  %v4604_v57 = vrot.slane %v2677_v20, 9  ;;  %v2725_v39 = vrot.slane %v2678_v35, 5 }
 0x355   : > { %v2722_v10 = vsel %vm6251_vm15, %v4603_v38, %v2721_v42  ;;  %v5151_v51 = vld [vmem:[#allocation3 + $0xec] sm:$0xf]  ;;  %v4733_v13 = vld [vmem:[#allocation3 + $0x10c] sm:$0xf0]  ;;  %v4740_v8 = vor.u32 %v5156_v3, %v4739_v36  ;;  %v4639_v15 = vld [vmem:[#allocation3 + $0x20] sm:$0xf] }
 0x356   : > { %3682 = vmatmul.bf16.gmra.mxu3 %v4732_v59  ;;  %v2726_v41 = vsel %vm6251_vm15, %v4604_v57, %v2725_v39  ;;  %2741 = vst [vmem:[#allocation3 + $0xf8] sm:$0xf] %v2722_v10  ;;  %v4736_v17 = vor.u32 %v5151_v51, %v4733_v13  ;;  %v5130_v48 = vld [vmem:[#allocation3 + $0x40] sm:$0xf0]  ;;  %v4675_v19 = vld [vmem:[#allocation3 + $0x68] sm:$0xf] }
 0x357   : > { %2742 = vst [vmem:[#allocation3 + $0x11c] sm:$0xf] %v2726_v41  ;;  %v4640_v52 = vor.u32 %v5130_v48, %v4639_v15  ;;  %v5139_v55 = vld [vmem:[#allocation3 + $0x88] sm:$0xf0] }
 0x358   : > { %3769 = vmatmul.bf16.gmra.mxu0 %v4744_v34  ;;  %v4676_v58 = vor.u32 %v5139_v55, %v4675_v19 }
 0x359   : > { %3740 = vmatmul.bf16.gmra.mxu2 %v4740_v8 }
 0x35a   : > { %v4711_v32 = vld [vmem:[#allocation3 + $0xb0] sm:$0xf] }
 0x35b   : > { %v5148_v37 = vld [vmem:[#allocation3 + $0xd0] sm:$0xf0] }
 0x35c   : > { %3711 = vmatmul.bf16.gmra.mxu1 %v4736_v17  ;;  %v4712_v6 = vor.u32 %v5148_v37, %v4711_v32 }
 0x35d   : > { %v4747_v31 = vld [vmem:[#allocation3 + $0xf8] sm:$0xf] }
 0x35e   : > { %v5157_v62 = vld [vmem:[#allocation3 + $0x118] sm:$0xf0] }
 0x35f   : > { %v4748_v35 = vor.u32 %v5157_v62, %v4747_v31 }
 0x364   : > { %v3639_v0 = vpop.f32.mrf.mxu0 }
 0x366   : > { %3783 = vmatmul.bf16.vlgmr.msrb.gmra.mxu3 %v4640_v52 }
 0x368   : > { %v3552_v16 = vpop.f32.mrf.mxu3  ;;  %v3581_v24 = vpop.f32.mrf.mxu1 }
 0x369   : > { %v3582_v26 = vadd.f32 %v3581_v24, %v3552_v16 }
 0x36c   : > { %v3610_v9 = vpop.f32.mrf.mxu2  ;;  %v3641_v7 = vpop.f32.mrf.mxu0 }
 0x36d   : > { %v3611_v43 = vadd.f32 %v3610_v9, %v3582_v26 }
 0x36f   : > { %v3640_v44 = vadd.f32 %v3639_v0, %v3611_v43 }
 0x370   : > { %v3554_v27 = vpop.f32.mrf.mxu3  ;;  %v3583_v45 = vpop.f32.mrf.mxu1 }
 0x371   : > { %v3584_v30 = vadd.f32 %v3583_v45, %v3554_v27 }
 0x374   : > { %v3612_v60 = vpop.f32.mrf.mxu2  ;;  %v3644_v63 = vpop.f32.mrf.mxu0 }
 0x375   : > { %v3613_v18 = vadd.f32 %v3612_v60, %v3584_v30 }
 0x376   : > { %3788 = vmatmul.bf16.gmra.mxu3 %v4676_v58 }
 0x377   : > { %v3642_v12 = vadd.f32 %v3641_v7, %v3613_v18 }
 0x378   : > { %v3557_v56 = vpop.f32.mrf.mxu3  ;;  %v3586_v11 = vpop.f32.mrf.mxu1 }
 0x379   : > { %v3587_v2 = vadd.f32 %v3586_v11, %v3557_v56 }
 0x37c   : > { %v3615_v4 = vpop.f32.mrf.mxu2  ;;  %v3646_v38 = vpop.f32.mrf.mxu0 }
 0x37d   : > { %v3616_v23 = vadd.f32 %v3615_v4, %v3587_v2 }
 0x37f   : > { %v3645_v40 = vadd.f32 %v3644_v63, %v3616_v23 }
 0x380   : > { %v3559_v1 = vpop.f32.mrf.mxu3  ;;  %v3588_v28 = vpop.f32.mrf.mxu1 }
 0x381   : > { %v3589_v25 = vadd.f32 %v3588_v28, %v3559_v1 }
 0x384   : > { %v3617_v29 = vpop.f32.mrf.mxu2  ;;  %v3649_v39 = vpop.f32.mrf.mxu0 }
 0x385   : > { %v3618_v47 = vadd.f32 %v3617_v29, %v3589_v25 }
 0x386   : > { %3793 = vmatmul.bf16.gmra.mxu3 %v4712_v6 }
 0x387   : > { %v3647_v3 = vadd.f32 %v3646_v38, %v3618_v47 }
 0x388   : > { %v3562_v33 = vpop.f32.mrf.mxu3  ;;  %v3591_v53 = vpop.f32.mrf.mxu1 }
 0x389   : > { %v3592_v50 = vadd.f32 %v3591_v53, %v3562_v33 }
 0x38c   : > { %v3620_v54 = vpop.f32.mrf.mxu2  ;;  %v3651_v13 = vpop.f32.mrf.mxu0 }
 0x38d   : > { %v3621_v61 = vadd.f32 %v3620_v54, %v3592_v50 }
 0x38f   : > { %v3650_v34 = vadd.f32 %v3649_v39, %v3621_v61 }
 0x390   : > { %v3564_v22 = vpop.f32.mrf.mxu3  ;;  %v3593_v14 = vpop.f32.mrf.mxu1 }
 0x391   : > { %v3594_v20 = vadd.f32 %v3593_v14, %v3564_v22 }
 0x394   : > { %v3622_v59 = vpop.f32.mrf.mxu2  ;;  %v3654_v9 = vpop.f32.mrf.mxu0 }
 0x395   : > { %v3623_v36 = vadd.f32 %v3622_v59, %v3594_v20 }
 0x396   : > { %3798 = vmatmul.bf16.gmra.mxu3 %v4748_v35 }
 0x397   : > { %v3652_v41 = vadd.f32 %v3651_v13, %v3623_v36 }
 0x398   : > { %v3567_v42 = vpop.f32.mrf.mxu3  ;;  %v3596_v52 = vpop.f32.mrf.mxu1 }
 0x399   : > { %v3597_v61 = vadd.f32 %v3596_v52, %v3567_v42  ;;  %v5233_v42 = vld [vmem:[%s6717_s8 + $0x18] sm:$0xff] }
 0x39a   : > { %3959 = vmatpush.bf16.msra.mxu1 %v5233_v42 }
 0x39c   : > { %v3625_v16 = vpop.f32.mrf.mxu2  ;;  %v3656_v55 = vpop.f32.mrf.mxu0 }
 0x39d   : > { %v3626_v63 = vadd.f32 %v3625_v16, %v3597_v61 }
 0x39f   : > { %v3655_v36 = vadd.f32 %v3654_v9, %v3626_v63 }
 0x3a0   : > { %v3569_v57 = vpop.f32.mrf.mxu3  ;;  %v3598_v43 = vpop.f32.mrf.mxu1 }
 0x3a1   : > { %v3599_v14 = vadd.f32 %v3598_v43, %v3569_v57 }
 0x3a4   : > { %v3627_v19 = vpop.f32.mrf.mxu2 }
 0x3a5   : > { %v3755_v56 = vpop.f32.mrf.mxu0 }
 0x3a9   : > { %v3668_v10 = vpop.f32.mrf.mxu3  ;;  %v3697_v30 = vpop.f32.mrf.mxu1 }
 0x3aa   : > { %v3669_v51 = vadd.f32 %v3668_v10, %v3640_v44 }
 0x3ac   : > { %v3726_v18 = vpop.f32.mrf.mxu2  ;;  %v3698_v62 = vadd.f32 %v3697_v30, %v3669_v51 }
 0x3ad   : > { %v3757_v23 = vpop.f32.mrf.mxu0 }
 0x3ae   : > { %v3727_v39 = vadd.f32 %v3726_v18, %v3698_v62 }
 0x3b0   : > { %v3756_v16 = vadd.f32 %v3755_v56, %v3727_v39 }
 0x3b1   : > { %v3670_v8 = vpop.f32.mrf.mxu3  ;;  %v3699_v11 = vpop.f32.mrf.mxu1 }
 0x3b2   : > { %v3671_v17 = vadd.f32 %v3670_v8, %v3642_v12 }
 0x3b4   : > { %v3728_v0 = vpop.f32.mrf.mxu2  ;;  %v3700_v31 = vadd.f32 %v3699_v11, %v3671_v17 }
 0x3b5   : > { %v3760_v37 = vpop.f32.mrf.mxu0 }
 0x3b6   : > { %v3729_v38 = vadd.f32 %v3728_v0, %v3700_v31 }
 0x3b9   : > { %v3673_v15 = vpop.f32.mrf.mxu3  ;;  %v3702_v1 = vpop.f32.mrf.mxu1 }
 0x3ba   : > { %v3674_v48 = vadd.f32 %v3673_v15, %v3645_v40  ;;  %v3628_v40 = vadd.f32 %v3627_v19, %v3599_v14  ;;  %v3758_v15 = vadd.f32 %v3757_v23, %v3729_v38 }
 0x3bc   : > { %v3731_v28 = vpop.f32.mrf.mxu2  ;;  %v3703_v59 = vadd.f32 %v3702_v1, %v3674_v48  ;;  %v3657_v51 = vadd.f32 %v3656_v55, %v3628_v40  ;;  %v5232_v48 = vld [vmem:[%s6717_s8 + $0x10] sm:$0xff]  ;;  %v5231_v55 = vld [vmem:[%s6717_s8 + $0x8] sm:$0xff] }
 0x3bd   : > { %v3762_v29 = vpop.f32.mrf.mxu0  ;;  %3960 = vmatpush.bf16.msra.mxu1 %v5232_v48 }
 0x3be   : > { %v3732_v10 = vadd.f32 %v3731_v28, %v3703_v59 }
 0x3c0   : > { %v3761_v43 = vadd.f32 %v3760_v37, %v3732_v10 }
 0x3c1   : > { %v3675_v24 = vpop.f32.mrf.mxu3  ;;  %v3704_v25 = vpop.f32.mrf.mxu1  ;;  %3961 = vmatpush.bf16.msra.mxu1 %v5231_v55 }
 0x3c2   : > { %v3676_v26 = vadd.f32 %v3675_v24, %v3647_v3 }
 0x3c4   : > { %v3733_v7 = vpop.f32.mrf.mxu2  ;;  %v3705_v3 = vadd.f32 %v3704_v25, %v3676_v26 }
 0x3c5   : > { %v3765_v53 = vpop.f32.mrf.mxu0 }
 0x3c6   : > { %v3734_v57 = vadd.f32 %v3733_v7, %v3705_v3 }
 0x3c8   : > { %v3763_v18 = vadd.f32 %v3762_v29, %v3734_v57 }
 0x3c9   : > { %v3678_v27 = vpop.f32.mrf.mxu3  ;;  %v3707_v47 = vpop.f32.mrf.mxu1 }
 0x3ca   : > { %v3679_v45 = vadd.f32 %v3678_v27, %v3650_v34 }
 0x3cc   : > { %v3736_v33 = vpop.f32.mrf.mxu2  ;;  %v3708_v13 = vadd.f32 %v3707_v47, %v3679_v45 }
 0x3cd   : > { %v3767_v20 = vpop.f32.mrf.mxu0 }
 0x3ce   : > { %v3737_v24 = vadd.f32 %v3736_v33, %v3708_v13 }
 0x3d0   : > { %v3766_v56 = vadd.f32 %v3765_v53, %v3737_v24 }
 0x3d1   : > { %v3680_v58 = vpop.f32.mrf.mxu3  ;;  %v3709_v50 = vpop.f32.mrf.mxu1 }
 0x3d2   : > { %v3681_v60 = vadd.f32 %v3680_v58, %v3652_v41 }
 0x3d4   : > { %v3738_v12 = vpop.f32.mrf.mxu2  ;;  %v3710_v17 = vadd.f32 %v3709_v50, %v3681_v60 }
 0x3d5   : > { %v3770_v27 = vpop.f32.mrf.mxu0 }
 0x3d6   : > { %v3739_v19 = vadd.f32 %v3738_v12, %v3710_v17 }
 0x3d8   : > { %v3768_v28 = vadd.f32 %v3767_v20, %v3739_v19 }
 0x3d9   : > { %v3683_v2 = vpop.f32.mrf.mxu3  ;;  %v3712_v35 = vpop.f32.mrf.mxu1 }
 0x3da   : > { %v3684_v34 = vadd.f32 %v3683_v2, %v3655_v36 }
 0x3dc   : > { %v3741_v41 = vpop.f32.mrf.mxu2  ;;  %v3713_v52 = vadd.f32 %v3712_v35, %v3684_v34 }
 0x3dd   : > { %v3772_v33 = vpop.f32.mrf.mxu0 }
 0x3de   : > { %v3742_v60 = vadd.f32 %v3741_v41, %v3713_v52 }
 0x3e0   : > { %v3771_v29 = vadd.f32 %v3770_v27, %v3742_v60 }
 0x3e1   : > { %v3685_v4 = vpop.f32.mrf.mxu3  ;;  %v3714_v45 = vpop.f32.mrf.mxu1 }
 0x3e2   : > { %v3686_v26 = vadd.f32 %v3685_v4, %v3657_v51 }
 0x3e4   : > { %v3715_v11 = vadd.f32 %v3714_v45, %v3686_v26  ;;  %v3743_v37 = vpop.f32.mrf.mxu2 }
 0x3e6   : > { %v3744_v25 = vadd.f32 %v3743_v37, %v3715_v11 }
 0x3e8   : > { %v3773_v53 = vadd.f32 %v3772_v33, %v3744_v25 }
 0x3e9   : > { %v3784_v32 = vpop.f32.mrf.mxu3 }
 0x3ea   : > { %v3785_v30 = vadd.f32 %v3784_v32, %v3756_v16  ;;  %v5230_v32 = vld [vmem:[%s6717_s8] sm:$0xff] }
 0x3eb   : > { %3962 = vmatpush.bf16.msra.mxu1 %v5230_v32 }
 0x3f1   : > { %v3786_v6 = vpop.f32.mrf.mxu3 }
 0x3f2   : > { %v3787_v9 = vadd.f32 %v3786_v6, %v3758_v15 }
 0x3f4   : > { %v3806_v2 = vadd.f32 %v3787_v9, %v3785_v30 }
 0x3f9   : > { %v3789_v44 = vpop.f32.mrf.mxu3 }
 0x3fa   : > { %v3790_v58 = vadd.f32 %v3789_v44, %v3761_v43 }
 0x3fc   : > { %v3807_v4 = vadd.f32 %v3806_v2, %v3790_v58 }
 0x401   : > { %v3791_v54 = vpop.f32.mrf.mxu3 }
 0x402   : > { %v3792_v0 = vadd.f32 %v3791_v54, %v3763_v18 }
 0x404   : > { %v3808_v6 = vadd.f32 %v3807_v4, %v3792_v0 }
 0x409   : > { %v3794_v22 = vpop.f32.mrf.mxu3 }
 0x40a   : > { %v3795_v1 = vadd.f32 %v3794_v22, %v3766_v56 }
 0x40c   : > { %v3809_v47 = vadd.f32 %v3808_v6, %v3795_v1 }
 0x411   : > { %v3796_v8 = vpop.f32.mrf.mxu3 }
 0x412   : > { %v3797_v7 = vadd.f32 %v3796_v8, %v3768_v28 }
 0x414   : > { %v3810_v50 = vadd.f32 %v3809_v47, %v3797_v7 }
 0x419   : > { %v3799_v23 = vpop.f32.mrf.mxu3 }
 0x41a   : > { %v3800_v44 = vadd.f32 %v3799_v23, %v3771_v29 }
 0x41c   : > { %v3811_v61 = vadd.f32 %v3810_v50, %v3800_v44 }
 0x421   : > { %v3801_v54 = vpop.f32.mrf.mxu3 }
 0x422   : > { %v3802_v12 = vadd.f32 %v3801_v54, %v3773_v53 }
 0x424   : > { %v3812_v63 = vadd.f32 %v3811_v61, %v3802_v12 }
 0x426   : > { %v3813_v22 = vrot.slane %v3812_v63, 4 }
 0x428   : > { %v3814_v14 = vadd.f32 %v3813_v22, %v3812_v63 }
 0x42a   : > { %v3815_v31 = vrot.slane %v3814_v14, 2 }
 0x42c   : > { %v3816_v62 = vadd.f32 %v3815_v31, %v3814_v14 }
 0x42e   : > { %v3817_v20 = vrot.slane %v3816_v62, 1 }
 0x430   : > { %v3818_v35 = vadd.f32 %v3817_v20, %v3816_v62 }
 0x432   : > { %3835 = vmatmul.f32.vlgmr.msrb.gmra.mxu1 %v3818_v35 }
 0x43a   : > { %5053 = vmatmul.msk.bf16.vlgmr.msra.gmra.mxu1 %vm496_vm2, %v5803_v49 }
 0x44a   : > { %5054 = vmatmul.msk.bf16.gmra.mxu1 %vm496_vm2, %v5827_v21 }
 0x45a   : > { %5055 = vmatmul.msk.bf16.gmra.mxu1 %vm496_vm2, %v5849_v46 }
 0x46a   : > { %5056 = vmatmul.msk.bf16.gmra.mxu1 %vm496_vm2, %v5865_v5 }
 0x4af   : > { %v3836_v59 = vpop.f32.mrf.mxu1 }
 0x4b0   : > { %v3839_v36 = vmul.f32 0.00390625, %v3836_v59 }
 0x4b2   : > { %v3840_v40 = vperm.slane %v3839_v36, 0 }
 0x4b4   : > { %v6578_v38 = vsub.f32 %v3785_v30, %v3840_v40  ;;  %v6580_v3 = vsub.f32 %v3787_v9, %v3840_v40  ;;  %v6582_v39 = vsub.f32 %v3790_v58, %v3840_v40  ;;  %v6584_v34 = vsub.f32 %v3792_v0, %v3840_v40 }
 0x4b5   : > { %v6590_v10 = vsub.f32 %v3795_v1, %v3840_v40  ;;  %v6594_v42 = vsub.f32 %v3797_v7, %v3840_v40  ;;  %v6598_v57 = vsub.f32 %v3800_v44, %v3840_v40  ;;  %v6602_v15 = vsub.f32 %v3802_v12, %v3840_v40 }
 0x4b6   : > { %v3849_v49 = vmul.f32 %v6578_v38, %v6578_v38  ;;  %v3850_v21 = vmul.f32 %v6580_v3, %v6580_v3  ;;  %v3851_v5 = vmul.f32 %v6582_v39, %v6582_v39  ;;  %v3852_v41 = vmul.f32 %v6584_v34, %v6584_v34 }
 0x4b7   : > { %v3964_v46 = vpop.f32.mrf.mxu1  ;;  %v3853_v17 = vmul.f32 %v6590_v10, %v6590_v10  ;;  %v3854_v48 = vmul.f32 %v6594_v42, %v6594_v42  ;;  %v3855_v24 = vmul.f32 %v6598_v57, %v6598_v57  ;;  %v3856_v9 = vmul.f32 %v6602_v15, %v6602_v15 }
 0x4b8   : > { %v3857_v13 = vadd.f32 %v3850_v21, %v3849_v49 }
 0x4ba   : > { %v3858_v8 = vadd.f32 %v3857_v13, %v3851_v5 }
 0x4bc   : > { %v3859_v51 = vadd.f32 %v3858_v8, %v3852_v41 }
 0x4be   : > { %v3860_v52 = vadd.f32 %v3859_v51, %v3853_v17 }
 0x4bf   : > { %v3966_v16 = vpop.f32.mrf.mxu1 }
 0x4c0   : > { %v3861_v26 = vadd.f32 %v3860_v52, %v3854_v48  ;;  %v3986_v56 = vadd.f32 %v3966_v16, %v3964_v46 }
 0x4c2   : > { %v3862_v43 = vadd.f32 %v3861_v26, %v3855_v24 }
 0x4c4   : > { %v3863_v27 = vadd.f32 %v3862_v43, %v3856_v9 }
 0x4c6   : > { %v3864_v45 = vrot.slane %v3863_v27, 4 }
 0x4c7   : > { %v3969_v19 = vpop.f32.mrf.mxu1 }
 0x4c8   : > { %v3865_v30 = vadd.f32 %v3864_v45, %v3863_v27  ;;  %v3987_v23 = vadd.f32 %v3986_v56, %v3969_v19 }
 0x4ca   : > { %v3866_v58 = vrot.slane %v3865_v30, 2 }
 0x4cc   : > { %v3867_v18 = vadd.f32 %v3866_v58, %v3865_v30 }
 0x4ce   : > { %v3868_v55 = vrot.slane %v3867_v18, 1 }
 0x4cf   : > { %v3971_v60 = vpop.f32.mrf.mxu1 }
 0x4d0   : > { %v3869_v11 = vadd.f32 %v3868_v55, %v3867_v18  ;;  %v3988_v1 = vadd.f32 %v3987_v23, %v3971_v60 }
 0x4d2   : > { %3886 = vmatmul.f32.vlgmr.msrb.gmra.mxu2 %v3869_v11 }
 0x4d7   : > { %v3974_v2 = vpop.f32.mrf.mxu1 }
 0x4d8   : > { %v3989_v28 = vadd.f32 %v3988_v1, %v3974_v2  ;;  %v3804_v1 = vld [vmem:[%s6714_s5] sm:$0x1] }
 0x4df   : > { %v3976_v0 = vpop.f32.mrf.mxu1 }
 0x4e0   : > { %v3990_v32 = vadd.f32 %v3989_v28, %v3976_v0 }
 0x4e7   : > { %v3979_v4 = vpop.f32.mrf.mxu1 }
 0x4e8   : > { %v3991_v37 = vadd.f32 %v3990_v32, %v3979_v4 }
 0x4ef   : > { %v3981_v25 = vpop.f32.mrf.mxu1 }
 0x4f0   : > { %v3992_v6 = vadd.f32 %v3991_v37, %v3981_v25 }
 0x4f2   : > { %v3993_v7 = vrot.slane %v3992_v6, 4 }
 0x4f4   : > { %v3994_v29 = vadd.f32 %v3993_v7, %v3992_v6 }
 0x4f6   : > { %v3995_v47 = vrot.slane %v3994_v29, 2 }
 0x4f8   : > { %v3996_v44 = vadd.f32 %v3995_v47, %v3994_v29 }
 0x4fa   : > { %v3997_v33 = vrot.slane %v3996_v44, 1 }
 0x4fc   : > { %v3998_v50 = vadd.f32 %v3997_v33, %v3996_v44  ;;  %v3984_v44 = vld [vmem:[%s6718_s9] sm:$0x1] }
 0x4fe   : > { %4015 = vmatmul.f32.vlgmr.msra.gmra.mxu0 %v3998_v50 }
 0x57b   : > { %v4016_v53 = vpop.f32.mrf.mxu0 }
 0x57c   : > { %v4019_v54 = vmul.f32 0.00390625, %v4016_v53  ;;  %v5323_v53 = vld [vmem:[%s6715_s6] ss:$0 sm:$0xff] }
 0x57e   : > { %v4020_v61 = vperm.slane %v4019_v54, 0 }
 0x580   : > { %v6610_v12 = vsub.f32 %v3964_v46, %v4020_v61  ;;  %v6612_v63 = vsub.f32 %v3966_v16, %v4020_v61  ;;  %v6614_v22 = vsub.f32 %v3969_v19, %v4020_v61  ;;  %v6616_v14 = vsub.f32 %v3971_v60, %v4020_v61  ;;  %v3887_v19 = vpop.f32.mrf.mxu2 }
 0x581   : > { %v6622_v20 = vsub.f32 %v3974_v2, %v4020_v61  ;;  %v6626_v36 = vsub.f32 %v3976_v0, %v4020_v61  ;;  %v6630_v21 = vsub.f32 %v3979_v4, %v4020_v61  ;;  %v6634_v13 = vsub.f32 %v3981_v25, %v4020_v61 }
 0x582   : > { %v4029_v31 = vmul.f32 %v6610_v12, %v6610_v12  ;;  %v4030_v62 = vmul.f32 %v6612_v63, %v6612_v63  ;;  %v4031_v35 = vmul.f32 %v6614_v22, %v6614_v22  ;;  %v4032_v40 = vmul.f32 %v6616_v14, %v6616_v14 }
 0x583   : > { %v4033_v46 = vmul.f32 %v6622_v20, %v6622_v20  ;;  %v4034_v41 = vmul.f32 %v6626_v36, %v6626_v36  ;;  %v4035_v17 = vmul.f32 %v6630_v21, %v6630_v21  ;;  %v4036_v48 = vmul.f32 %v6634_v13, %v6634_v13 }
 0x584   : > { %v4037_v59 = vadd.f32 %v4030_v62, %v4029_v31  ;;  %v3890_v30 = vmul.f32 0.00390625, %v3887_v19 }
 0x586   : > { %v4038_v49 = vadd.f32 %v4037_v59, %v4031_v35  ;;  %v3891_v58 = vadd.f32 1e-05, %v3890_v30 }
 0x588   : > { %v4039_v5 = vadd.f32 %v4038_v49, %v4032_v40  ;;  %5327 = vrsqrt.f32 %v3891_v58  ;;  %vm3898_vm1 = vweird.f32 %v3891_v58 }
 0x58a   : > { %v4040_v8 = vadd.f32 %v4039_v5, %v4033_v46 }
 0x58c   : > { %v4041_v51 = vadd.f32 %v4040_v8, %v4034_v41 }
 0x58e   : > { %v4042_v52 = vadd.f32 %v4041_v51, %v4035_v17  ;;  %v5328_v18 = vpop.eup %5327 }
 0x58f   : > { %v3893_v55 = vmul.f32 %v5328_v18, %v3891_v58  ;;  %vm3899_vm0 = vweird.f32 %v5328_v18 }
 0x590   : > { %v4043_v16 = vadd.f32 %v4042_v52, %v4036_v48  ;;  %vm3900_vm2 = vmor %vm3898_vm1, %vm3899_vm0 }
 0x591   : > { %v3894_v60 = vmul.f32 %v5328_v18, %v3893_v55 }
 0x592   : > { %v4044_v24 = vrot.slane %v4043_v16, 4 }
 0x593   : > { %v3895_v11 = vmul.f32 0.5, %v3894_v60 }
 0x594   : > { %v4045_v26 = vadd.f32 %v4044_v24, %v4043_v16 }
 0x595   : > { %v3896_v0 = vsub.f32 1.5, %v3895_v11 }
 0x596   : > { %v4046_v9 = vrot.slane %v4045_v26, 2 }
 0x597   : > { %v3897_v4 = vmul.f32 %v5328_v18, %v3896_v0 }
 0x598   : > { %v4047_v43 = vadd.f32 %v4046_v9, %v4045_v26 }
 0x599   : > { %v3901_v28 = vsel %vm3900_vm2, %v5328_v18, %v3897_v4 }
 0x59a   : > { %v4048_v27 = vrot.slane %v4047_v43, 1  ;;  %v3902_v37 = vmul.f32 %v3901_v28, %v3804_v1 }
 0x59c   : > { %v4049_v45 = vadd.f32 %v4048_v27, %v4047_v43  ;;  %v3903_v7 = vperm.slane %v3902_v37, 0 }
 0x59e   : > { %4066 = vmatmul.f32.vlgmr.msra.gmra.mxu2 %v4049_v45  ;;  %v3904_v50 = vmul.f32 %v3903_v7, %v6578_v38  ;;  %v3905_v54 = vmul.f32 %v3903_v7, %v6580_v3  ;;  %v3906_v61 = vmul.f32 %v3903_v7, %v6582_v39  ;;  %v3907_v31 = vmul.f32 %v3903_v7, %v6584_v34  ;;  %v5324_v34 = vld [vmem:[%s6719_s10] ss:$0 sm:$0xff] }
 0x59f   : > { %v3908_v62 = vmul.f32 %v3903_v7, %v6590_v10  ;;  %v3909_v59 = vmul.f32 %v3903_v7, %v6594_v42  ;;  %v3910_v40 = vmul.f32 %v3903_v7, %v6598_v57  ;;  %v3911_v38 = vmul.f32 %v3903_v7, %v6602_v15 }
 0x5a0   : > { %v3915_v46 = vadd.f32 %v5323_v53, %v3904_v50  ;;  %v3916_v41 = vadd.f32 %v5323_v53, %v3905_v54  ;;  %v3917_v3 = vadd.f32 %v5323_v53, %v3906_v61  ;;  %v3918_v39 = vadd.f32 %v5323_v53, %v3907_v31 }
 0x5a1   : > { %v3919_v10 = vadd.f32 %v5323_v53, %v3908_v62  ;;  %v3920_v8 = vadd.f32 %v5323_v53, %v3909_v59  ;;  %v3921_v42 = vadd.f32 %v5323_v53, %v3910_v40  ;;  %v3922_v17 = vadd.f32 %v5323_v53, %v3911_v38 }
 0x621   : > { %v4067_v2 = vpop.f32.mrf.mxu2 }
 0x622   : > { %v4070_v56 = vmul.f32 0.00390625, %v4067_v2 }
 0x624   : > { %v4071_v23 = vadd.f32 1e-05, %v4070_v56 }
 0x626   : > { %5329 = vrsqrt.f32 %v4071_v23  ;;  %vm4078_vm4 = vweird.f32 %v4071_v23 }
 0x62c   : > { %v5330_v32 = vpop.eup %5329 }
 0x62d   : > { %v4073_v25 = vmul.f32 %v5330_v32, %v4071_v23  ;;  %vm4079_vm3 = vweird.f32 %v5330_v32 }
 0x62e   : > { %vm4080_vm5 = vmor %vm4078_vm4, %vm4079_vm3 }
 0x62f   : > { %v4074_v6 = vmul.f32 %v5330_v32, %v4073_v25 }
 0x631   : > { %v4075_v29 = vmul.f32 0.5, %v4074_v6 }
 0x633   : > { %v4076_v47 = vsub.f32 1.5, %v4075_v29 }
 0x635   : > { %v4077_v33 = vmul.f32 %v5330_v32, %v4076_v47 }
 0x637   : > { %v4081_v35 = vsel %vm4080_vm5, %v5330_v32, %v4077_v33 }
 0x638   : > { %v4082_v49 = vmul.f32 %v4081_v35, %v3984_v44 }
 0x63a   : > { %v4083_v5 = vperm.slane %v4082_v49, 0 }
 0x63c   : > { %v4084_v57 = vmul.f32 %v4083_v5, %v6610_v12  ;;  %v4085_v15 = vmul.f32 %v4083_v5, %v6612_v63  ;;  %v4086_v51 = vmul.f32 %v4083_v5, %v6614_v22  ;;  %v4087_v48 = vmul.f32 %v4083_v5, %v6616_v14 }
 0x63d   : > { %v4088_v52 = vmul.f32 %v4083_v5, %v6622_v20  ;;  %v4089_v16 = vmul.f32 %v4083_v5, %v6626_v36  ;;  %v4090_v24 = vmul.f32 %v4083_v5, %v6630_v21  ;;  %v4091_v26 = vmul.f32 %v4083_v5, %v6634_v13 }
 0x63e   : > { %v4095_v9 = vadd.f32 %v5324_v34, %v4084_v57  ;;  %v4096_v12 = vadd.f32 %v5324_v34, %v4085_v15  ;;  %v4097_v43 = vadd.f32 %v5324_v34, %v4086_v51  ;;  %v4098_v63 = vadd.f32 %v5324_v34, %v4087_v48 }
 0x63f   : > { %v4099_v27 = vadd.f32 %v5324_v34, %v4088_v52  ;;  %v4100_v22 = vadd.f32 %v5324_v34, %v4089_v16  ;;  %v4101_v45 = vadd.f32 %v5324_v34, %v4090_v24  ;;  %v4102_v14 = vadd.f32 %v5324_v34, %v4091_v26 }
 0x640   : > { %v4103_v19 = vadd.f32 %v4095_v9, %v3915_v46  ;;  %v4104_v30 = vadd.f32 %v4096_v12, %v3916_v41  ;;  %v4105_v58 = vadd.f32 %v4097_v43, %v3917_v3  ;;  %v4106_v20 = vadd.f32 %v4098_v63, %v3918_v39 }
 0x641   : > { %v4107_v36 = vadd.f32 %v4099_v27, %v3919_v10  ;;  %v4108_v21 = vadd.f32 %v4100_v22, %v3920_v8  ;;  %v4109_v13 = vadd.f32 %v4101_v45, %v3921_v42  ;;  %v4110_v18 = vadd.f32 %v4102_v14, %v3922_v17 }
 0x642   : > { %v4111_v55 = vmax.f32 %v4103_v19, 0.0  ;;  %v4112_v60 = vmax.f32 %v4104_v30, 0.0  ;;  %v4113_v11 = vmax.f32 %v4105_v58, 0.0  ;;  %v4114_v2 = vmax.f32 %v4106_v20, 0.0 }
 0x643   : > { %v4115_v0 = vmax.f32 %v4107_v36, 0.0  ;;  %v4116_v56 = vmax.f32 %v4108_v21, 0.0  ;;  %v4117_v23 = vmax.f32 %v4109_v13, 0.0  ;;  %v4118_v4 = vmax.f32 %v4110_v18, 0.0 }
 0x644   : > { %v5238_v1 = vpack.c.bf16 %v4112_v60, %v4111_v55  ;;  %v5243_v28 = vpack.c.bf16 %v4114_v2, %v4113_v11 }
 0x645   : > { %v5248_v32 = vpack.c.bf16 %v4116_v56, %v4115_v0  ;;  %v5253_v37 = vpack.c.bf16 %v4118_v4, %v4117_v23 }
 0x646   : > { %5239 = vst [vmem:[%s396_s21] sm:$0xff] %v5238_v1  }
 0x647   : > { %5255 = vst [vmem:[%s396_s21 + $0x8] sm:$0xff] %v5243_v28  }
 0x648   : > { %5256 = vst [vmem:[%s396_s21 + $0x10] sm:$0xff] %v5248_v32  }
 0x649   : > { %5257 = vst [vmem:[%s396_s21 + $0x18] sm:$0xff] %v5253_v37  }
 0x64a   : > { %5404 = shalt.err (!%p5401_p8)
}
 0x64b   : > { %s5449_s29 = smov 64   ;;  %s5450_s21 = smov 4  }
 0x64c   : > { %5271 = dma.vmem_to_hbm [thread:$0]  (%p5549_p5), %s4149_s16, 512, %s4151_s22, %s4136_s25, %s5449_s29, %s5449_s29, %s5450_s21  }
 0x64d PF: > { %p5283_p9 = scmp.ge.s32.totalorder %s5443_s20, 2  ;;  %s4165_s30 = sand.u32 1, %s5431_s17  }
 0x64e   : > { %s4166_s14 = scalar_lea.sflag [#allocation6], %s4165_s30 }
 0x64f   : > { %p5278_p10 = pnand %p5283_p9, %p5553_p6 }
 0x651   : > { %p5279_p11 = pneg %p5278_p10 }
 0x653   : > { %5426 = dma.done.wait (%p5279_p11), %s4166_s14, 512  }
 0x654   : > { %5428 = vsyncadd (%p5279_p11), %s4166_s14, 4294966784  ;;  %p22_p12 = scmp.ge.s32.totalorder %s5536_s23, 4   ;;  %s6733_s17 = smov %s5435_s18 }
 0x655   : > { %s6734_s18 = smov %s5439_s19  ;;  %s6735_s19 = smov %s5547_s26 }
 0x656   : > { %s6736_s20 = smov %s5536_s23  ;;  %24 = sbr.rel (!%p22_p12) target bundleno = 6 (0x6), region = 111 }
 0x65b   :  { %4172 = vsyncpa [#allocation5], 1 }
 0x65c   :  { %4174 = vsyncpa [#allocation5 + $0x1], 1 }
 0x65d   :  { %4175 = vsyncpa [#allocation6], 1 }
 0x65e   :  { %4177 = vsyncpa [#allocation6 + $0x1], 1 }

</bundles_post_ra>
